<compile_context>
chip_gen: v5e
topology: v5e:2x2
jax: 0.10.0
libtpu: 0.0.40
codegen_flags: <defaults>
</compile_context>

<pallas_src>
import functools

import jax
import jax.numpy as jnp
from jax import lax
from jax.experimental import pallas as pl
from jax.experimental.pallas import tpu as pltpu

IMAGE_SIZE = (64, 64)  # module-level global used by DeepLab.forward's final interpolate


def _rup(x, m):
    return (x + m - 1) // m * m


def _cdiv(a, b):
    return -(-a // b)


# ---------------------------------------------------------------------------
# Pallas kernels
# ---------------------------------------------------------------------------
def _matmul_bias_kernel(a_ref, b_ref, bias_ref, o_ref, acc_ref):
    k = pl.program_id(2)

    @pl.when(k == 0)
    def _():
        acc_ref[...] = jnp.zeros_like(acc_ref)

    acc_ref[...] += jnp.dot(a_ref[...], b_ref[...],
                            preferred_element_type=jnp.float32)

    @pl.when(k == pl.num_programs(2) - 1)
    def _():
        o_ref[...] = (acc_ref[...] + bias_ref[...]).astype(o_ref.dtype)


def _bn_act_kernel(x_ref, g_ref, b_ref, o_ref, *, count, fold, relu, eps):
    """Fused train-mode BN: per-channel batch stats + affine (+ReLU), whole tensor in VMEM.

    When `fold` the (m, 64) tensor was reshaped to (m//2, 128): lanes [0:64] hold even rows,
    lanes [64:128] hold odd rows of the same 64 channels, so channel sums are lane-folded.
    """
    x = x_ref[...].astype(jnp.float32)
    s = jnp.sum(x, axis=0, keepdims=True)
    sq = jnp.sum(x * x, axis=0, keepdims=True)
    if fold:
        c = s.shape[1] // 2
        s = s[:, :c] + s[:, c:]
        sq = sq[:, :c] + sq[:, c:]
    inv = 1.0 / count
    mean = s * inv
    var = jnp.maximum(sq * inv - mean * mean, 0.0)      # biased variance (PyTorch training)
    scale = g_ref[...] * lax.rsqrt(var + eps)
    shift = b_ref[...] - mean * scale
    if fold:
        scale = jnp.concatenate([scale, scale], axis=-1)
        shift = jnp.concatenate([shift, shift], axis=-1)
    y = x * scale + shift
    if relu:
        y = jnp.maximum(y, 0.0)
    o_ref[...] = y.astype(o_ref.dtype)


def _bottleneck_tail_kernel(a_ref, ga_ref, ba_ref, i_ref, gi_ref, bi_ref, o_ref,
                            *, count, has_ds, eps):
    """relu( BN(conv3_out) + [BN(downsample) or identity] ), BN stats computed in-kernel."""
    a = a_ref[...].astype(jnp.float32)
    ident = i_ref[...].astype(jnp.float32)
    inv = 1.0 / count

    sa = jnp.sum(a, axis=0, keepdims=True)
    sqa = jnp.sum(a * a, axis=0, keepdims=True)
    mean_a = sa * inv
    var_a = jnp.maximum(sqa * inv - mean_a * mean_a, 0.0)
    sc_a = ga_ref[...] * lax.rsqrt(var_a + eps)
    sh_a = ba_ref[...] - mean_a * sc_a
    y = a * sc_a + sh_a

    if has_ds:
        si = jnp.sum(ident, axis=0, keepdims=True)
        sqi = jnp.sum(ident * ident, axis=0, keepdims=True)
        mean_i = si * inv
        var_i = jnp.maximum(sqi * inv - mean_i * mean_i, 0.0)
        sc_i = gi_ref[...] * lax.rsqrt(var_i + eps)
        sh_i = bi_ref[...] - mean_i * sc_i
        y = y + ident * sc_i + sh_i
    else:
        y = y + ident

    o_ref[...] = jnp.maximum(y, 0.0).astype(o_ref.dtype)


def _sigmoid_kernel(x_ref, o_ref):
    o_ref[...] = jax.nn.sigmoid(x_ref[...])


# ---------------------------------------------------------------------------
# Pallas wrappers (called inside jitted block functions)
# ---------------------------------------------------------------------------
_VMEM_LIMIT = 32 * 1024 * 1024


def _divisor_tile(total, cap):
    """Largest multiple of 128 that divides `total` (itself a multiple of 128) and is <= cap."""
    t = min(total, max(cap // 128, 1) * 128)
    while total % t:
        t -= 128
    return t


def _matmul_tiles(m, kp, np_):
    # M: pad only to the bf16 sublane quantum (16); cap block rows at 256.
    tm = min(_rup(m, 16), 256)
    mp = _rup(m, tm)
    # K: single reduction step whenever the whole (padded) K fits comfortably in VMEM.
    tk = _divisor_tile(kp, 4608)
    # N: dense tiles up to 512; keep >= 2 N tiles when M provides no grid parallelism
    #    so the v7x megacore still has parallel work (harmless extra step on v5e/v6e).
    if mp // tm >= 2:
        tn = _divisor_tile(np_, 512)
    else:
        tn = _divisor_tile(np_, min(max(np_ // 2, 128), 512))
    return tm, tk, tn, mp


def pallas_matmul_bias(a, w, bias_row, cout):
    """a:(M,K) any float; w:(Kp,Np) pre-padded bf16; bias_row:(1,Np) f32 -> (M,cout) bf16."""
    m, k = a.shape
    kp, np_ = w.shape
    tm, tk, tn, mp = _matmul_tiles(m, kp, np_)
    ap = a.astype(jnp.bfloat16)
    if mp != m or kp != k:
        ap = jnp.pad(ap, ((0, mp - m), (0, kp - k)))
    out = pl.pallas_call(
        _matmul_bias_kernel,
        out_shape=jax.ShapeDtypeStruct((mp, np_), jnp.bfloat16),
        grid_spec=pltpu.PrefetchScalarGridSpec(
            num_scalar_prefetch=0,
            grid=(mp // tm, np_ // tn, kp // tk),
            in_specs=[pl.BlockSpec((tm, tk), lambda i, j, kk: (i, kk)),
                      pl.BlockSpec((tk, tn), lambda i, j, kk: (kk, j)),
                      # bias block index ignores kk -> stays resident across the k loop
                      pl.BlockSpec((1, tn), lambda i, j, kk: (0, j))],
            out_specs=pl.BlockSpec((tm, tn), lambda i, j, kk: (i, j)),
            scratch_shapes=[pltpu.VMEM((tm, tn), jnp.float32)]),
        compiler_params=pltpu.CompilerParams(
            dimension_semantics=("parallel", "parallel", "arbitrary"),
            vmem_limit_bytes=_VMEM_LIMIT),
    )(ap, w, bias_row)
    if mp != m:
        out = out[:m]
    if np_ != cout:
        out = out[:, :cout]
    return out


def pallas_bn_act(x2d, gamma, beta, *, relu, eps=1e-5):
    """Whole-tensor fused BN (batch stats) + affine (+ReLU). Tensor must fit in VMEM (it does
    at these shapes: <= ~0.5 MiB)."""
    m, c = x2d.shape
    fold = (c == 64) and (m % 2 == 0)          # lane-dense layout for the 64-channel tensors
    xk = x2d.reshape(m // 2, c * 2) if fold else x2d
    rows, lanes = xk.shape
    g = gamma.reshape(1, c).astype(jnp.float32)
    b = beta.reshape(1, c).astype(jnp.float32)
    out = pl.pallas_call(
        functools.partial(_bn_act_kernel, count=float(m), fold=fold, relu=relu, eps=eps),
        out_shape=jax.ShapeDtypeStruct((rows, lanes), x2d.dtype),
        grid_spec=pltpu.PrefetchScalarGridSpec(
            num_scalar_prefetch=0, grid=(1,),
            in_specs=[pl.BlockSpec((rows, lanes), lambda i: (0, 0)),
                      pl.BlockSpec((1, c), lambda i: (0, 0)),
                      pl.BlockSpec((1, c), lambda i: (0, 0))],
            out_specs=pl.BlockSpec((rows, lanes), lambda i: (0, 0))),
        compiler_params=pltpu.CompilerParams(
            dimension_semantics=("arbitrary",),
            vmem_limit_bytes=_VMEM_LIMIT),
    )(xk, g, b)
    return out.reshape(m, c) if fold else out


def pallas_bottleneck_tail(a2d, g3, b3, i2d, gi, bi, *, has_ds, eps=1e-5):
    """Fused bottleneck tail: relu(BN(a) + (BN(i) if has_ds else i)), stats in-kernel."""
    m, c = a2d.shape
    g3r = g3.reshape(1, c).astype(jnp.float32)
    b3r = b3.reshape(1, c).astype(jnp.float32)
    gir = gi.reshape(1, c).astype(jnp.float32)
    bir = bi.reshape(1, c).astype(jnp.float32)
    return pl.pallas_call(
        functools.partial(_bottleneck_tail_kernel, count=float(m), has_ds=has_ds, eps=eps),
        out_shape=jax.ShapeDtypeStruct((m, c), a2d.dtype),
        grid_spec=pltpu.PrefetchScalarGridSpec(
            num_scalar_prefetch=0, grid=(1,),
            in_specs=[pl.BlockSpec((m, c), lambda i: (0, 0)),
                      pl.BlockSpec((1, c), lambda i: (0, 0)),
                      pl.BlockSpec((1, c), lambda i: (0, 0)),
                      pl.BlockSpec((m, c), lambda i: (0, 0)),
                      pl.BlockSpec((1, c), lambda i: (0, 0)),
                      pl.BlockSpec((1, c), lambda i: (0, 0))],
            out_specs=pl.BlockSpec((m, c), lambda i: (0, 0))),
        compiler_params=pltpu.CompilerParams(
            dimension_semantics=("arbitrary",),
            vmem_limit_bytes=_VMEM_LIMIT),
    )(a2d, g3r, b3r, i2d, gir, bir)


def pallas_sigmoid(x):
    """Lane-dense sigmoid: flatten to (rows, 128) regardless of channel count."""
    shape = x.shape
    flat = x.reshape(-1)
    total = flat.shape[0]
    rows_needed = _cdiv(total, 128)
    tm = min(_rup(rows_needed, 8), 512)
    rows = _rup(rows_needed, tm)
    xp = jnp.pad(flat, (0, rows * 128 - total)).reshape(rows, 128)
    out = pl.pallas_call(
        _sigmoid_kernel,
        out_shape=jax.ShapeDtypeStruct((rows, 128), jnp.float32),
        grid_spec=pltpu.PrefetchScalarGridSpec(
            num_scalar_prefetch=0, grid=(rows // tm,),
            in_specs=[pl.BlockSpec((tm, 128), lambda i: (i, 0))],
            out_specs=pl.BlockSpec((tm, 128), lambda i: (i, 0))),
        compiler_params=pltpu.CompilerParams(
            dimension_semantics=("parallel",),
            vmem_limit_bytes=_VMEM_LIMIT),
    )(xp)
    return out.reshape(-1)[:total].reshape(shape)


# ---------------------------------------------------------------------------
# Conv / pooling / resize built on the Pallas kernels (plain-JAX glue, fused under jit)
# ---------------------------------------------------------------------------
def _im2col(x, kh, kw, stride, dilation, padding):
    # TODO(synk): im2col patch extraction stays in plain JAX; fusing the KH*KW taps into the
    #             matmul's K index_map would need strided in-block DMAs Pallas can't express.
    n, h, w, cin = x.shape
    ho = (h + 2 * padding - dilation * (kh - 1) - 1) // stride + 1
    wo = (w + 2 * padding - dilation * (kw - 1) - 1) // stride + 1
    if kh == 1 and kw == 1 and padding == 0:
        xs = x[:, ::stride, ::stride, :]
        return xs.reshape(n * ho * wo, cin), ho, wo
    xp = jnp.pad(x, ((0, 0), (padding, padding), (padding, padding), (0, 0)))
    cols = []
    for ih in range(kh):
        for iw in range(kw):
            h0 = ih * dilation
            w0 = iw * dilation
            cols.append(xp[:, h0:h0 + (ho - 1) * stride + 1:stride,
                           w0:w0 + (wo - 1) * stride + 1:stride, :])
    a = jnp.concatenate(cols, axis=-1).reshape(n * ho * wo, kh * kw * cin)
    return a, ho, wo


def conv2d(x, w2d, bias_row, kh, kw, cout, stride=1, dilation=1, padding=0):
    """x: NHWC; w2d: pre-padded bf16 (Kp,Np); bias_row: f32 (1,Np) -> NHWC bf16."""
    n = x.shape[0]
    a, ho, wo = _im2col(x, kh, kw, stride, dilation, padding)
    out = pallas_matmul_bias(a, w2d, bias_row, cout)
    return out.reshape(n, ho, wo, cout)


def bn_act_nhwc(x, gamma, beta, relu=True):
    n, h, w, c = x.shape
    y = pallas_bn_act(x.reshape(n * h * w, c), gamma, beta, relu=relu)
    return y.reshape(n, h, w, c)


def maxpool3x3_s2_p1(x):
    # TODO(synk): max-pool window reduction stays in plain JAX (lax.reduce_window glue).
    init = jnp.asarray(-jnp.inf, dtype=x.dtype)
    return lax.reduce_window(x, init, lax.max,
                             (1, 3, 3, 1), (1, 2, 2, 1),
                             ((0, 0), (1, 1), (1, 1), (0, 0)))


def bilinear_resize(x, out_h, out_w):
    """PyTorch F.interpolate(mode='bilinear', align_corners=False) semantics, NHWC."""
    # TODO(synk): the gather-based index selection has no clean Pallas equivalent; plain JAX.
    n, h, w, c = x.shape

    def src_idx(out_size, in_size):
        scale = in_size / out_size
        s = (jnp.arange(out_size, dtype=jnp.float32) + 0.5) * scale - 0.5
        s = jnp.maximum(s, 0.0)
        i0 = jnp.minimum(jnp.floor(s).astype(jnp.int32), in_size - 1)
        i1 = jnp.minimum(i0 + 1, in_size - 1)
        lam = s - i0.astype(jnp.float32)
        return i0, i1, lam

    h0, h1, lh = src_idx(out_h, h)
    w0, w1, lw = src_idx(out_w, w)
    xh = (x[:, h0, :, :] * (1.0 - lh)[None, :, None, None]
          + x[:, h1, :, :] * lh[None, :, None, None])
    xw = (xh[:, :, w0, :] * (1.0 - lw)[None, None, :, None]
          + xh[:, :, w1, :] * lw[None, None, :, None])
    return xw


# ---------------------------------------------------------------------------
# jit-compiled network blocks (glue fuses into a handful of XLA computations)
# ---------------------------------------------------------------------------
@jax.jit
def _stem_block(x, w, b, gamma, beta):
    x = conv2d(x, w, b, 7, 7, gamma.shape[0], stride=2, padding=3)
    x = bn_act_nhwc(x, gamma, beta, relu=True)
    return maxpool3x3_s2_p1(x)


@functools.partial(jax.jit, static_argnames=("stride", "has_ds"))
def _bottleneck_block(x, c1, bn1, c2, bn2, c3, bn3, ds, ds_bn, *, stride, has_ds):
    planes = bn1[0].shape[0]
    out = conv2d(x, c1[0], c1[1], 1, 1, planes)
    out = bn_act_nhwc(out, bn1[0], bn1[1], relu=True)
    out = conv2d(out, c2[0], c2[1], 3, 3, planes, stride=stride, padding=1)
    out = bn_act_nhwc(out, bn2[0], bn2[1], relu=True)
    out = conv2d(out, c3[0], c3[1], 1, 1, planes * 4)
    if has_ds:
        ident = conv2d(x, ds[0], ds[1], 1, 1, planes * 4, stride=stride)
        gi, bi = ds_bn
    else:
        ident = x
        gi, bi = bn3          # unused inside the kernel when has_ds=False
    n, h, w, c = out.shape
    y = pallas_bottleneck_tail(out.reshape(-1, c), bn3[0], bn3[1],
                               ident.reshape(-1, c), gi, bi, has_ds=has_ds)
    return y.reshape(n, h, w, c)


@jax.jit
def _aspp_fused_block(x, brw, brb, ipw, ipb, outw, outb):
    """ASPP when the feature map is smaller than every dilation: all four branches are
    centre-tap 1x1 convs fused into one matmul; image-pooling branch broadcast (exact,
    since bilinear upsample of a 1x1 map is constant)."""
    n, h, w, _ = x.shape
    branches = conv2d(x, brw, brb, 1, 1, brw.shape[1])          # (n,h,w,1024) = [x1|x2|x3|x4]
    pooled = jnp.mean(x.astype(jnp.float32), axis=(1, 2), keepdims=True)
    x5 = conv2d(pooled, ipw, ipb, 1, 1, ipw.shape[1])            # (n,1,1,256)
    x5 = jnp.broadcast_to(x5, (n, h, w, x5.shape[-1]))
    xc = jnp.concatenate([branches, x5], axis=-1)                # (n,h,w,1280)
    return conv2d(xc, outw, outb, 1, 1, outw.shape[1])


@jax.jit
def _aspp_full_block(x, c1, c2, c3, c4, ip, outp):
    """Generic ASPP fallback (used only when the feature map is not smaller than the dilations)."""
    n, h, w, _ = x.shape
    x1 = conv2d(x, c1[0], c1[1], 1, 1, 256)
    x2 = conv2d(x, c2[0], c2[1], 3, 3, 256, dilation=6, padding=6)
    x3 = conv2d(x, c3[0], c3[1], 3, 3, 256, dilation=12, padding=12)
    x4 = conv2d(x, c4[0], c4[1], 3, 3, 256, dilation=18, padding=18)
    pooled = jnp.mean(x.astype(jnp.float32), axis=(1, 2), keepdims=True)
    x5 = conv2d(pooled, ip[0], ip[1], 1, 1, 256)
    x5 = jnp.broadcast_to(x5, (n, h, w, 256))
    xc = jnp.concatenate([x1, x2, x3, x4, x5], axis=-1)
    return conv2d(xc, outp[0], outp[1], 1, 1, 256)


@functools.partial(jax.jit, static_argnames=("num_classes", "out_h", "out_w"))
def _head_block(x, fcw, fcb, *, num_classes, out_h, out_w):
    logits = conv2d(x, fcw, fcb, 1, 1, num_classes)
    logits = bilinear_resize(logits.astype(jnp.float32), out_h, out_w)
    return pallas_sigmoid(logits)


# ---------------------------------------------------------------------------
# Deterministic parameter construction (synthetic weights, shapes match torchvision)
# ---------------------------------------------------------------------------
class ParamGen:
    def __init__(self, seed=0):
        self.key = jax.random.PRNGKey(seed)

    def conv(self, kh, kw, cin, cout, bias=False):
        self.key, k1, k2 = jax.random.split(self.key, 3)
        fan_in = kh * kw * cin
        w = jax.random.normal(k1, (kh, kw, cin, cout), jnp.float32) / jnp.sqrt(float(fan_in))
        b = jax.random.normal(k2, (cout,), jnp.float32) * 0.01 if bias else None
        return w, b

    def bn(self, c):
        return jnp.ones((c,), jnp.float32), jnp.zeros((c,), jnp.float32)


def _prep_conv(w, b=None):
    """(KH,KW,Cin,Cout) f32 weight -> pre-padded bf16 (Kp,Np) matrix + f32 (1,Np) bias row."""
    kh, kw, cin, cout = w.shape
    k = kh * kw * cin
    kp, np_ = _rup(k, 128), _rup(cout, 128)
    w2 = jnp.pad(w.reshape(k, cout), ((0, kp - k), (0, np_ - cout))).astype(jnp.bfloat16)
    bias = jnp.zeros((cout,), jnp.float32) if b is None else b
    bias_row = jnp.pad(bias, (0, np_ - cout)).reshape(1, np_).astype(jnp.float32)
    return w2, bias_row


def make_bottleneck_params(pg, inplanes, planes, stride):
    has_ds = stride != 1 or inplanes != planes * 4
    return {
        "stride": stride, "has_ds": has_ds,
        "c1": _prep_conv(pg.conv(1, 1, inplanes, planes)[0]), "bn1": pg.bn(planes),
        "c2": _prep_conv(pg.conv(3, 3, planes, planes)[0]),   "bn2": pg.bn(planes),
        "c3": _prep_conv(pg.conv(1, 1, planes, planes * 4)[0]), "bn3": pg.bn(planes * 4),
        "ds": _prep_conv(pg.conv(1, 1, inplanes, planes * 4)[0]) if has_ds else None,
        "ds_bn": pg.bn(planes * 4) if has_ds else None,
    }


def _backbone_out_hw(size):
    s = (size + 2 * 3 - 7) // 2 + 1       # stem conv 7x7 s2 p3
    s = (s + 2 * 1 - 3) // 2 + 1          # maxpool 3x3 s2 p1
    for _ in range(3):                    # layer2..4 stride-2 3x3 convs
        s = (s + 2 * 1 - 3) // 2 + 1
    return s


def build_aspp_params(pg, feat_hw):
    c1w, c1b = pg.conv(1, 1, 2048, 256, bias=True)
    c2w, c2b = pg.conv(3, 3, 2048, 256, bias=True)
    c3w, c3b = pg.conv(3, 3, 2048, 256, bias=True)
    c4w, c4b = pg.conv(3, 3, 2048, 256, bias=True)
    ipw, ipb = pg.conv(1, 1, 2048, 256, bias=True)
    outw, outb = pg.conv(1, 1, 256 * 5, 256, bias=True)
    # When dilation >= feature size, every non-centre tap of the dilated 3x3 lands entirely
    # in zero padding, so each branch is exactly its centre-tap 1x1 conv.
    fused_ok = 6 >= max(feat_hw)
    p = {"fused": fused_ok, "ip": _prep_conv(ipw, ipb), "out": _prep_conv(outw, outb)}
    if fused_ok:
        wf = jnp.concatenate([c1w[0, 0], c2w[1, 1], c3w[1, 1], c4w[1, 1]], axis=-1)
        bf = jnp.concatenate([c1b, c2b, c3b, c4b])
        p["branches"] = _prep_conv(wf[None, None], bf)          # (2048, 1024) fused matmul
    else:
        p["c1"] = _prep_conv(c1w, c1b)
        p["c2"] = _prep_conv(c2w, c2b)
        p["c3"] = _prep_conv(c3w, c3b)
        p["c4"] = _prep_conv(c4w, c4b)
    return p


def build_deeplab_params(num_classes=1, seed=0):
    pg = ParamGen(seed)
    stem_w, _ = pg.conv(7, 7, 3, 64)
    params = {"stem": {"conv": _prep_conv(stem_w), "bn": pg.bn(64)}, "layers": []}
    inplanes = 64
    for planes, nblocks, stride in [(64, 3, 1), (128, 4, 2), (256, 6, 2), (512, 3, 2)]:
        blocks = []
        for bi in range(nblocks):
            s = stride if bi == 0 else 1
            blocks.append(make_bottleneck_params(pg, inplanes, planes, s))
            inplanes = planes * 4
        params["layers"].append(blocks)
    feat = (_backbone_out_hw(IMAGE_SIZE[0]), _backbone_out_hw(IMAGE_SIZE[1]))
    params["aspp"] = build_aspp_params(pg, feat)
    fcw, fcb = pg.conv(1, 1, 256, num_classes, bias=True)
    params["fc"] = _prep_conv(fcw, fcb)
    params["num_classes"] = num_classes
    return params


# ---------------------------------------------------------------------------
# Forward pass
# ---------------------------------------------------------------------------
def deeplab_forward(x_nchw, params):
    x = jnp.transpose(x_nchw, (0, 2, 3, 1))                     # NCHW -> NHWC
    st = params["stem"]
    x = _stem_block(x, st["conv"][0], st["conv"][1], st["bn"][0], st["bn"][1])
    for blocks in params["layers"]:
        for bp in blocks:
            x = _bottleneck_block(x, bp["c1"], bp["bn1"], bp["c2"], bp["bn2"],
                                  bp["c3"], bp["bn3"], bp["ds"], bp["ds_bn"],
                                  stride=bp["stride"], has_ds=bp["has_ds"])
    ap = params["aspp"]
    if ap["fused"]:
        x = _aspp_fused_block(x, ap["branches"][0], ap["branches"][1],
                              ap["ip"][0], ap["ip"][1], ap["out"][0], ap["out"][1])
    else:
        x = _aspp_full_block(x, ap["c1"], ap["c2"], ap["c3"], ap["c4"], ap["ip"], ap["out"])
    x = _head_block(x, params["fc"][0], params["fc"][1],
                    num_classes=params["num_classes"],
                    out_h=IMAGE_SIZE[0], out_w=IMAGE_SIZE[1])
    return jnp.transpose(x, (0, 3, 1, 2))                       # back to NCHW


# ---------------------------------------------------------------------------
if __name__ == "__main__":
    key = jax.random.PRNGKey(0)
    x = jax.random.normal(key, (2, 3, IMAGE_SIZE[0], IMAGE_SIZE[1]), jnp.float32)

    params = build_deeplab_params(num_classes=1, seed=0)
    y = deeplab_forward(x, params)
    y = jax.block_until_ready(y)

    assert y.shape == (2, 1, IMAGE_SIZE[0], IMAGE_SIZE[1]), y.shape
    assert bool(jnp.all(jnp.isfinite(y)))
    assert bool(jnp.all((y >= 0.0) & (y <= 1.0)))                # sigmoid output range
    print("KERNEL_OK")
</pallas_src>

<mosaic_0001>
module attributes {stable_mosaic.version = 11 : i64} {
  func.func @_matmul_bias_kernel(%arg0: i32, %arg1: i32, %arg2: i32, %arg3: memref<256x256xbf16, #tpu.memory_space<vmem>>, %arg4: memref<256x128xbf16, #tpu.memory_space<vmem>>, %arg5: memref<1x128xf32, #tpu.memory_space<vmem>>, %arg6: memref<256x128xbf16, #tpu.memory_space<vmem>>, %arg7: memref<256x128xf32, #tpu.memory_space<vmem>>) attributes {dimension_semantics = [#tpu.dimension_semantics<parallel>, #tpu.dimension_semantics<parallel>, #tpu.dimension_semantics<arbitrary>], iteration_bounds = array<i64: 8, 1, 1>, scalar_prefetch = 0 : i64, scratch_operands = 1 : i64, tpu.core_type = #tpu.core_type<tc>, window_params = [{transform_indices = @transform_0, window_bounds = array<i64: 256, 256>}, {transform_indices = @transform_1, window_bounds = array<i64: 256, 128>}, {transform_indices = @transform_2, window_bounds = array<i64: 1, 128>}, {transform_indices = @transform_3, window_bounds = array<i64: 256, 128>}]} {
    %c0_i32 = arith.constant 0 : i32
    %0 = arith.cmpi eq, %arg2, %c0_i32 : i32
    %1 = arith.extui %0 : i1 to i32
    %c0_i32_0 = arith.constant 0 : i32
    %2 = arith.cmpi ne, %1, %c0_i32_0 : i32
    scf.if %2 {
      %cst_10 = arith.constant 0.000000e+00 : f32
      %12 = vector.broadcast %cst_10 : f32 to vector<256x128xf32>
      %c0_11 = arith.constant 0 : index
      %c0_12 = arith.constant 0 : index
      %13 = vector.load %arg7[%c0_11, %c0_12] : memref<256x128xf32, #tpu.memory_space<vmem>>, vector<256x128xf32>
      tpu.vector_store %arg7[%c0_11, %c0_12], %12 {strides = array<i32>} : memref<256x128xf32, #tpu.memory_space<vmem>>, vector<256x128xf32>,
    } else {
    }
    %c0 = arith.constant 0 : index
    %c0_1 = arith.constant 0 : index
    %3 = vector.load %arg7[%c0, %c0_1] : memref<256x128xf32, #tpu.memory_space<vmem>>, vector<256x128xf32>
    %c0_2 = arith.constant 0 : index
    %c0_3 = arith.constant 0 : index
    %4 = vector.load %arg3[%c0_2, %c0_3] : memref<256x256xbf16, #tpu.memory_space<vmem>>, vector<256x256xbf16>
    %c0_4 = arith.constant 0 : index
    %c0_5 = arith.constant 0 : index
    %5 = vector.load %arg4[%c0_4, %c0_5] : memref<256x128xbf16, #tpu.memory_space<vmem>>, vector<256x128xbf16>
    %cst = arith.constant dense<0.000000e+00> : vector<256x128xf32>
    %6 = tpu.matmul %4, %5, %cst {dimension_numbers = #tpu.dot_dimension_numbers<[1], [0], [0], [1], [0, 0, 1, 1], [], []>} : vector<256x256xbf16>, vector<256x128xbf16>, vector<256x128xf32> -> vector<256x128xf32>
    %7 = arith.addf %3, %6 : vector<256x128xf32>
    %c0_6 = arith.constant 0 : index
    %c0_7 = arith.constant 0 : index
    %8 = vector.load %arg7[%c0_6, %c0_7] : memref<256x128xf32, #tpu.memory_space<vmem>>, vector<256x128xf32>
    tpu.vector_store %arg7[%c0_6, %c0_7], %7 {strides = array<i32>} : memref<256x128xf32, #tpu.memory_space<vmem>>, vector<256x128xf32>,
    %c0_i32_8 = arith.constant 0 : i32
    %9 = arith.cmpi eq, %arg2, %c0_i32_8 : i32
    %10 = arith.extui %9 : i1 to i32
    %c0_i32_9 = arith.constant 0 : i32
    %11 = arith.cmpi ne, %10, %c0_i32_9 : i32
    scf.if %11 {
      %c0_10 = arith.constant 0 : index
      %c0_11 = arith.constant 0 : index
      %12 = vector.load %arg7[%c0_10, %c0_11] : memref<256x128xf32, #tpu.memory_space<vmem>>, vector<256x128xf32>
      %c0_12 = arith.constant 0 : index
      %c0_13 = arith.constant 0 : index
      %13 = vector.load %arg5[%c0_12, %c0_13] : memref<1x128xf32, #tpu.memory_space<vmem>>, vector<1x128xf32>
      %14 = vector.broadcast %13 : vector<1x128xf32> to vector<256x128xf32>
      %15 = arith.addf %12, %14 : vector<256x128xf32>
      %16 = arith.truncf %15 : vector<256x128xf32> to vector<256x128xbf16>
      %c0_14 = arith.constant 0 : index
      %c0_15 = arith.constant 0 : index
      %17 = vector.load %arg6[%c0_14, %c0_15] : memref<256x128xbf16, #tpu.memory_space<vmem>>, vector<256x128xbf16>
      tpu.vector_store %arg6[%c0_14, %c0_15], %16 {strides = array<i32>} : memref<256x128xbf16, #tpu.memory_space<vmem>>, vector<256x128xbf16>,
    } else {
    }
    return
  }
  func.func @transform_0(%arg0: i32, %arg1: i32, %arg2: i32) -> (i32, i32) {
    %c0_i32 = arith.constant 0 : i32
    return %arg0, %arg2 : i32, i32
  }
  func.func @transform_1(%arg0: i32, %arg1: i32, %arg2: i32) -> (i32, i32) {
    %c0_i32 = arith.constant 0 : i32
    return %arg2, %arg1 : i32, i32
  }
  func.func @transform_2(%arg0: i32, %arg1: i32, %arg2: i32) -> (i32, i32) {
    %c0_i32 = arith.constant 0 : i32
    %c0_i32_0 = arith.constant 0 : i32
    return %c0_i32, %arg1 : i32, i32
  }
  func.func @transform_3(%arg0: i32, %arg1: i32, %arg2: i32) -> (i32, i32) {
    %c0_i32 = arith.constant 0 : i32
    return %arg0, %arg1 : i32, i32
  }
}

module attributes {stable_mosaic.version = 11 : i64} {
  func.func @_bn_act_kernel(%arg0: i32, %arg1: memref<1024x128xbf16, #tpu.memory_space<vmem>>, %arg2: memref<1x64xf32, #tpu.memory_space<vmem>>, %arg3: memref<1x64xf32, #tpu.memory_space<vmem>>, %arg4: memref<1024x128xbf16, #tpu.memory_space<vmem>>) attributes {dimension_semantics = [#tpu.dimension_semantics<arbitrary>], iteration_bounds = array<i64: 1>, scalar_prefetch = 0 : i64, scratch_operands = 0 : i64, tpu.core_type = #tpu.core_type<tc>, window_params = [{pipeline_mode = #tpu.pipeline_mode<synchronous>, transform_indices = @transform_0, window_bounds = array<i64: 1024, 128>}, {pipeline_mode = #tpu.pipeline_mode<synchronous>, transform_indices = @transform_1, window_bounds = array<i64: 1, 64>}, {pipeline_mode = #tpu.pipeline_mode<synchronous>, transform_indices = @transform_2, window_bounds = array<i64: 1, 64>}, {pipeline_mode = #tpu.pipeline_mode<synchronous>, transform_indices = @transform_3, window_bounds = array<i64: 1024, 128>}]} {
    %c0 = arith.constant 0 : index
    %c0_0 = arith.constant 0 : index
    %0 = vector.load %arg1[%c0, %c0_0] : memref<1024x128xbf16, #tpu.memory_space<vmem>>, vector<1024x128xbf16>
    %1 = arith.extf %0 : vector<1024x128xbf16> to vector<1024x128xf32>
    %cst = arith.constant dense<0.000000e+00> : vector<128xf32>
    %2 = vector.multi_reduction <add>, %1, %cst [0] : vector<1024x128xf32> to vector<128xf32>
    %3 = vector.shape_cast %2 : vector<128xf32> to vector<1x128xf32>
    %4 = arith.mulf %1, %1 : vector<1024x128xf32>
    %cst_1 = arith.constant dense<0.000000e+00> : vector<128xf32>
    %5 = vector.multi_reduction <add>, %4, %cst_1 [0] : vector<1024x128xf32> to vector<128xf32>
    %6 = vector.shape_cast %5 : vector<128xf32> to vector<1x128xf32>
    %7 = vector.extract_strided_slice %3 {offsets = [0, 0], sizes = [1, 64], strides = [1, 1]} : vector<1x128xf32> to vector<1x64xf32>
    %8 = vector.extract_strided_slice %3 {offsets = [0, 64], sizes = [1, 64], strides = [1, 1]} : vector<1x128xf32> to vector<1x64xf32>
    %9 = arith.addf %7, %8 : vector<1x64xf32>
    %10 = vector.extract_strided_slice %6 {offsets = [0, 0], sizes = [1, 64], strides = [1, 1]} : vector<1x128xf32> to vector<1x64xf32>
    %11 = vector.extract_strided_slice %6 {offsets = [0, 64], sizes = [1, 64], strides = [1, 1]} : vector<1x128xf32> to vector<1x64xf32>
    %12 = arith.addf %10, %11 : vector<1x64xf32>
    %cst_2 = arith.constant 4.8828125E-4 : f32
    %13 = vector.broadcast %cst_2 : f32 to vector<1x64xf32>
    %14 = arith.mulf %9, %13 : vector<1x64xf32>
    %cst_3 = arith.constant 4.8828125E-4 : f32
    %15 = vector.broadcast %cst_3 : f32 to vector<1x64xf32>
    %16 = arith.mulf %12, %15 : vector<1x64xf32>
    %17 = arith.mulf %14, %14 : vector<1x64xf32>
    %18 = arith.subf %16, %17 : vector<1x64xf32>
    %cst_4 = arith.constant 0.000000e+00 : f32
    %19 = vector.broadcast %cst_4 : f32 to vector<1x64xf32>
    %20 = arith.maximumf %18, %19 : vector<1x64xf32>
    %c0_5 = arith.constant 0 : index
    %c0_6 = arith.constant 0 : index
    %21 = vector.load %arg2[%c0_5, %c0_6] : memref<1x64xf32, #tpu.memory_space<vmem>>, vector<1x64xf32>
    %cst_7 = arith.constant 9.99999974E-6 : f32
    %22 = vector.broadcast %cst_7 : f32 to vector<1x64xf32>
    %23 = arith.addf %20, %22 : vector<1x64xf32>
    %24 = math.rsqrt %23 : vector<1x64xf32>
    %25 = arith.mulf %21, %24 : vector<1x64xf32>
    %c0_8 = arith.constant 0 : index
    %c0_9 = arith.constant 0 : index
    %26 = vector.load %arg3[%c0_8, %c0_9] : memref<1x64xf32, #tpu.memory_space<vmem>>, vector<1x64xf32>
    %27 = arith.mulf %14, %25 : vector<1x64xf32>
    %28 = arith.subf %26, %27 : vector<1x64xf32>
    %29 = tpu.concatenate %25, %25 in 1 : vector<1x64xf32>, vector<1x64xf32> -> vector<1x128xf32>
    %30 = tpu.concatenate %28, %28 in 1 : vector<1x64xf32>, vector<1x64xf32> -> vector<1x128xf32>
    %31 = vector.broadcast %29 : vector<1x128xf32> to vector<1024x128xf32>
    %32 = arith.mulf %1, %31 : vector<1024x128xf32>
    %33 = vector.broadcast %30 : vector<1x128xf32> to vector<1024x128xf32>
    %34 = arith.addf %32, %33 : vector<1024x128xf32>
    %cst_10 = arith.constant 0.000000e+00 : f32
    %35 = vector.broadcast %cst_10 : f32 to vector<1024x128xf32>
    %36 = arith.maximumf %34, %35 : vector<1024x128xf32>
    %37 = arith.truncf %36 : vector<1024x128xf32> to vector<1024x128xbf16>
    %c0_11 = arith.constant 0 : index
    %c0_12 = arith.constant 0 : index
    %38 = vector.load %arg4[%c0_11, %c0_12] : memref<1024x128xbf16, #tpu.memory_space<vmem>>, vector<1024x128xbf16>
    tpu.vector_store %arg4[%c0_11, %c0_12], %37 {strides = array<i32>} : memref<1024x128xbf16, #tpu.memory_space<vmem>>, vector<1024x128xbf16>,
    return
  }
  func.func @transform_0(%arg0: i32) -> (i32, i32) {
    %c0_i32 = arith.constant 0 : i32
    %c0_i32_0 = arith.constant 0 : i32
    %c0_i32_1 = arith.constant 0 : i32
    return %c0_i32, %c0_i32_0 : i32, i32
  }
  func.func @transform_1(%arg0: i32) -> (i32, i32) {
    %c0_i32 = arith.constant 0 : i32
    %c0_i32_0 = arith.constant 0 : i32
    %c0_i32_1 = arith.constant 0 : i32
    return %c0_i32, %c0_i32_0 : i32, i32
  }
  func.func @transform_2(%arg0: i32) -> (i32, i32) {
    %c0_i32 = arith.constant 0 : i32
    %c0_i32_0 = arith.constant 0 : i32
    %c0_i32_1 = arith.constant 0 : i32
    return %c0_i32, %c0_i32_0 : i32, i32
  }
  func.func @transform_3(%arg0: i32) -> (i32, i32) {
    %c0_i32 = arith.constant 0 : i32
    %c0_i32_0 = arith.constant 0 : i32
    %c0_i32_1 = arith.constant 0 : i32
    return %c0_i32, %c0_i32_0 : i32, i32
  }
}

</mosaic_0001>

<bundles_post_ra>
// kernel: _stem_block.2
= control target key start
LH: loop header
LB: loop body
LE: loop exit
PB: predicated region body
PF: predicated region fallthrough
CT: control target
= control target key end

     0   :  { %s1581_s12 = smov 0   ;;  %s1583_s13 = smov 0   ;;  %s1790_s0 = inlined_call_operand.vmem [shape: bf16[2048,256], index: 0, kind: input, shape index: {}]   ;;  %s1791_s1 = inlined_call_operand.vmem [shape: bf16[256,128], index: 1, kind: input, shape index: {}]   ;;  %s1792_s2 = inlined_call_operand.vmem [shape: f32[1,128], index: 2, kind: input, shape index: {}]   ;;  %s1793_s3 = inlined_call_operand.vmem [shape: bf16[2048,128], index: 3, kind: output, shape index: {}]  }
   0x1   :  { %s1585_s14 = smov 0  }
   0x2 LB: > { %s32_s15 = sadd.s32 1, %s1555_s13  ;;  %p1152_p0 = scmp.ge.s32.totalorder %s1559_s14, 1  ;;  %s1559_s14 = sphi %s1585_s14, %s13_s14   ;;  %s1555_s13 = sphi %s1583_s13, %s1795_s13   ;;  %s1551_s12 = sphi %s1581_s12, %s1794_s12  }
   0x3   : > { %p34_p1 = scmp.ge.s32.totalorder %s32_s15, 8  ;;  %p191_p2 = scmp.lt.s32.totalorder %s1559_s14, 9 }
   0x5   : > { %s1797_s15 = smov (%p34_p1, %s32_s15), 0  ;;  %p192_p3 = pnand %p1152_p0, %p191_p2 }
   0x6   : > { %s1153_s28 = sshll.u32 (!%p192_p3), %s1551_s12, 5 }
   0x7   : > { %195 = sbr.rel (%p192_p3) target bundleno = 304 (0x130), region = 32  ;;  %p236_p4 = scmp.lt.s32.totalorder (!%p192_p3), %s1153_s28, 255 }
   0xc   : > { %v1392_v0 = vld [vmem:[%s1791_s1 + $0x38] sm:$0xff]  ;;  %v1391_v2 = vld [vmem:[%s1791_s1 + $0x30] sm:$0xff]  ;;  %v1390_v4 = vld [vmem:[%s1791_s1 + $0x28] sm:$0xff]  ;;  %s1799_s28 = smov (!%p236_p4, %s1153_s28), 255 }
   0xd   : > { %v1400_v1 = vld [vmem:[%s1791_s1 + $0x78] sm:$0xff]  ;;  %655 = vmatpush.bf16.msra.mxu0 %v1392_v0  ;;  %1496 = vmatpush.bf16.msra.mxu2 %v1392_v0  ;;  %v1399_v3 = vld [vmem:[%s1791_s1 + $0x70] sm:$0xff]  ;;  %v1398_v5 = vld [vmem:[%s1791_s1 + $0x68] sm:$0xff]  ;;  %s1352_s17 = sshll.u32 %s1799_s28, 3  ;;  %s1157_s5 = sshll.u32 %s1799_s28, 2 }
   0xe   : > { %744 = vmatpush.bf16.msra.mxu1 %v1400_v1  ;;  %1504 = vmatpush.bf16.msra.mxu3 %v1400_v1  ;;  %v1389_v6 = vld [vmem:[%s1791_s1 + $0x20] sm:$0xff]  ;;  %v1388_v8 = vld [vmem:[%s1791_s1 + $0x18] sm:$0xff]  ;;  %v1387_v10 = vld [vmem:[%s1791_s1 + $0x10] sm:$0xff]  ;;  %s1647_s22 = scalar_lea.vmem %s1790_s0, %s1352_s17  ;;  %s1733_s8 = scalar_lea.vmem %s1793_s3, %s1157_s5 }
   0xf   : > { %v1397_v7 = vld [vmem:[%s1791_s1 + $0x60] sm:$0xff]  ;;  %v1396_v9 = vld [vmem:[%s1791_s1 + $0x58] sm:$0xff]  ;;  %v1395_v11 = vld [vmem:[%s1791_s1 + $0x50] sm:$0xff] }
  0x10   : > { %v1386_v12 = vld [vmem:[%s1791_s1 + $0x8] sm:$0xff]  ;;  %v1385_v14 = vld [vmem:[%s1791_s1] sm:$0xff]  ;;  %v1168_v28 = vld [vmem:[%s1647_s22 + $0x10] sm:$0xf] }
  0x11   : > { %656 = vmatpush.bf16.msra.mxu0 %v1391_v2  ;;  %1497 = vmatpush.bf16.msra.mxu2 %v1391_v2  ;;  %v1394_v13 = vld [vmem:[%s1791_s1 + $0x48] sm:$0xff]  ;;  %v1393_v15 = vld [vmem:[%s1791_s1 + $0x40] sm:$0xff]  ;;  %v1356_v29 = vld [vmem:[%s1647_s22 + $0x14] sm:$0xf0] }
  0x12   : > { %745 = vmatpush.bf16.msra.mxu1 %v1399_v3  ;;  %1505 = vmatpush.bf16.msra.mxu3 %v1399_v3  ;;  %v1160_v16 = vld [vmem:[%s1647_s22] sm:$0xf]  ;;  %v1354_v17 = vld [vmem:[%s1647_s22 + $0x4] sm:$0xf0]  ;;  %v1353_v20 = vld [vmem:[%s1647_s22 + $0x4] sm:$0xf]  ;;  %v1169_v36 = vor.u32 %v1356_v29, %v1168_v28 }
  0x13   : > { %v1224_v18 = vld [vmem:[%s1647_s22 + $0x80] sm:$0xf]  ;;  %v1370_v19 = vld [vmem:[%s1647_s22 + $0x84] sm:$0xf0]  ;;  %v1162_v21 = vld [vmem:[%s1647_s22 + $0x8] sm:$0xf0]  ;;  %v1161_v24 = vor.u32 %v1354_v17, %v1160_v16 }
  0x14   : > { %v1369_v22 = vld [vmem:[%s1647_s22 + $0x84] sm:$0xf]  ;;  %v1226_v23 = vld [vmem:[%s1647_s22 + $0x88] sm:$0xf0]  ;;  %v1225_v25 = vor.u32 %v1370_v19, %v1224_v18  ;;  %v1165_v26 = vor.u32 %v1353_v20, %v1162_v21  ;;  %v1232_v30 = vld [vmem:[%s1647_s22 + $0x90] sm:$0xf] }
  0x15   : > { %657 = vmatpush.bf16.msra.mxu0 %v1390_v4  ;;  %1498 = vmatpush.bf16.msra.mxu2 %v1390_v4  ;;  %v1229_v27 = vor.u32 %v1369_v22, %v1226_v23  ;;  %v1372_v31 = vld [vmem:[%s1647_s22 + $0x94] sm:$0xf0]  ;;  %v1355_v32 = vld [vmem:[%s1647_s22 + $0x14] sm:$0xf]  ;;  %v1170_v33 = vld [vmem:[%s1647_s22 + $0x18] sm:$0xf0] }
  0x16   : > { %746 = vmatpush.bf16.msra.mxu1 %v1398_v5  ;;  %1506 = vmatpush.bf16.msra.mxu3 %v1398_v5  ;;  %v1371_v34 = vld [vmem:[%s1647_s22 + $0x94] sm:$0xf]  ;;  %v1234_v35 = vld [vmem:[%s1647_s22 + $0x98] sm:$0xf0]  ;;  %v1233_v37 = vor.u32 %v1372_v31, %v1232_v30  ;;  %v1173_v38 = vor.u32 %v1355_v32, %v1170_v33  ;;  %v1176_v40 = vld [vmem:[%s1647_s22 + $0x20] sm:$0xf] }
  0x17   : > { %v1237_v39 = vor.u32 %v1371_v34, %v1234_v35  ;;  %v1358_v41 = vld [vmem:[%s1647_s22 + $0x24] sm:$0xf0]  ;;  %v1240_v42 = vld [vmem:[%s1647_s22 + $0xa0] sm:$0xf]  ;;  %v1357_v44 = vld [vmem:[%s1647_s22 + $0x24] sm:$0xf] }
  0x18   : > { %v1374_v43 = vld [vmem:[%s1647_s22 + $0xa4] sm:$0xf0]  ;;  %v1178_v45 = vld [vmem:[%s1647_s22 + $0x28] sm:$0xf0]  ;;  %v1373_v46 = vld [vmem:[%s1647_s22 + $0xa4] sm:$0xf]  ;;  %v1177_v48 = vor.u32 %v1358_v41, %v1176_v40 }
  0x19   : > { %658 = vmatpush.bf16.msra.mxu0 %v1389_v6  ;;  %1499 = vmatpush.bf16.msra.mxu2 %v1389_v6  ;;  %v1242_v47 = vld [vmem:[%s1647_s22 + $0xa8] sm:$0xf0]  ;;  %v1241_v49 = vor.u32 %v1374_v43, %v1240_v42  ;;  %v1181_v50 = vor.u32 %v1357_v44, %v1178_v45  ;;  %v1184_v52 = vld [vmem:[%s1647_s22 + $0x30] sm:$0xf]  ;;  %v1360_v53 = vld [vmem:[%s1647_s22 + $0x34] sm:$0xf0] }
  0x1a   : > { %747 = vmatpush.bf16.msra.mxu1 %v1397_v7  ;;  %1507 = vmatpush.bf16.msra.mxu3 %v1397_v7  ;;  %v1245_v51 = vor.u32 %v1373_v46, %v1242_v47  ;;  %v1248_v54 = vld [vmem:[%s1647_s22 + $0xb0] sm:$0xf]  ;;  %v1376_v55 = vld [vmem:[%s1647_s22 + $0xb4] sm:$0xf0]  ;;  %v1359_v56 = vld [vmem:[%s1647_s22 + $0x34] sm:$0xf]  ;;  %v1185_v60 = vor.u32 %v1360_v53, %v1184_v52 }
  0x1b   : > { %v1186_v57 = vld [vmem:[%s1647_s22 + $0x38] sm:$0xf0]  ;;  %v1375_v58 = vld [vmem:[%s1647_s22 + $0xb4] sm:$0xf]  ;;  %v1249_v61 = vor.u32 %v1376_v55, %v1248_v54  ;;  %v1192_v0 = vld [vmem:[%s1647_s22 + $0x40] sm:$0xf] }
  0x1c   : > { %v1250_v59 = vld [vmem:[%s1647_s22 + $0xb8] sm:$0xf0]  ;;  %v1189_v62 = vor.u32 %v1359_v56, %v1186_v57  ;;  %v1362_v1 = vld [vmem:[%s1647_s22 + $0x44] sm:$0xf0]  ;;  %v1256_v2 = vld [vmem:[%s1647_s22 + $0xc0] sm:$0xf] }
  0x1d   : > { %659 = vmatpush.bf16.msra.mxu0 %v1388_v8  ;;  %1500 = vmatpush.bf16.msra.mxu2 %v1388_v8  ;;  %v1253_v63 = vor.u32 %v1375_v58, %v1250_v59  ;;  %v1378_v3 = vld [vmem:[%s1647_s22 + $0xc4] sm:$0xf0]  ;;  %v1361_v4 = vld [vmem:[%s1647_s22 + $0x44] sm:$0xf]  ;;  %v1194_v5 = vld [vmem:[%s1647_s22 + $0x48] sm:$0xf0]  ;;  %v1193_v8 = vor.u32 %v1362_v1, %v1192_v0 }
  0x1e   : > { %748 = vmatpush.bf16.msra.mxu1 %v1396_v9  ;;  %1508 = vmatpush.bf16.msra.mxu3 %v1396_v9  ;;  %v1377_v6 = vld [vmem:[%s1647_s22 + $0xc4] sm:$0xf]  ;;  %v1258_v7 = vld [vmem:[%s1647_s22 + $0xc8] sm:$0xf0]  ;;  %v1257_v9 = vor.u32 %v1378_v3, %v1256_v2  ;;  %v1363_v16 = vld [vmem:[%s1647_s22 + $0x54] sm:$0xf] }
  0x1f   : > { %v1202_v17 = vld [vmem:[%s1647_s22 + $0x58] sm:$0xf0]  ;;  %v1379_v18 = vld [vmem:[%s1647_s22 + $0xd4] sm:$0xf]  ;;  %v1365_v28 = vld [vmem:[%s1647_s22 + $0x64] sm:$0xf] }
  0x20   : > { %v1266_v19 = vld [vmem:[%s1647_s22 + $0xd8] sm:$0xf0]  ;;  %v1205_v22 = vor.u32 %v1363_v16, %v1202_v17  ;;  %v1210_v29 = vld [vmem:[%s1647_s22 + $0x68] sm:$0xf0]  ;;  %v1381_v30 = vld [vmem:[%s1647_s22 + $0xe4] sm:$0xf] }
  0x21   : > { %660 = vmatpush.bf16.msra.mxu0 %v1387_v10  ;;  %1501 = vmatpush.bf16.msra.mxu2 %v1387_v10  ;;  %v1197_v10 = vor.u32 %v1361_v4, %v1194_v5  ;;  %v1269_v23 = vor.u32 %v1379_v18, %v1266_v19  ;;  %v1274_v31 = vld [vmem:[%s1647_s22 + $0xe8] sm:$0xf0]  ;;  %v1213_v34 = vor.u32 %v1365_v28, %v1210_v29  ;;  %v1367_v40 = vld [vmem:[%s1647_s22 + $0x74] sm:$0xf]  ;;  %v1218_v41 = vld [vmem:[%s1647_s22 + $0x78] sm:$0xf0] }
  0x22   : > { %749 = vmatpush.bf16.msra.mxu1 %v1395_v11  ;;  %1509 = vmatpush.bf16.msra.mxu3 %v1395_v11  ;;  %v1261_v11 = vor.u32 %v1377_v6, %v1258_v7  ;;  %v1277_v35 = vor.u32 %v1381_v30, %v1274_v31  ;;  %v1383_v42 = vld [vmem:[%s1647_s22 + $0xf4] sm:$0xf]  ;;  %v1282_v43 = vld [vmem:[%s1647_s22 + $0xf8] sm:$0xf0]  ;;  %v1221_v46 = vor.u32 %v1367_v40, %v1218_v41  ;;  %v1725_v53 = vld [vmem:[%s1792_s2] ss:$0 sm:$0xff] }
  0x23   : > { %v1285_v47 = vor.u32 %v1383_v42, %v1282_v43 }
  0x25   : > { %661 = vmatpush.bf16.msra.mxu0 %v1386_v12  ;;  %1502 = vmatpush.bf16.msra.mxu2 %v1386_v12  ;;  %v1200_v12 = vld [vmem:[%s1647_s22 + $0x50] sm:$0xf] }
  0x26   : > { %750 = vmatpush.bf16.msra.mxu1 %v1394_v13  ;;  %1510 = vmatpush.bf16.msra.mxu3 %v1394_v13  ;;  %v1364_v13 = vld [vmem:[%s1647_s22 + $0x54] sm:$0xf0] }
  0x27   : > { %v1201_v20 = vor.u32 %v1364_v13, %v1200_v12 }
  0x29   : > { %662 = vmatpush.bf16.msra.mxu0 %v1385_v14  ;;  %1503 = vmatpush.bf16.msra.mxu2 %v1385_v14  ;;  %v1264_v14 = vld [vmem:[%s1647_s22 + $0xd0] sm:$0xf] }
  0x2a   : > { %751 = vmatpush.bf16.msra.mxu1 %v1393_v15  ;;  %1511 = vmatpush.bf16.msra.mxu3 %v1393_v15  ;;  %v1380_v15 = vld [vmem:[%s1647_s22 + $0xd4] sm:$0xf0] }
  0x2b   : > { %v1265_v21 = vor.u32 %v1380_v15, %v1264_v14 }
  0x2c   : > { %663 = vmatmul.bf16.vlgmr.msra.gmra.mxu0 %v1161_v24  ;;  %703 = vmatmul.bf16.vlgmr.msra.gmra.mxu2 %v1225_v25  ;;  %v1208_v24 = vld [vmem:[%s1647_s22 + $0x60] sm:$0xf]  ;;  %v1366_v25 = vld [vmem:[%s1647_s22 + $0x64] sm:$0xf0] }
  0x2d   : > { %752 = vmatmul.bf16.vlgmr.msra.gmra.mxu1 %v1165_v26  ;;  %792 = vmatmul.bf16.vlgmr.msra.gmra.mxu3 %v1229_v27  ;;  %v1272_v26 = vld [vmem:[%s1647_s22 + $0xe0] sm:$0xf]  ;;  %v1382_v27 = vld [vmem:[%s1647_s22 + $0xe4] sm:$0xf0]  ;;  %v1209_v32 = vor.u32 %v1366_v25, %v1208_v24 }
  0x2e   : > { %v1273_v33 = vor.u32 %v1382_v27, %v1272_v26 }
  0x3c   : > { %668 = vmatmul.bf16.gmra.mxu0 %v1169_v36  ;;  %708 = vmatmul.bf16.gmra.mxu2 %v1233_v37  ;;  %v1216_v36 = vld [vmem:[%s1647_s22 + $0x70] sm:$0xf]  ;;  %v1368_v37 = vld [vmem:[%s1647_s22 + $0x74] sm:$0xf0] }
  0x3d   : > { %757 = vmatmul.bf16.gmra.mxu1 %v1173_v38  ;;  %797 = vmatmul.bf16.gmra.mxu3 %v1237_v39  ;;  %v1280_v38 = vld [vmem:[%s1647_s22 + $0xf0] sm:$0xf]  ;;  %v1384_v39 = vld [vmem:[%s1647_s22 + $0xf4] sm:$0xf0]  ;;  %v1217_v44 = vor.u32 %v1368_v37, %v1216_v36 }
  0x3e   : > { %v1281_v45 = vor.u32 %v1384_v39, %v1280_v38 }
  0x4c   : > { %673 = vmatmul.bf16.gmra.mxu0 %v1177_v48  ;;  %713 = vmatmul.bf16.gmra.mxu2 %v1241_v49 }
  0x4d   : > { %762 = vmatmul.bf16.gmra.mxu1 %v1181_v50  ;;  %802 = vmatmul.bf16.gmra.mxu3 %v1245_v51 }
  0x5c   : > { %678 = vmatmul.bf16.gmra.mxu0 %v1185_v60  ;;  %718 = vmatmul.bf16.gmra.mxu2 %v1249_v61 }
  0x5d   : > { %767 = vmatmul.bf16.gmra.mxu1 %v1189_v62  ;;  %807 = vmatmul.bf16.gmra.mxu3 %v1253_v63 }
  0x6c   : > { %683 = vmatmul.bf16.gmra.mxu0 %v1193_v8  ;;  %723 = vmatmul.bf16.gmra.mxu2 %v1257_v9 }
  0x6d   : > { %772 = vmatmul.bf16.gmra.mxu1 %v1197_v10  ;;  %812 = vmatmul.bf16.gmra.mxu3 %v1261_v11 }
  0x7c   : > { %688 = vmatmul.bf16.gmra.mxu0 %v1201_v20  ;;  %728 = vmatmul.bf16.gmra.mxu2 %v1265_v21 }
  0x7d   : > { %777 = vmatmul.bf16.gmra.mxu1 %v1205_v22  ;;  %817 = vmatmul.bf16.gmra.mxu3 %v1269_v23 }
  0x8c   : > { %693 = vmatmul.bf16.gmra.mxu0 %v1209_v32  ;;  %733 = vmatmul.bf16.gmra.mxu2 %v1273_v33 }
  0x8d   : > { %782 = vmatmul.bf16.gmra.mxu1 %v1213_v34  ;;  %822 = vmatmul.bf16.gmra.mxu3 %v1277_v35 }
  0x9c   : > { %698 = vmatmul.bf16.gmra.mxu0 %v1217_v44  ;;  %738 = vmatmul.bf16.gmra.mxu2 %v1281_v45 }
  0x9d   : > { %787 = vmatmul.bf16.gmra.mxu1 %v1221_v46  ;;  %827 = vmatmul.bf16.gmra.mxu3 %v1285_v47 }
  0xa9   : > { %v664_v48 = vpop.f32.mrf.mxu0 }
  0xaa   : > { %v753_v49 = vpop.f32.mrf.mxu1 }
  0xab   : > { %v754_v52 = vadd.f32 %v753_v49, %v664_v48 }
  0xad   : > { %v936_v57 = vadd.f32 %v1725_v53, %v754_v52 }
  0xaf   : > { %v704_v50 = vpop.f32.mrf.mxu2 }
  0xb0   : > { %v793_v51 = vpop.f32.mrf.mxu3 }
  0xb1   : > { %v666_v54 = vpop.f32.mrf.mxu0  ;;  %v794_v59 = vadd.f32 %v793_v51, %v704_v50 }
  0xb2   : > { %v755_v55 = vpop.f32.mrf.mxu1 }
  0xb3   : > { %v756_v56 = vadd.f32 %v755_v55, %v666_v54  ;;  %v952_v2 = vadd.f32 %v1725_v53, %v794_v59 }
  0xb5   : > { %v937_v58 = vadd.f32 %v1725_v53, %v756_v56 }
  0xb7   : > { %v1404_v60 = vpack.c.bf16 %v937_v58, %v936_v57  ;;  %v706_v61 = vpop.f32.mrf.mxu2 }
  0xb8   : > { %v795_v62 = vpop.f32.mrf.mxu3 }
  0xb9   : > { %1405 = vst [vmem:[%s1733_s8] sm:$0xff] %v1404_v60   ;;  %v796_v63 = vadd.f32 %v795_v62, %v706_v61  ;;  %v669_v0 = vpop.f32.mrf.mxu0 }
  0xba   : > { %v758_v1 = vpop.f32.mrf.mxu1 }
  0xbb   : > { %v953_v3 = vadd.f32 %v1725_v53, %v796_v63  ;;  %v759_v7 = vadd.f32 %v758_v1, %v669_v0 }
  0xbd   : > { %v1444_v4 = vpack.c.bf16 %v953_v3, %v952_v2  ;;  %v938_v11 = vadd.f32 %v1725_v53, %v759_v7 }
  0xbf   : > { %1488 = vst [vmem:[%s1733_s8 + $0x40] sm:$0xff] %v1444_v4   ;;  %v709_v5 = vpop.f32.mrf.mxu2 }
  0xc0   : > { %v798_v6 = vpop.f32.mrf.mxu3 }
  0xc1   : > { %v671_v8 = vpop.f32.mrf.mxu0  ;;  %v799_v13 = vadd.f32 %v798_v6, %v709_v5 }
  0xc2   : > { %v760_v9 = vpop.f32.mrf.mxu1 }
  0xc3   : > { %v761_v10 = vadd.f32 %v760_v9, %v671_v8  ;;  %v954_v20 = vadd.f32 %v1725_v53, %v799_v13 }
  0xc5   : > { %v939_v12 = vadd.f32 %v1725_v53, %v761_v10 }
  0xc7   : > { %v1409_v14 = vpack.c.bf16 %v939_v12, %v938_v11  ;;  %v711_v15 = vpop.f32.mrf.mxu2 }
  0xc8   : > { %v800_v16 = vpop.f32.mrf.mxu3 }
  0xc9   : > { %1481 = vst [vmem:[%s1733_s8 + $0x8] sm:$0xff] %v1409_v14   ;;  %v801_v17 = vadd.f32 %v800_v16, %v711_v15  ;;  %v674_v18 = vpop.f32.mrf.mxu0 }
  0xca   : > { %v763_v19 = vpop.f32.mrf.mxu1 }
  0xcb   : > { %v955_v21 = vadd.f32 %v1725_v53, %v801_v17  ;;  %v764_v25 = vadd.f32 %v763_v19, %v674_v18 }
  0xcd   : > { %v1449_v22 = vpack.c.bf16 %v955_v21, %v954_v20  ;;  %v940_v29 = vadd.f32 %v1725_v53, %v764_v25 }
  0xcf   : > { %1489 = vst [vmem:[%s1733_s8 + $0x48] sm:$0xff] %v1449_v22   ;;  %v714_v23 = vpop.f32.mrf.mxu2 }
  0xd0   : > { %v803_v24 = vpop.f32.mrf.mxu3 }
  0xd1   : > { %v676_v26 = vpop.f32.mrf.mxu0  ;;  %v804_v31 = vadd.f32 %v803_v24, %v714_v23 }
  0xd2   : > { %v765_v27 = vpop.f32.mrf.mxu1 }
  0xd3   : > { %v766_v28 = vadd.f32 %v765_v27, %v676_v26  ;;  %v956_v38 = vadd.f32 %v1725_v53, %v804_v31 }
  0xd5   : > { %v941_v30 = vadd.f32 %v1725_v53, %v766_v28 }
  0xd7   : > { %v1414_v32 = vpack.c.bf16 %v941_v30, %v940_v29  ;;  %v716_v33 = vpop.f32.mrf.mxu2 }
  0xd8   : > { %v805_v34 = vpop.f32.mrf.mxu3 }
  0xd9   : > { %1482 = vst [vmem:[%s1733_s8 + $0x10] sm:$0xff] %v1414_v32   ;;  %v806_v35 = vadd.f32 %v805_v34, %v716_v33  ;;  %v679_v36 = vpop.f32.mrf.mxu0 }
  0xda   : > { %v768_v37 = vpop.f32.mrf.mxu1 }
  0xdb   : > { %v957_v39 = vadd.f32 %v1725_v53, %v806_v35  ;;  %v769_v43 = vadd.f32 %v768_v37, %v679_v36 }
  0xdd   : > { %v1454_v40 = vpack.c.bf16 %v957_v39, %v956_v38  ;;  %v942_v47 = vadd.f32 %v1725_v53, %v769_v43 }
  0xdf   : > { %1490 = vst [vmem:[%s1733_s8 + $0x50] sm:$0xff] %v1454_v40   ;;  %v719_v41 = vpop.f32.mrf.mxu2 }
  0xe0   : > { %v808_v42 = vpop.f32.mrf.mxu3 }
  0xe1   : > { %v681_v44 = vpop.f32.mrf.mxu0  ;;  %v809_v49 = vadd.f32 %v808_v42, %v719_v41 }
  0xe2   : > { %v770_v45 = vpop.f32.mrf.mxu1 }
  0xe3   : > { %v771_v46 = vadd.f32 %v770_v45, %v681_v44  ;;  %v958_v57 = vadd.f32 %v1725_v53, %v809_v49 }
  0xe5   : > { %v943_v48 = vadd.f32 %v1725_v53, %v771_v46 }
  0xe7   : > { %v1419_v50 = vpack.c.bf16 %v943_v48, %v942_v47  ;;  %v721_v51 = vpop.f32.mrf.mxu2 }
  0xe8   : > { %v810_v52 = vpop.f32.mrf.mxu3 }
  0xe9   : > { %1483 = vst [vmem:[%s1733_s8 + $0x18] sm:$0xff] %v1419_v50   ;;  %v811_v54 = vadd.f32 %v810_v52, %v721_v51  ;;  %v684_v55 = vpop.f32.mrf.mxu0 }
  0xea   : > { %v773_v56 = vpop.f32.mrf.mxu1 }
  0xeb   : > { %v959_v58 = vadd.f32 %v1725_v53, %v811_v54  ;;  %v774_v62 = vadd.f32 %v773_v56, %v684_v55 }
  0xed   : > { %v1459_v59 = vpack.c.bf16 %v959_v58, %v958_v57  ;;  %v944_v2 = vadd.f32 %v1725_v53, %v774_v62 }
  0xef   : > { %1491 = vst [vmem:[%s1733_s8 + $0x58] sm:$0xff] %v1459_v59   ;;  %v724_v60 = vpop.f32.mrf.mxu2 }
  0xf0   : > { %v813_v61 = vpop.f32.mrf.mxu3 }
  0xf1   : > { %v686_v63 = vpop.f32.mrf.mxu0  ;;  %v814_v4 = vadd.f32 %v813_v61, %v724_v60 }
  0xf2   : > { %v775_v0 = vpop.f32.mrf.mxu1 }
  0xf3   : > { %v776_v1 = vadd.f32 %v775_v0, %v686_v63  ;;  %v960_v11 = vadd.f32 %v1725_v53, %v814_v4 }
  0xf5   : > { %v945_v3 = vadd.f32 %v1725_v53, %v776_v1 }
  0xf7   : > { %v1424_v5 = vpack.c.bf16 %v945_v3, %v944_v2  ;;  %v726_v6 = vpop.f32.mrf.mxu2 }
  0xf8   : > { %v815_v7 = vpop.f32.mrf.mxu3 }
  0xf9   : > { %1484 = vst [vmem:[%s1733_s8 + $0x20] sm:$0xff] %v1424_v5   ;;  %v816_v8 = vadd.f32 %v815_v7, %v726_v6  ;;  %v689_v9 = vpop.f32.mrf.mxu0 }
  0xfa   : > { %v778_v10 = vpop.f32.mrf.mxu1 }
  0xfb   : > { %v961_v12 = vadd.f32 %v1725_v53, %v816_v8  ;;  %v779_v16 = vadd.f32 %v778_v10, %v689_v9 }
  0xfd   : > { %v1464_v13 = vpack.c.bf16 %v961_v12, %v960_v11  ;;  %v946_v20 = vadd.f32 %v1725_v53, %v779_v16 }
  0xff   : > { %1492 = vst [vmem:[%s1733_s8 + $0x60] sm:$0xff] %v1464_v13   ;;  %v729_v14 = vpop.f32.mrf.mxu2 }
 0x100   : > { %v818_v15 = vpop.f32.mrf.mxu3 }
 0x101   : > { %v691_v17 = vpop.f32.mrf.mxu0  ;;  %v819_v22 = vadd.f32 %v818_v15, %v729_v14 }
 0x102   : > { %v780_v18 = vpop.f32.mrf.mxu1 }
 0x103   : > { %v781_v19 = vadd.f32 %v780_v18, %v691_v17  ;;  %v962_v29 = vadd.f32 %v1725_v53, %v819_v22 }
 0x105   : > { %v947_v21 = vadd.f32 %v1725_v53, %v781_v19 }
 0x107   : > { %v1429_v23 = vpack.c.bf16 %v947_v21, %v946_v20  ;;  %v731_v24 = vpop.f32.mrf.mxu2 }
 0x108   : > { %v820_v25 = vpop.f32.mrf.mxu3 }
 0x109   : > { %1485 = vst [vmem:[%s1733_s8 + $0x28] sm:$0xff] %v1429_v23   ;;  %v821_v26 = vadd.f32 %v820_v25, %v731_v24  ;;  %v694_v27 = vpop.f32.mrf.mxu0 }
 0x10a   : > { %v783_v28 = vpop.f32.mrf.mxu1 }
 0x10b   : > { %v963_v30 = vadd.f32 %v1725_v53, %v821_v26  ;;  %v784_v34 = vadd.f32 %v783_v28, %v694_v27 }
 0x10d   : > { %v1469_v31 = vpack.c.bf16 %v963_v30, %v962_v29  ;;  %v948_v38 = vadd.f32 %v1725_v53, %v784_v34 }
 0x10f   : > { %1493 = vst [vmem:[%s1733_s8 + $0x68] sm:$0xff] %v1469_v31   ;;  %v734_v32 = vpop.f32.mrf.mxu2 }
 0x110   : > { %v823_v33 = vpop.f32.mrf.mxu3 }
 0x111   : > { %v696_v35 = vpop.f32.mrf.mxu0  ;;  %v824_v40 = vadd.f32 %v823_v33, %v734_v32 }
 0x112   : > { %v785_v36 = vpop.f32.mrf.mxu1 }
 0x113   : > { %v786_v37 = vadd.f32 %v785_v36, %v696_v35  ;;  %v964_v47 = vadd.f32 %v1725_v53, %v824_v40 }
 0x115   : > { %v949_v39 = vadd.f32 %v1725_v53, %v786_v37 }
 0x117   : > { %v1434_v41 = vpack.c.bf16 %v949_v39, %v948_v38  ;;  %v736_v42 = vpop.f32.mrf.mxu2 }
 0x118   : > { %v825_v43 = vpop.f32.mrf.mxu3 }
 0x119   : > { %1486 = vst [vmem:[%s1733_s8 + $0x30] sm:$0xff] %v1434_v41   ;;  %v826_v44 = vadd.f32 %v825_v43, %v736_v42  ;;  %v699_v45 = vpop.f32.mrf.mxu0 }
 0x11a   : > { %v788_v46 = vpop.f32.mrf.mxu1 }
 0x11b   : > { %v965_v48 = vadd.f32 %v1725_v53, %v826_v44  ;;  %v789_v52 = vadd.f32 %v788_v46, %v699_v45 }
 0x11d   : > { %v1474_v49 = vpack.c.bf16 %v965_v48, %v964_v47  ;;  %v950_v57 = vadd.f32 %v1725_v53, %v789_v52 }
 0x11f   : > { %1494 = vst [vmem:[%s1733_s8 + $0x70] sm:$0xff] %v1474_v49   ;;  %v739_v50 = vpop.f32.mrf.mxu2 }
 0x120   : > { %v828_v51 = vpop.f32.mrf.mxu3 }
 0x121   : > { %v701_v54 = vpop.f32.mrf.mxu0  ;;  %v829_v59 = vadd.f32 %v828_v51, %v739_v50 }
 0x122   : > { %v790_v55 = vpop.f32.mrf.mxu1 }
 0x123   : > { %v791_v56 = vadd.f32 %v790_v55, %v701_v54  ;;  %v966_v0 = vadd.f32 %v1725_v53, %v829_v59 }
 0x125   : > { %v951_v58 = vadd.f32 %v1725_v53, %v791_v56 }
 0x127   : > { %v1439_v60 = vpack.c.bf16 %v951_v58, %v950_v57  ;;  %v741_v61 = vpop.f32.mrf.mxu2 }
 0x128   : > { %v830_v62 = vpop.f32.mrf.mxu3 }
 0x129   : > { %1487 = vst [vmem:[%s1733_s8 + $0x38] sm:$0xff] %v1439_v60   ;;  %v831_v63 = vadd.f32 %v830_v62, %v741_v61 }
 0x12b   : > { %v967_v1 = vadd.f32 %v1725_v53, %v831_v63 }
 0x12d   : > { %v1479_v2 = vpack.c.bf16 %v967_v1, %v966_v0 }
 0x12f   : > { %1495 = vst [vmem:[%s1733_s8 + $0x78] sm:$0xff] %v1479_v2  }
 0x130 PF: > { %s13_s14 = sadd.s32 1, %s1559_s14   ;;  %s1794_s12 = smov %s1555_s13 }
 0x131   : > { %p10_p5 = scmp.ge.s32.totalorder %s13_s14, 10   ;;  %s1795_s13 = smov %s1797_s15 }
 0x133   :  { %12 = sbr.rel (!%p10_p5) target bundleno = 2 (0x2), region = 76 }

// kernel: _stem_block.3
= control target key start
LH: loop header
LB: loop body
LE: loop exit
PB: predicated region body
PF: predicated region fallthrough
CT: control target
= control target key end

     0   :  { %vm700_vm3 = vcmask 523264   ;;  %s4242_s0 = inlined_call_operand.vmem [shape: bf16[1024,128], index: 0, kind: input, shape index: {}]   ;;  %s4243_s1 = inlined_call_operand.vmem [shape: f32[1,64], index: 1, kind: input, shape index: {}]   ;;  %s4244_s2 = inlined_call_operand.vmem [shape: f32[1,64], index: 2, kind: input, shape index: {}]   ;;  %s4245_s3 = inlined_call_operand.vmem [shape: bf16[1024,128], index: 3, kind: output, shape index: {}]  }
   0x1   :  { %v1355_v0 = vld [vmem:[%s4242_s0] sm:$0xff]   ;;  %v1930_v1 = vld [vmem:[%s4242_s0 + $0x8] sm:$0xff]   ;;  %v1931_v5 = vld [vmem:[%s4242_s0 + $0x10] sm:$0xff]  }
   0x2   :  { %v2086_v2 = vunpack.c.l.bf16 %v1355_v0  ;;  %v2088_v3 = vunpack.c.h.bf16 %v1355_v0  ;;  %v2090_v4 = vunpack.c.l.bf16 %v1930_v1  ;;  %v2095_v6 = vunpack.c.h.bf16 %v1930_v1  ;;  %v1932_v12 = vld [vmem:[%s4242_s0 + $0x18] sm:$0xff]   ;;  %v1933_v20 = vld [vmem:[%s4242_s0 + $0x20] sm:$0xff]   ;;  %v1934_v29 = vld [vmem:[%s4242_s0 + $0x28] sm:$0xff]  }
   0x3   :  { %v2103_v10 = vunpack.c.l.bf16 %v1931_v5  ;;  %v2111_v14 = vunpack.c.h.bf16 %v1931_v5  ;;  %v2116_v18 = vunpack.c.l.bf16 %v1932_v12  ;;  %v2124_v23 = vunpack.c.h.bf16 %v1932_v12  ;;  %v1935_v38 = vld [vmem:[%s4242_s0 + $0x30] sm:$0xff]   ;;  %v1936_v47 = vld [vmem:[%s4242_s0 + $0x38] sm:$0xff]   ;;  %v1937_v56 = vld [vmem:[%s4242_s0 + $0x40] sm:$0xff]  }
   0x4   :  { %v270_v7 = vadd.f32 %v2088_v3, %v2086_v2  ;;  %v403_v8 = vmul.f32 %v2086_v2, %v2086_v2  ;;  %v404_v9 = vmul.f32 %v2088_v3, %v2088_v3  ;;  %v405_v13 = vmul.f32 %v2090_v4, %v2090_v4  ;;  %v1938_v1 = vld [vmem:[%s4242_s0 + $0x48] sm:$0xff]  }
   0x5   :  { %v406_v16 = vmul.f32 %v2095_v6, %v2095_v6  ;;  %v407_v21 = vmul.f32 %v2103_v10, %v2103_v10  ;;  %v408_v25 = vmul.f32 %v2111_v14, %v2111_v14  ;;  %v2129_v27 = vunpack.c.l.bf16 %v1933_v20 }
   0x6   :  { %v271_v11 = vadd.f32 %v2090_v4, %v270_v7  ;;  %v531_v17 = vadd.f32 %v404_v9, %v403_v8  ;;  %v409_v30 = vmul.f32 %v2116_v18, %v2116_v18  ;;  %v2137_v32 = vunpack.c.h.bf16 %v1933_v20 }
   0x7   :  { %v410_v34 = vmul.f32 %v2124_v23, %v2124_v23  ;;  %v2142_v36 = vunpack.c.l.bf16 %v1934_v29  ;;  %v411_v39 = vmul.f32 %v2129_v27, %v2129_v27  ;;  %v2150_v41 = vunpack.c.h.bf16 %v1934_v29 }
   0x8   :  { %v272_v15 = vadd.f32 %v2095_v6, %v271_v11  ;;  %v532_v22 = vadd.f32 %v531_v17, %v405_v13  ;;  %v412_v43 = vmul.f32 %v2137_v32, %v2137_v32  ;;  %v2155_v45 = vunpack.c.l.bf16 %v1935_v38 }
   0x9   :  { %v413_v48 = vmul.f32 %v2142_v36, %v2142_v36  ;;  %v2163_v50 = vunpack.c.h.bf16 %v1935_v38  ;;  %v414_v52 = vmul.f32 %v2150_v41, %v2150_v41  ;;  %v2168_v54 = vunpack.c.l.bf16 %v1936_v47 }
   0xa   :  { %v273_v19 = vadd.f32 %v2103_v10, %v272_v15  ;;  %v533_v26 = vadd.f32 %v532_v22, %v406_v16  ;;  %v415_v57 = vmul.f32 %v2155_v45, %v2155_v45  ;;  %v2176_v59 = vunpack.c.h.bf16 %v1936_v47  ;;  %v1939_v16 = vld [vmem:[%s4242_s0 + $0x50] sm:$0xff]  }
   0xb   :  { %v416_v61 = vmul.f32 %v2163_v50, %v2163_v50  ;;  %v2181_v63 = vunpack.c.l.bf16 %v1937_v56  ;;  %v417_v5 = vmul.f32 %v2168_v54, %v2168_v54  ;;  %v2189_v8 = vunpack.c.h.bf16 %v1937_v56 }
   0xc   :  { %v274_v24 = vadd.f32 %v2111_v14, %v273_v19  ;;  %v534_v31 = vadd.f32 %v533_v26, %v407_v21  ;;  %v418_v11 = vmul.f32 %v2176_v59, %v2176_v59  ;;  %v2194_v13 = vunpack.c.l.bf16 %v1938_v1 }
   0xd   :  { %v419_v17 = vmul.f32 %v2181_v63, %v2181_v63  ;;  %v2202_v20 = vunpack.c.h.bf16 %v1938_v1  ;;  %v420_v22 = vmul.f32 %v2189_v8, %v2189_v8 }
   0xe   :  { %v275_v28 = vadd.f32 %v2116_v18, %v274_v24  ;;  %v535_v35 = vadd.f32 %v534_v31, %v408_v25  ;;  %v2207_v25 = vunpack.c.l.bf16 %v1939_v16  ;;  %v421_v29 = vmul.f32 %v2194_v13, %v2194_v13 }
   0xf   :  { %v2215_v31 = vunpack.c.h.bf16 %v1939_v16  ;;  %v1944_v16 = vld [vmem:[%s4242_s0 + $0x78] sm:$0xff]  }
  0x10   :  { %v276_v33 = vadd.f32 %v2124_v23, %v275_v28  ;;  %v536_v40 = vadd.f32 %v535_v35, %v409_v30  ;;  %v1940_v28 = vld [vmem:[%s4242_s0 + $0x58] sm:$0xff]  }
  0x12   :  { %v277_v37 = vadd.f32 %v2129_v27, %v276_v33  ;;  %v537_v44 = vadd.f32 %v536_v40, %v410_v34  ;;  %v422_v34 = vmul.f32 %v2202_v20, %v2202_v20  ;;  %v423_v40 = vmul.f32 %v2207_v25, %v2207_v25 }
  0x14   :  { %v278_v42 = vadd.f32 %v2137_v32, %v277_v37  ;;  %v538_v49 = vadd.f32 %v537_v44, %v411_v39  ;;  %v2220_v37 = vunpack.c.l.bf16 %v1940_v28  ;;  %v1941_v39 = vld [vmem:[%s4242_s0 + $0x60] sm:$0xff]  }
  0x16   :  { %v279_v46 = vadd.f32 %v2142_v36, %v278_v42  ;;  %v539_v53 = vadd.f32 %v538_v49, %v412_v43  ;;  %v2228_v43 = vunpack.c.h.bf16 %v1940_v28  ;;  %v2272_v28 = vunpack.c.l.bf16 %v1944_v16 }
  0x18   :  { %v280_v51 = vadd.f32 %v2150_v41, %v279_v46  ;;  %v540_v58 = vadd.f32 %v539_v53, %v413_v48  ;;  %v424_v46 = vmul.f32 %v2215_v31, %v2215_v31  ;;  %v2233_v48 = vunpack.c.l.bf16 %v1941_v39 }
  0x1a   :  { %v281_v55 = vadd.f32 %v2155_v45, %v280_v51  ;;  %v541_v62 = vadd.f32 %v540_v58, %v414_v52  ;;  %v1942_v51 = vld [vmem:[%s4242_s0 + $0x68] sm:$0xff]   ;;  %v425_v52 = vmul.f32 %v2220_v37, %v2220_v37 }
  0x1c   :  { %v282_v60 = vadd.f32 %v2163_v50, %v281_v55  ;;  %v542_v7 = vadd.f32 %v541_v62, %v415_v57  ;;  %v2241_v55 = vunpack.c.h.bf16 %v1941_v39  ;;  %v426_v57 = vmul.f32 %v2228_v43, %v2228_v43  ;;  %v1943_v62 = vld [vmem:[%s4242_s0 + $0x70] sm:$0xff]  }
  0x1e   :  { %v283_v0 = vadd.f32 %v2168_v54, %v282_v60  ;;  %v543_v12 = vadd.f32 %v542_v7, %v416_v61  ;;  %v2246_v60 = vunpack.c.l.bf16 %v1942_v51 }
  0x20   :  { %v284_v9 = vadd.f32 %v2176_v59, %v283_v0  ;;  %v544_v19 = vadd.f32 %v543_v12, %v417_v5  ;;  %v427_v0 = vmul.f32 %v2233_v48, %v2233_v48  ;;  %v2254_v5 = vunpack.c.h.bf16 %v1942_v51 }
  0x21   :  { %v2259_v12 = vunpack.c.l.bf16 %v1943_v62 }
  0x22   :  { %v285_v15 = vadd.f32 %v2181_v63, %v284_v9  ;;  %v545_v24 = vadd.f32 %v544_v19, %v418_v11  ;;  %v428_v9 = vmul.f32 %v2241_v55, %v2241_v55 }
  0x24   :  { %v286_v21 = vadd.f32 %v2189_v8, %v285_v15  ;;  %v546_v30 = vadd.f32 %v545_v24, %v419_v17  ;;  %v429_v17 = vmul.f32 %v2246_v60, %v2246_v60  ;;  %v430_v24 = vmul.f32 %v2254_v5, %v2254_v5 }
  0x26   :  { %v287_v26 = vadd.f32 %v2194_v13, %v286_v21  ;;  %v547_v35 = vadd.f32 %v546_v30, %v420_v22  ;;  %v2267_v21 = vunpack.c.h.bf16 %v1943_v62  ;;  %v1945_v30 = vld [vmem:[%s4242_s0 + $0x80] sm:$0xff]  }
  0x27   :  { %v2293_v51 = vunpack.c.h.bf16 %v1945_v30 }
  0x28   :  { %v288_v33 = vadd.f32 %v2202_v20, %v287_v26  ;;  %v548_v42 = vadd.f32 %v547_v35, %v421_v29  ;;  %v2280_v35 = vunpack.c.h.bf16 %v1944_v16  ;;  %v432_v39 = vmul.f32 %v2267_v21, %v2267_v21 }
  0x2a   :  { %v289_v38 = vadd.f32 %v2207_v25, %v288_v33  ;;  %v549_v47 = vadd.f32 %v548_v42, %v422_v34  ;;  %v431_v33 = vmul.f32 %v2259_v12, %v2259_v12  ;;  %v2285_v42 = vunpack.c.l.bf16 %v1945_v30 }
  0x2c   :  { %v290_v44 = vadd.f32 %v2215_v31, %v289_v38  ;;  %v550_v53 = vadd.f32 %v549_v47, %v423_v40  ;;  %v433_v47 = vmul.f32 %v2272_v28, %v2272_v28  ;;  %v435_v62 = vmul.f32 %v2285_v42, %v2285_v42 }
  0x2e   :  { %v291_v49 = vadd.f32 %v2220_v37, %v290_v44  ;;  %v551_v58 = vadd.f32 %v550_v53, %v424_v46  ;;  %v1946_v46 = vld [vmem:[%s4242_s0 + $0x88] sm:$0xff]   ;;  %v434_v53 = vmul.f32 %v2280_v35, %v2280_v35 }
  0x30   :  { %v292_v56 = vadd.f32 %v2228_v43, %v291_v49  ;;  %v552_v1 = vadd.f32 %v551_v58, %v425_v52 }
  0x32   :  { %v293_v61 = vadd.f32 %v2233_v48, %v292_v56  ;;  %v553_v11 = vadd.f32 %v552_v1, %v426_v57  ;;  %v2298_v57 = vunpack.c.l.bf16 %v1946_v46  ;;  %v2306_v1 = vunpack.c.h.bf16 %v1946_v46 }
  0x34   :  { %v294_v7 = vadd.f32 %v2241_v55, %v293_v61  ;;  %v554_v19 = vadd.f32 %v553_v11, %v427_v0  ;;  %v1947_v61 = vld [vmem:[%s4242_s0 + $0x90] sm:$0xff]  }
  0x36   :  { %v295_v15 = vadd.f32 %v2246_v60, %v294_v7  ;;  %v555_v26 = vadd.f32 %v554_v19, %v428_v9  ;;  %v436_v9 = vmul.f32 %v2293_v51, %v2293_v51  ;;  %v437_v19 = vmul.f32 %v2298_v57, %v2298_v57 }
  0x38   :  { %v296_v22 = vadd.f32 %v2254_v5, %v295_v15  ;;  %v556_v34 = vadd.f32 %v555_v26, %v429_v17  ;;  %v2311_v15 = vunpack.c.l.bf16 %v1947_v61  ;;  %v1948_v17 = vld [vmem:[%s4242_s0 + $0x98] sm:$0xff]  }
  0x3a   :  { %v297_v29 = vadd.f32 %v2259_v12, %v296_v22  ;;  %v557_v40 = vadd.f32 %v556_v34, %v430_v24  ;;  %v2319_v24 = vunpack.c.h.bf16 %v1947_v61 }
  0x3c   :  { %v298_v38 = vadd.f32 %v2267_v21, %v297_v29  ;;  %v558_v49 = vadd.f32 %v557_v40, %v431_v33  ;;  %v438_v29 = vmul.f32 %v2306_v1, %v2306_v1  ;;  %v2324_v33 = vunpack.c.l.bf16 %v1948_v17 }
  0x3e   :  { %v299_v44 = vadd.f32 %v2272_v28, %v298_v38  ;;  %v559_v56 = vadd.f32 %v558_v49, %v432_v39  ;;  %v1949_v38 = vld [vmem:[%s4242_s0 + $0xa0] sm:$0xff]   ;;  %v439_v39 = vmul.f32 %v2311_v15, %v2311_v15 }
  0x40   :  { %v300_v52 = vadd.f32 %v2280_v35, %v299_v44  ;;  %v560_v0 = vadd.f32 %v559_v56, %v433_v47  ;;  %v2332_v44 = vunpack.c.h.bf16 %v1948_v17  ;;  %v440_v47 = vmul.f32 %v2319_v24, %v2319_v24  ;;  %v1950_v56 = vld [vmem:[%s4242_s0 + $0xa8] sm:$0xff]   ;;  %v1951_v17 = vld [vmem:[%s4242_s0 + $0xb0] sm:$0xff]  }
  0x42   :  { %v301_v58 = vadd.f32 %v2285_v42, %v300_v52  ;;  %v561_v11 = vadd.f32 %v560_v0, %v434_v53  ;;  %v2337_v52 = vunpack.c.l.bf16 %v1949_v38 }
  0x44   :  { %v302_v7 = vadd.f32 %v2293_v51, %v301_v58  ;;  %v562_v22 = vadd.f32 %v561_v11, %v435_v62  ;;  %v441_v58 = vmul.f32 %v2324_v33, %v2324_v33  ;;  %v2345_v62 = vunpack.c.h.bf16 %v1949_v38 }
  0x45   :  { %v2350_v11 = vunpack.c.l.bf16 %v1950_v56  ;;  %v2363_v38 = vunpack.c.l.bf16 %v1951_v17 }
  0x46   :  { %v303_v16 = vadd.f32 %v2298_v57, %v302_v7  ;;  %v563_v30 = vadd.f32 %v562_v22, %v436_v9  ;;  %4331 = vst [vmem:[#allocation2_spill] sm:$0xff] %v2345_v62  ;;  %v442_v7 = vmul.f32 %v2332_v44, %v2332_v44 }
  0x47   :  { %4332 = vst [vmem:[#allocation3_spill] sm:$0xff] %v2350_v11 }
  0x48   :  { %v304_v26 = vadd.f32 %v2306_v1, %v303_v16  ;;  %v564_v40 = vadd.f32 %v563_v30, %v437_v19  ;;  %v443_v19 = vmul.f32 %v2337_v52, %v2337_v52  ;;  %v444_v30 = vmul.f32 %v2345_v62, %v2345_v62  ;;  %4334 = vst [vmem:[#allocation5_spill] sm:$0xff] %v2363_v38 }
  0x4a   :  { %v305_v34 = vadd.f32 %v2311_v15, %v304_v26  ;;  %v565_v49 = vadd.f32 %v564_v40, %v438_v29  ;;  %v2358_v26 = vunpack.c.h.bf16 %v1950_v56  ;;  %v1952_v40 = vld [vmem:[%s4242_s0 + $0xb8] sm:$0xff]  }
  0x4c   :  { %v306_v46 = vadd.f32 %v2319_v24, %v305_v34  ;;  %v566_v61 = vadd.f32 %v565_v49, %v439_v39  ;;  %4333 = vst [vmem:[#allocation4_spill] sm:$0xff] %v2358_v26  ;;  %v2371_v49 = vunpack.c.h.bf16 %v1951_v17  ;;  %v446_v56 = vmul.f32 %v2358_v26, %v2358_v26 }
  0x4d   :  { %v2384_v17 = vunpack.c.h.bf16 %v1952_v40 }
  0x4e   :  { %v307_v53 = vadd.f32 %v2324_v33, %v306_v46  ;;  %v567_v9 = vadd.f32 %v566_v61, %v440_v47  ;;  %v445_v46 = vmul.f32 %v2350_v11, %v2350_v11  ;;  %4335 = vst [vmem:[#allocation6_spill] sm:$0xff] %v2371_v49  ;;  %v2376_v61 = vunpack.c.l.bf16 %v1952_v40 }
  0x4f   :  { %4337 = vst [vmem:[#allocation8_spill] sm:$0xff] %v2384_v17 }
  0x50   :  { %v308_v0 = vadd.f32 %v2332_v44, %v307_v53  ;;  %v568_v22 = vadd.f32 %v567_v9, %v441_v58  ;;  %4336 = vst [vmem:[#allocation7_spill] sm:$0xff] %v2376_v61  ;;  %v447_v9 = vmul.f32 %v2363_v38, %v2363_v38 }
  0x52   :  { %v309_v16 = vadd.f32 %v2337_v52, %v308_v0  ;;  %v569_v34 = vadd.f32 %v568_v22, %v442_v7  ;;  %v1953_v7 = vld [vmem:[%s4242_s0 + $0xc0] sm:$0xff]   ;;  %v448_v22 = vmul.f32 %v2371_v49, %v2371_v49 }
  0x53   :  { %v2397_v40 = vunpack.c.h.bf16 %v1953_v7 }
  0x54   :  { %v310_v29 = vadd.f32 %v2345_v62, %v309_v16  ;;  %v570_v47 = vadd.f32 %v569_v34, %v443_v19 }
  0x55   :  { %4339 = vst [vmem:[#allocation10_spill] sm:$0xff] %v2397_v40 }
  0x56   :  { %v311_v39 = vadd.f32 %v2350_v11, %v310_v29  ;;  %v571_v58 = vadd.f32 %v570_v47, %v444_v30  ;;  %v2389_v30 = vunpack.c.l.bf16 %v1953_v7  ;;  %v449_v47 = vmul.f32 %v2376_v61, %v2376_v61 }
  0x58   :  { %v312_v53 = vadd.f32 %v2358_v26, %v311_v39  ;;  %v572_v16 = vadd.f32 %v571_v58, %v445_v46  ;;  %4338 = vst [vmem:[#allocation9_spill] sm:$0xff] %v2389_v30  ;;  %v1954_v39 = vld [vmem:[%s4242_s0 + $0xc8] sm:$0xff]   ;;  %v450_v58 = vmul.f32 %v2384_v17, %v2384_v17 }
  0x59   :  { %v2410_v7 = vunpack.c.h.bf16 %v1954_v39 }
  0x5a   :  { %v313_v0 = vadd.f32 %v2363_v38, %v312_v53  ;;  %v573_v29 = vadd.f32 %v572_v16, %v446_v56 }
  0x5b   :  { %4341 = vst [vmem:[#allocation12_spill] sm:$0xff] %v2410_v7 }
  0x5c   :  { %v314_v19 = vadd.f32 %v2371_v49, %v313_v0  ;;  %v574_v46 = vadd.f32 %v573_v29, %v447_v9  ;;  %v2402_v0 = vunpack.c.l.bf16 %v1954_v39 }
  0x5e   :  { %v315_v34 = vadd.f32 %v2376_v61, %v314_v19  ;;  %v575_v56 = vadd.f32 %v574_v46, %v448_v22  ;;  %4340 = vst [vmem:[#allocation11_spill] sm:$0xff] %v2402_v0  ;;  %v1955_v19 = vld [vmem:[%s4242_s0 + $0xd0] sm:$0xff]   ;;  %v451_v61 = vmul.f32 %v2389_v30, %v2389_v30 }
  0x5f   :  { %v2415_v46 = vunpack.c.l.bf16 %v1955_v19  ;;  %v2423_v39 = vunpack.c.h.bf16 %v1955_v19 }
  0x60   :  { %v316_v53 = vadd.f32 %v2384_v17, %v315_v34  ;;  %v576_v9 = vadd.f32 %v575_v56, %v449_v47  ;;  %v452_v34 = vmul.f32 %v2397_v40, %v2397_v40  ;;  %v1956_v17 = vld [vmem:[%s4242_s0 + $0xd8] sm:$0xff]  }
  0x61   :  { %4342 = vst [vmem:[#allocation13_spill] sm:$0xff] %v2415_v46  ;;  %v2436_v19 = vunpack.c.h.bf16 %v1956_v17 }
  0x62   :  { %v317_v16 = vadd.f32 %v2389_v30, %v316_v53  ;;  %v577_v22 = vadd.f32 %v576_v9, %v450_v58  ;;  %v453_v30 = vmul.f32 %v2402_v0, %v2402_v0  ;;  %4343 = vst [vmem:[#allocation14_spill] sm:$0xff] %v2423_v39  ;;  %v2428_v9 = vunpack.c.l.bf16 %v1956_v17 }
  0x63   :  { %4345 = vst [vmem:[#allocation16_spill] sm:$0xff] %v2436_v19 }
  0x64   :  { %v318_v29 = vadd.f32 %v2397_v40, %v317_v16  ;;  %v578_v47 = vadd.f32 %v577_v22, %v451_v61  ;;  %v454_v16 = vmul.f32 %v2410_v7, %v2410_v7  ;;  %4344 = vst [vmem:[#allocation15_spill] sm:$0xff] %v2428_v9  ;;  %v1957_v40 = vld [vmem:[%s4242_s0 + $0xe0] sm:$0xff]  }
  0x65   :  { %v2449_v17 = vunpack.c.h.bf16 %v1957_v40 }
  0x66   :  { %v319_v53 = vadd.f32 %v2402_v0, %v318_v29  ;;  %v579_v58 = vadd.f32 %v578_v47, %v452_v34  ;;  %v455_v0 = vmul.f32 %v2415_v46, %v2415_v46  ;;  %v2441_v47 = vunpack.c.l.bf16 %v1957_v40 }
  0x67   :  { %4347 = vst [vmem:[#allocation18_spill] sm:$0xff] %v2449_v17 }
  0x68   :  { %v320_v56 = vadd.f32 %v2410_v7, %v319_v53  ;;  %v580_v61 = vadd.f32 %v579_v58, %v453_v30  ;;  %v456_v53 = vmul.f32 %v2423_v39, %v2423_v39  ;;  %4346 = vst [vmem:[#allocation17_spill] sm:$0xff] %v2441_v47  ;;  %v1958_v7 = vld [vmem:[%s4242_s0 + $0xe8] sm:$0xff]  }
  0x69   :  { %v2462_v40 = vunpack.c.h.bf16 %v1958_v7 }
  0x6a   :  { %v321_v29 = vadd.f32 %v2415_v46, %v320_v56  ;;  %v581_v34 = vadd.f32 %v580_v61, %v454_v16  ;;  %v457_v46 = vmul.f32 %v2428_v9, %v2428_v9  ;;  %v2454_v61 = vunpack.c.l.bf16 %v1958_v7 }
  0x6b   :  { %4349 = vst [vmem:[#allocation20_spill] sm:$0xff] %v2462_v40 }
  0x6c   :  { %v322_v22 = vadd.f32 %v2423_v39, %v321_v29  ;;  %v582_v30 = vadd.f32 %v581_v34, %v455_v0  ;;  %v458_v29 = vmul.f32 %v2436_v19, %v2436_v19  ;;  %4348 = vst [vmem:[#allocation19_spill] sm:$0xff] %v2454_v61  ;;  %v1959_v39 = vld [vmem:[%s4242_s0 + $0xf0] sm:$0xff]  }
  0x6d   :  { %v2475_v7 = vunpack.c.h.bf16 %v1959_v39 }
  0x6e   :  { %v323_v56 = vadd.f32 %v2428_v9, %v322_v22  ;;  %v583_v16 = vadd.f32 %v582_v30, %v456_v53  ;;  %v459_v9 = vmul.f32 %v2441_v47, %v2441_v47  ;;  %v2467_v30 = vunpack.c.l.bf16 %v1959_v39 }
  0x6f   :  { %4351 = vst [vmem:[#allocation22_spill] sm:$0xff] %v2475_v7 }
  0x70   :  { %v324_v58 = vadd.f32 %v2436_v19, %v323_v56  ;;  %v584_v0 = vadd.f32 %v583_v16, %v457_v46  ;;  %v460_v56 = vmul.f32 %v2449_v17, %v2449_v17  ;;  %4350 = vst [vmem:[#allocation21_spill] sm:$0xff] %v2467_v30  ;;  %v1960_v19 = vld [vmem:[%s4242_s0 + $0xf8] sm:$0xff]  }
  0x71   :  { %v2488_v39 = vunpack.c.h.bf16 %v1960_v19 }
  0x72   :  { %v325_v22 = vadd.f32 %v2441_v47, %v324_v58  ;;  %v585_v53 = vadd.f32 %v584_v0, %v458_v29  ;;  %v461_v47 = vmul.f32 %v2454_v61, %v2454_v61  ;;  %v2480_v0 = vunpack.c.l.bf16 %v1960_v19 }
  0x73   :  { %4353 = vst [vmem:[#allocation24_spill] sm:$0xff] %v2488_v39 }
  0x74   :  { %v326_v34 = vadd.f32 %v2449_v17, %v325_v22  ;;  %v586_v46 = vadd.f32 %v585_v53, %v459_v9  ;;  %v462_v22 = vmul.f32 %v2462_v40, %v2462_v40  ;;  %4352 = vst [vmem:[#allocation23_spill] sm:$0xff] %v2480_v0  ;;  %v1961_v17 = vld [vmem:[%s4242_s0 + $0x100] sm:$0xff]  }
  0x75   :  { %v2501_v19 = vunpack.c.h.bf16 %v1961_v17 }
  0x76   :  { %v327_v58 = vadd.f32 %v2454_v61, %v326_v34  ;;  %v587_v29 = vadd.f32 %v586_v46, %v460_v56  ;;  %v463_v61 = vmul.f32 %v2467_v30, %v2467_v30  ;;  %v2493_v46 = vunpack.c.l.bf16 %v1961_v17 }
  0x77   :  { %4355 = vst [vmem:[#allocation26_spill] sm:$0xff] %v2501_v19 }
  0x78   :  { %v328_v16 = vadd.f32 %v2462_v40, %v327_v58  ;;  %v588_v9 = vadd.f32 %v587_v29, %v461_v47  ;;  %v464_v58 = vmul.f32 %v2475_v7, %v2475_v7  ;;  %4354 = vst [vmem:[#allocation25_spill] sm:$0xff] %v2493_v46  ;;  %v1962_v40 = vld [vmem:[%s4242_s0 + $0x108] sm:$0xff]  }
  0x79   :  { %v2514_v17 = vunpack.c.h.bf16 %v1962_v40 }
  0x7a   :  { %v329_v34 = vadd.f32 %v2467_v30, %v328_v16  ;;  %v589_v56 = vadd.f32 %v588_v9, %v462_v22  ;;  %v465_v30 = vmul.f32 %v2480_v0, %v2480_v0  ;;  %v2506_v9 = vunpack.c.l.bf16 %v1962_v40 }
  0x7b   :  { %4357 = vst [vmem:[#allocation28_spill] sm:$0xff] %v2514_v17 }
  0x7c   :  { %v330_v53 = vadd.f32 %v2475_v7, %v329_v34  ;;  %v590_v47 = vadd.f32 %v589_v56, %v463_v61  ;;  %v466_v34 = vmul.f32 %v2488_v39, %v2488_v39  ;;  %4356 = vst [vmem:[#allocation27_spill] sm:$0xff] %v2506_v9  ;;  %v1963_v7 = vld [vmem:[%s4242_s0 + $0x110] sm:$0xff]  }
  0x7d   :  { %v2527_v40 = vunpack.c.h.bf16 %v1963_v7 }
  0x7e   :  { %v331_v16 = vadd.f32 %v2480_v0, %v330_v53  ;;  %v591_v22 = vadd.f32 %v590_v47, %v464_v58  ;;  %v467_v0 = vmul.f32 %v2493_v46, %v2493_v46  ;;  %v2519_v47 = vunpack.c.l.bf16 %v1963_v7 }
  0x7f   :  { %4359 = vst [vmem:[#allocation30_spill] sm:$0xff] %v2527_v40 }
  0x80   :  { %v332_v29 = vadd.f32 %v2488_v39, %v331_v16  ;;  %v592_v61 = vadd.f32 %v591_v22, %v465_v30  ;;  %v468_v16 = vmul.f32 %v2501_v19, %v2501_v19  ;;  %4358 = vst [vmem:[#allocation29_spill] sm:$0xff] %v2519_v47  ;;  %v1964_v39 = vld [vmem:[%s4242_s0 + $0x118] sm:$0xff]  }
  0x81   :  { %v2540_v7 = vunpack.c.h.bf16 %v1964_v39 }
  0x82   :  { %v333_v53 = vadd.f32 %v2493_v46, %v332_v29  ;;  %v593_v58 = vadd.f32 %v592_v61, %v466_v34  ;;  %v469_v46 = vmul.f32 %v2506_v9, %v2506_v9  ;;  %v2532_v61 = vunpack.c.l.bf16 %v1964_v39 }
  0x83   :  { %4361 = vst [vmem:[#allocation32_spill] sm:$0xff] %v2540_v7 }
  0x84   :  { %v334_v56 = vadd.f32 %v2501_v19, %v333_v53  ;;  %v594_v30 = vadd.f32 %v593_v58, %v467_v0  ;;  %v470_v53 = vmul.f32 %v2514_v17, %v2514_v17  ;;  %4360 = vst [vmem:[#allocation31_spill] sm:$0xff] %v2532_v61  ;;  %v1965_v19 = vld [vmem:[%s4242_s0 + $0x120] sm:$0xff]  }
  0x85   :  { %v2553_v39 = vunpack.c.h.bf16 %v1965_v19 }
  0x86   :  { %v335_v29 = vadd.f32 %v2506_v9, %v334_v56  ;;  %v595_v34 = vadd.f32 %v594_v30, %v468_v16  ;;  %v471_v9 = vmul.f32 %v2519_v47, %v2519_v47  ;;  %v2545_v30 = vunpack.c.l.bf16 %v1965_v19 }
  0x87   :  { %4363 = vst [vmem:[#allocation34_spill] sm:$0xff] %v2553_v39 }
  0x88   :  { %v336_v22 = vadd.f32 %v2514_v17, %v335_v29  ;;  %v596_v0 = vadd.f32 %v595_v34, %v469_v46  ;;  %v472_v29 = vmul.f32 %v2527_v40, %v2527_v40  ;;  %4362 = vst [vmem:[#allocation33_spill] sm:$0xff] %v2545_v30  ;;  %v1966_v17 = vld [vmem:[%s4242_s0 + $0x128] sm:$0xff]  }
  0x89   :  { %v2566_v19 = vunpack.c.h.bf16 %v1966_v17 }
  0x8a   :  { %v337_v56 = vadd.f32 %v2519_v47, %v336_v22  ;;  %v597_v16 = vadd.f32 %v596_v0, %v470_v53  ;;  %v473_v47 = vmul.f32 %v2532_v61, %v2532_v61  ;;  %v2558_v0 = vunpack.c.l.bf16 %v1966_v17 }
  0x8b   :  { %4365 = vst [vmem:[#allocation36_spill] sm:$0xff] %v2566_v19 }
  0x8c   :  { %v338_v58 = vadd.f32 %v2527_v40, %v337_v56  ;;  %v598_v46 = vadd.f32 %v597_v16, %v471_v9  ;;  %v474_v56 = vmul.f32 %v2540_v7, %v2540_v7  ;;  %4364 = vst [vmem:[#allocation35_spill] sm:$0xff] %v2558_v0  ;;  %v1967_v40 = vld [vmem:[%s4242_s0 + $0x130] sm:$0xff]  }
  0x8d   :  { %v2579_v17 = vunpack.c.h.bf16 %v1967_v40 }
  0x8e   :  { %v339_v22 = vadd.f32 %v2532_v61, %v338_v58  ;;  %v599_v53 = vadd.f32 %v598_v46, %v472_v29  ;;  %v475_v61 = vmul.f32 %v2545_v30, %v2545_v30  ;;  %v2571_v46 = vunpack.c.l.bf16 %v1967_v40 }
  0x8f   :  { %4367 = vst [vmem:[#allocation38_spill] sm:$0xff] %v2579_v17 }
  0x90   :  { %v340_v34 = vadd.f32 %v2540_v7, %v339_v22  ;;  %v600_v9 = vadd.f32 %v599_v53, %v473_v47  ;;  %v476_v22 = vmul.f32 %v2553_v39, %v2553_v39  ;;  %4366 = vst [vmem:[#allocation37_spill] sm:$0xff] %v2571_v46  ;;  %v1968_v7 = vld [vmem:[%s4242_s0 + $0x138] sm:$0xff]  }
  0x91   :  { %v2592_v40 = vunpack.c.h.bf16 %v1968_v7 }
  0x92   :  { %v341_v58 = vadd.f32 %v2545_v30, %v340_v34  ;;  %v601_v29 = vadd.f32 %v600_v9, %v474_v56  ;;  %v477_v30 = vmul.f32 %v2558_v0, %v2558_v0  ;;  %v2584_v9 = vunpack.c.l.bf16 %v1968_v7 }
  0x93   :  { %4369 = vst [vmem:[#allocation40_spill] sm:$0xff] %v2592_v40 }
  0x94   :  { %v342_v16 = vadd.f32 %v2553_v39, %v341_v58  ;;  %v602_v47 = vadd.f32 %v601_v29, %v475_v61  ;;  %v478_v58 = vmul.f32 %v2566_v19, %v2566_v19  ;;  %4368 = vst [vmem:[#allocation39_spill] sm:$0xff] %v2584_v9  ;;  %v1969_v39 = vld [vmem:[%s4242_s0 + $0x140] sm:$0xff]  }
  0x95   :  { %v2605_v7 = vunpack.c.h.bf16 %v1969_v39 }
  0x96   :  { %v343_v34 = vadd.f32 %v2558_v0, %v342_v16  ;;  %v603_v56 = vadd.f32 %v602_v47, %v476_v22  ;;  %v479_v0 = vmul.f32 %v2571_v46, %v2571_v46  ;;  %v2597_v47 = vunpack.c.l.bf16 %v1969_v39 }
  0x97   :  { %4371 = vst [vmem:[#allocation42_spill] sm:$0xff] %v2605_v7 }
  0x98   :  { %v344_v53 = vadd.f32 %v2566_v19, %v343_v34  ;;  %v604_v61 = vadd.f32 %v603_v56, %v477_v30  ;;  %v480_v34 = vmul.f32 %v2579_v17, %v2579_v17  ;;  %4370 = vst [vmem:[#allocation41_spill] sm:$0xff] %v2597_v47  ;;  %v1970_v19 = vld [vmem:[%s4242_s0 + $0x148] sm:$0xff]  }
  0x99   :  { %v2618_v39 = vunpack.c.h.bf16 %v1970_v19 }
  0x9a   :  { %v345_v16 = vadd.f32 %v2571_v46, %v344_v53  ;;  %v605_v22 = vadd.f32 %v604_v61, %v478_v58  ;;  %v481_v46 = vmul.f32 %v2584_v9, %v2584_v9  ;;  %v2610_v61 = vunpack.c.l.bf16 %v1970_v19 }
  0x9b   :  { %4373 = vst [vmem:[#allocation44_spill] sm:$0xff] %v2618_v39 }
  0x9c   :  { %v346_v29 = vadd.f32 %v2579_v17, %v345_v16  ;;  %v606_v30 = vadd.f32 %v605_v22, %v479_v0  ;;  %v482_v16 = vmul.f32 %v2592_v40, %v2592_v40  ;;  %4372 = vst [vmem:[#allocation43_spill] sm:$0xff] %v2610_v61  ;;  %v1971_v17 = vld [vmem:[%s4242_s0 + $0x150] sm:$0xff]  }
  0x9d   :  { %v2631_v19 = vunpack.c.h.bf16 %v1971_v17 }
  0x9e   :  { %v347_v53 = vadd.f32 %v2584_v9, %v346_v29  ;;  %v607_v58 = vadd.f32 %v606_v30, %v480_v34  ;;  %v483_v9 = vmul.f32 %v2597_v47, %v2597_v47  ;;  %v2623_v30 = vunpack.c.l.bf16 %v1971_v17 }
  0x9f   :  { %4375 = vst [vmem:[#allocation46_spill] sm:$0xff] %v2631_v19 }
  0xa0   :  { %v348_v56 = vadd.f32 %v2592_v40, %v347_v53  ;;  %v608_v0 = vadd.f32 %v607_v58, %v481_v46  ;;  %v484_v53 = vmul.f32 %v2605_v7, %v2605_v7  ;;  %4374 = vst [vmem:[#allocation45_spill] sm:$0xff] %v2623_v30  ;;  %v1972_v40 = vld [vmem:[%s4242_s0 + $0x158] sm:$0xff]  }
  0xa1   :  { %v2644_v17 = vunpack.c.h.bf16 %v1972_v40 }
  0xa2   :  { %v349_v29 = vadd.f32 %v2597_v47, %v348_v56  ;;  %v609_v34 = vadd.f32 %v608_v0, %v482_v16  ;;  %v485_v47 = vmul.f32 %v2610_v61, %v2610_v61  ;;  %v2636_v0 = vunpack.c.l.bf16 %v1972_v40 }
  0xa3   :  { %4377 = vst [vmem:[#allocation48_spill] sm:$0xff] %v2644_v17 }
  0xa4   :  { %v350_v22 = vadd.f32 %v2605_v7, %v349_v29  ;;  %v610_v46 = vadd.f32 %v609_v34, %v483_v9  ;;  %v486_v29 = vmul.f32 %v2618_v39, %v2618_v39  ;;  %4376 = vst [vmem:[#allocation47_spill] sm:$0xff] %v2636_v0  ;;  %v1973_v7 = vld [vmem:[%s4242_s0 + $0x160] sm:$0xff]  }
  0xa5   :  { %v2657_v40 = vunpack.c.h.bf16 %v1973_v7 }
  0xa6   :  { %v351_v56 = vadd.f32 %v2610_v61, %v350_v22  ;;  %v611_v16 = vadd.f32 %v610_v46, %v484_v53  ;;  %v487_v61 = vmul.f32 %v2623_v30, %v2623_v30  ;;  %v2649_v46 = vunpack.c.l.bf16 %v1973_v7 }
  0xa7   :  { %4379 = vst [vmem:[#allocation50_spill] sm:$0xff] %v2657_v40 }
  0xa8   :  { %v352_v58 = vadd.f32 %v2618_v39, %v351_v56  ;;  %v612_v9 = vadd.f32 %v611_v16, %v485_v47  ;;  %v488_v56 = vmul.f32 %v2631_v19, %v2631_v19  ;;  %4378 = vst [vmem:[#allocation49_spill] sm:$0xff] %v2649_v46  ;;  %v1974_v39 = vld [vmem:[%s4242_s0 + $0x168] sm:$0xff]  }
  0xa9   :  { %v2670_v7 = vunpack.c.h.bf16 %v1974_v39 }
  0xaa   :  { %v353_v22 = vadd.f32 %v2623_v30, %v352_v58  ;;  %v613_v53 = vadd.f32 %v612_v9, %v486_v29  ;;  %v489_v30 = vmul.f32 %v2636_v0, %v2636_v0  ;;  %v2662_v9 = vunpack.c.l.bf16 %v1974_v39 }
  0xab   :  { %4381 = vst [vmem:[#allocation52_spill] sm:$0xff] %v2670_v7 }
  0xac   :  { %v354_v34 = vadd.f32 %v2631_v19, %v353_v22  ;;  %v614_v47 = vadd.f32 %v613_v53, %v487_v61  ;;  %v490_v22 = vmul.f32 %v2644_v17, %v2644_v17  ;;  %4380 = vst [vmem:[#allocation51_spill] sm:$0xff] %v2662_v9  ;;  %v1975_v19 = vld [vmem:[%s4242_s0 + $0x170] sm:$0xff]  }
  0xad   :  { %v2683_v39 = vunpack.c.h.bf16 %v1975_v19 }
  0xae   :  { %v355_v58 = vadd.f32 %v2636_v0, %v354_v34  ;;  %v615_v29 = vadd.f32 %v614_v47, %v488_v56  ;;  %v491_v0 = vmul.f32 %v2649_v46, %v2649_v46  ;;  %v2675_v47 = vunpack.c.l.bf16 %v1975_v19 }
  0xaf   :  { %4383 = vst [vmem:[#allocation54_spill] sm:$0xff] %v2683_v39 }
  0xb0   :  { %v356_v16 = vadd.f32 %v2644_v17, %v355_v58  ;;  %v616_v61 = vadd.f32 %v615_v29, %v489_v30  ;;  %v492_v58 = vmul.f32 %v2657_v40, %v2657_v40  ;;  %4382 = vst [vmem:[#allocation53_spill] sm:$0xff] %v2675_v47  ;;  %v1976_v17 = vld [vmem:[%s4242_s0 + $0x178] sm:$0xff]  }
  0xb1   :  { %v2696_v19 = vunpack.c.h.bf16 %v1976_v17 }
  0xb2   :  { %v357_v34 = vadd.f32 %v2649_v46, %v356_v16  ;;  %v617_v56 = vadd.f32 %v616_v61, %v490_v22  ;;  %v493_v46 = vmul.f32 %v2662_v9, %v2662_v9  ;;  %v2688_v61 = vunpack.c.l.bf16 %v1976_v17 }
  0xb3   :  { %4385 = vst [vmem:[#allocation56_spill] sm:$0xff] %v2696_v19 }
  0xb4   :  { %v358_v53 = vadd.f32 %v2657_v40, %v357_v34  ;;  %v618_v30 = vadd.f32 %v617_v56, %v491_v0  ;;  %v494_v34 = vmul.f32 %v2670_v7, %v2670_v7  ;;  %4384 = vst [vmem:[#allocation55_spill] sm:$0xff] %v2688_v61  ;;  %v1977_v40 = vld [vmem:[%s4242_s0 + $0x180] sm:$0xff]  }
  0xb5   :  { %v2709_v17 = vunpack.c.h.bf16 %v1977_v40 }
  0xb6   :  { %v359_v16 = vadd.f32 %v2662_v9, %v358_v53  ;;  %v619_v22 = vadd.f32 %v618_v30, %v492_v58  ;;  %v495_v9 = vmul.f32 %v2675_v47, %v2675_v47  ;;  %v2701_v30 = vunpack.c.l.bf16 %v1977_v40 }
  0xb7   :  { %4387 = vst [vmem:[#allocation58_spill] sm:$0xff] %v2709_v17 }
  0xb8   :  { %v360_v29 = vadd.f32 %v2670_v7, %v359_v16  ;;  %v620_v0 = vadd.f32 %v619_v22, %v493_v46  ;;  %v496_v16 = vmul.f32 %v2683_v39, %v2683_v39  ;;  %4386 = vst [vmem:[#allocation57_spill] sm:$0xff] %v2701_v30  ;;  %v1978_v7 = vld [vmem:[%s4242_s0 + $0x188] sm:$0xff]  }
  0xb9   :  { %v2722_v40 = vunpack.c.h.bf16 %v1978_v7 }
  0xba   :  { %v361_v53 = vadd.f32 %v2675_v47, %v360_v29  ;;  %v621_v58 = vadd.f32 %v620_v0, %v494_v34  ;;  %v497_v47 = vmul.f32 %v2688_v61, %v2688_v61  ;;  %v2714_v0 = vunpack.c.l.bf16 %v1978_v7 }
  0xbb   :  { %4389 = vst [vmem:[#allocation60_spill] sm:$0xff] %v2722_v40 }
  0xbc   :  { %v362_v56 = vadd.f32 %v2683_v39, %v361_v53  ;;  %v622_v46 = vadd.f32 %v621_v58, %v495_v9  ;;  %v498_v53 = vmul.f32 %v2696_v19, %v2696_v19  ;;  %4388 = vst [vmem:[#allocation59_spill] sm:$0xff] %v2714_v0  ;;  %v1979_v39 = vld [vmem:[%s4242_s0 + $0x190] sm:$0xff]  }
  0xbd   :  { %v2735_v7 = vunpack.c.h.bf16 %v1979_v39 }
  0xbe   :  { %v363_v29 = vadd.f32 %v2688_v61, %v362_v56  ;;  %v623_v34 = vadd.f32 %v622_v46, %v496_v16  ;;  %v499_v61 = vmul.f32 %v2701_v30, %v2701_v30  ;;  %v2727_v46 = vunpack.c.l.bf16 %v1979_v39 }
  0xbf   :  { %4391 = vst [vmem:[#allocation62_spill] sm:$0xff] %v2735_v7 }
  0xc0   :  { %v364_v22 = vadd.f32 %v2696_v19, %v363_v29  ;;  %v624_v9 = vadd.f32 %v623_v34, %v497_v47  ;;  %v500_v29 = vmul.f32 %v2709_v17, %v2709_v17  ;;  %4390 = vst [vmem:[#allocation61_spill] sm:$0xff] %v2727_v46  ;;  %v1980_v19 = vld [vmem:[%s4242_s0 + $0x198] sm:$0xff]  }
  0xc1   :  { %v2748_v39 = vunpack.c.h.bf16 %v1980_v19 }
  0xc2   :  { %v365_v56 = vadd.f32 %v2701_v30, %v364_v22  ;;  %v625_v16 = vadd.f32 %v624_v9, %v498_v53  ;;  %v501_v30 = vmul.f32 %v2714_v0, %v2714_v0  ;;  %v2740_v9 = vunpack.c.l.bf16 %v1980_v19 }
  0xc3   :  { %4393 = vst [vmem:[#allocation64_spill] sm:$0xff] %v2748_v39 }
  0xc4   :  { %v366_v58 = vadd.f32 %v2709_v17, %v365_v56  ;;  %v626_v47 = vadd.f32 %v625_v16, %v499_v61  ;;  %v502_v56 = vmul.f32 %v2722_v40, %v2722_v40  ;;  %4392 = vst [vmem:[#allocation63_spill] sm:$0xff] %v2740_v9  ;;  %v1981_v17 = vld [vmem:[%s4242_s0 + $0x1a0] sm:$0xff]  }
  0xc5   :  { %v2761_v19 = vunpack.c.h.bf16 %v1981_v17 }
  0xc6   :  { %v367_v22 = vadd.f32 %v2714_v0, %v366_v58  ;;  %v627_v53 = vadd.f32 %v626_v47, %v500_v29  ;;  %v503_v0 = vmul.f32 %v2727_v46, %v2727_v46  ;;  %v2753_v47 = vunpack.c.l.bf16 %v1981_v17 }
  0xc7   :  { %4395 = vst [vmem:[#allocation66_spill] sm:$0xff] %v2761_v19 }
  0xc8   :  { %v368_v34 = vadd.f32 %v2722_v40, %v367_v22  ;;  %v628_v61 = vadd.f32 %v627_v53, %v501_v30  ;;  %v504_v22 = vmul.f32 %v2735_v7, %v2735_v7  ;;  %4394 = vst [vmem:[#allocation65_spill] sm:$0xff] %v2753_v47  ;;  %v1982_v40 = vld [vmem:[%s4242_s0 + $0x1a8] sm:$0xff]  }
  0xc9   :  { %v2774_v17 = vunpack.c.h.bf16 %v1982_v40 }
  0xca   :  { %v369_v58 = vadd.f32 %v2727_v46, %v368_v34  ;;  %v629_v29 = vadd.f32 %v628_v61, %v502_v56  ;;  %v505_v46 = vmul.f32 %v2740_v9, %v2740_v9  ;;  %v2766_v61 = vunpack.c.l.bf16 %v1982_v40 }
  0xcb   :  { %4397 = vst [vmem:[#allocation68_spill] sm:$0xff] %v2774_v17 }
  0xcc   :  { %v370_v16 = vadd.f32 %v2735_v7, %v369_v58  ;;  %v630_v30 = vadd.f32 %v629_v29, %v503_v0  ;;  %v506_v58 = vmul.f32 %v2748_v39, %v2748_v39  ;;  %4396 = vst [vmem:[#allocation67_spill] sm:$0xff] %v2766_v61  ;;  %v1983_v7 = vld [vmem:[%s4242_s0 + $0x1b0] sm:$0xff]  }
  0xcd   :  { %v2787_v40 = vunpack.c.h.bf16 %v1983_v7 }
  0xce   :  { %v371_v34 = vadd.f32 %v2740_v9, %v370_v16  ;;  %v631_v56 = vadd.f32 %v630_v30, %v504_v22  ;;  %v507_v9 = vmul.f32 %v2753_v47, %v2753_v47  ;;  %v2779_v30 = vunpack.c.l.bf16 %v1983_v7 }
  0xcf   :  { %4399 = vst [vmem:[#allocation70_spill] sm:$0xff] %v2787_v40 }
  0xd0   :  { %v372_v53 = vadd.f32 %v2748_v39, %v371_v34  ;;  %v632_v0 = vadd.f32 %v631_v56, %v505_v46  ;;  %v508_v34 = vmul.f32 %v2761_v19, %v2761_v19  ;;  %4398 = vst [vmem:[#allocation69_spill] sm:$0xff] %v2779_v30  ;;  %v1984_v39 = vld [vmem:[%s4242_s0 + $0x1b8] sm:$0xff]  }
  0xd1   :  { %v2800_v7 = vunpack.c.h.bf16 %v1984_v39 }
  0xd2   :  { %v373_v16 = vadd.f32 %v2753_v47, %v372_v53  ;;  %v633_v22 = vadd.f32 %v632_v0, %v506_v58  ;;  %v509_v47 = vmul.f32 %v2766_v61, %v2766_v61  ;;  %v2792_v0 = vunpack.c.l.bf16 %v1984_v39 }
  0xd3   :  { %4401 = vst [vmem:[#allocation72_spill] sm:$0xff] %v2800_v7 }
  0xd4   :  { %v374_v29 = vadd.f32 %v2761_v19, %v373_v16  ;;  %v634_v46 = vadd.f32 %v633_v22, %v507_v9  ;;  %v510_v16 = vmul.f32 %v2774_v17, %v2774_v17  ;;  %4400 = vst [vmem:[#allocation71_spill] sm:$0xff] %v2792_v0  ;;  %v1985_v19 = vld [vmem:[%s4242_s0 + $0x1c0] sm:$0xff]  }
  0xd5   :  { %v2813_v39 = vunpack.c.h.bf16 %v1985_v19 }
  0xd6   :  { %v375_v53 = vadd.f32 %v2766_v61, %v374_v29  ;;  %v635_v58 = vadd.f32 %v634_v46, %v508_v34  ;;  %v511_v61 = vmul.f32 %v2779_v30, %v2779_v30  ;;  %v2805_v46 = vunpack.c.l.bf16 %v1985_v19 }
  0xd7   :  { %4403 = vst [vmem:[#allocation74_spill] sm:$0xff] %v2813_v39 }
  0xd8   :  { %v376_v56 = vadd.f32 %v2774_v17, %v375_v53  ;;  %v636_v9 = vadd.f32 %v635_v58, %v509_v47  ;;  %v512_v53 = vmul.f32 %v2787_v40, %v2787_v40  ;;  %4402 = vst [vmem:[#allocation73_spill] sm:$0xff] %v2805_v46  ;;  %v1986_v17 = vld [vmem:[%s4242_s0 + $0x1c8] sm:$0xff]  }
  0xd9   :  { %v2826_v19 = vunpack.c.h.bf16 %v1986_v17 }
  0xda   :  { %v377_v29 = vadd.f32 %v2779_v30, %v376_v56  ;;  %v637_v34 = vadd.f32 %v636_v9, %v510_v16  ;;  %v513_v30 = vmul.f32 %v2792_v0, %v2792_v0  ;;  %v2818_v9 = vunpack.c.l.bf16 %v1986_v17 }
  0xdb   :  { %4405 = vst [vmem:[#allocation76_spill] sm:$0xff] %v2826_v19 }
  0xdc   :  { %v378_v22 = vadd.f32 %v2787_v40, %v377_v29  ;;  %v638_v47 = vadd.f32 %v637_v34, %v511_v61  ;;  %v514_v29 = vmul.f32 %v2800_v7, %v2800_v7  ;;  %4404 = vst [vmem:[#allocation75_spill] sm:$0xff] %v2818_v9  ;;  %v1987_v40 = vld [vmem:[%s4242_s0 + $0x1d0] sm:$0xff]  }
  0xdd   :  { %v2839_v17 = vunpack.c.h.bf16 %v1987_v40 }
  0xde   :  { %v379_v56 = vadd.f32 %v2792_v0, %v378_v22  ;;  %v639_v16 = vadd.f32 %v638_v47, %v512_v53  ;;  %v515_v0 = vmul.f32 %v2805_v46, %v2805_v46  ;;  %v2831_v47 = vunpack.c.l.bf16 %v1987_v40 }
  0xdf   :  { %4407 = vst [vmem:[#allocation78_spill] sm:$0xff] %v2839_v17 }
  0xe0   :  { %v380_v58 = vadd.f32 %v2800_v7, %v379_v56  ;;  %v640_v61 = vadd.f32 %v639_v16, %v513_v30  ;;  %v516_v56 = vmul.f32 %v2813_v39, %v2813_v39  ;;  %4406 = vst [vmem:[#allocation77_spill] sm:$0xff] %v2831_v47  ;;  %v1988_v7 = vld [vmem:[%s4242_s0 + $0x1d8] sm:$0xff]  }
  0xe1   :  { %v2852_v40 = vunpack.c.h.bf16 %v1988_v7 }
  0xe2   :  { %v381_v22 = vadd.f32 %v2805_v46, %v380_v58  ;;  %v641_v53 = vadd.f32 %v640_v61, %v514_v29  ;;  %v517_v46 = vmul.f32 %v2818_v9, %v2818_v9  ;;  %v2844_v61 = vunpack.c.l.bf16 %v1988_v7 }
  0xe3   :  { %4409 = vst [vmem:[#allocation80_spill] sm:$0xff] %v2852_v40 }
  0xe4   :  { %v382_v34 = vadd.f32 %v2813_v39, %v381_v22  ;;  %v642_v30 = vadd.f32 %v641_v53, %v515_v0  ;;  %v518_v22 = vmul.f32 %v2826_v19, %v2826_v19  ;;  %4408 = vst [vmem:[#allocation79_spill] sm:$0xff] %v2844_v61  ;;  %v1989_v39 = vld [vmem:[%s4242_s0 + $0x1e0] sm:$0xff]  }
  0xe5   :  { %v2865_v7 = vunpack.c.h.bf16 %v1989_v39 }
  0xe6   :  { %v383_v58 = vadd.f32 %v2818_v9, %v382_v34  ;;  %v643_v29 = vadd.f32 %v642_v30, %v516_v56  ;;  %v519_v9 = vmul.f32 %v2831_v47, %v2831_v47  ;;  %v2857_v30 = vunpack.c.l.bf16 %v1989_v39 }
  0xe7   :  { %4411 = vst [vmem:[#allocation82_spill] sm:$0xff] %v2865_v7 }
  0xe8   :  { %v384_v16 = vadd.f32 %v2826_v19, %v383_v58  ;;  %v644_v0 = vadd.f32 %v643_v29, %v517_v46  ;;  %v520_v58 = vmul.f32 %v2839_v17, %v2839_v17  ;;  %4410 = vst [vmem:[#allocation81_spill] sm:$0xff] %v2857_v30  ;;  %v1990_v19 = vld [vmem:[%s4242_s0 + $0x1e8] sm:$0xff]  }
  0xe9   :  { %v2878_v39 = vunpack.c.h.bf16 %v1990_v19 }
  0xea   :  { %v385_v34 = vadd.f32 %v2831_v47, %v384_v16  ;;  %v645_v56 = vadd.f32 %v644_v0, %v518_v22  ;;  %v521_v47 = vmul.f32 %v2844_v61, %v2844_v61  ;;  %v2870_v0 = vunpack.c.l.bf16 %v1990_v19 }
  0xeb   :  { %4413 = vst [vmem:[#allocation84_spill] sm:$0xff] %v2878_v39 }
  0xec   :  { %v386_v53 = vadd.f32 %v2839_v17, %v385_v34  ;;  %v646_v46 = vadd.f32 %v645_v56, %v519_v9  ;;  %v522_v34 = vmul.f32 %v2852_v40, %v2852_v40  ;;  %4412 = vst [vmem:[#allocation83_spill] sm:$0xff] %v2870_v0  ;;  %v1991_v17 = vld [vmem:[%s4242_s0 + $0x1f0] sm:$0xff]  }
  0xed   :  { %v2891_v19 = vunpack.c.h.bf16 %v1991_v17 }
  0xee   :  { %v387_v16 = vadd.f32 %v2844_v61, %v386_v53  ;;  %v647_v22 = vadd.f32 %v646_v46, %v520_v58  ;;  %v523_v61 = vmul.f32 %v2857_v30, %v2857_v30  ;;  %v2883_v46 = vunpack.c.l.bf16 %v1991_v17 }
  0xef   :  { %4415 = vst [vmem:[#allocation86_spill] sm:$0xff] %v2891_v19  ;;  %v528_v17 = vmul.f32 %v2891_v19, %v2891_v19 }
  0xf0   :  { %v388_v29 = vadd.f32 %v2852_v40, %v387_v16  ;;  %v648_v9 = vadd.f32 %v647_v22, %v521_v47  ;;  %v524_v16 = vmul.f32 %v2865_v7, %v2865_v7  ;;  %4414 = vst [vmem:[#allocation85_spill] sm:$0xff] %v2883_v46  ;;  %v1992_v40 = vld [vmem:[%s4242_s0 + $0x1f8] sm:$0xff]   ;;  %s2059_s0 = smov 64  }
  0xf1   :  { %v2901_v38 = vunpack.c.h.bf16 %v1992_v40 }
  0xf2   :  { %v389_v53 = vadd.f32 %v2857_v30, %v388_v29  ;;  %v649_v58 = vadd.f32 %v648_v9, %v522_v34  ;;  %v525_v30 = vmul.f32 %v2870_v0, %v2870_v0  ;;  %v2896_v9 = vunpack.c.l.bf16 %v1992_v40 }
  0xf4   :  { %v390_v56 = vadd.f32 %v2865_v7, %v389_v53  ;;  %v650_v47 = vadd.f32 %v649_v58, %v523_v61  ;;  %v526_v53 = vmul.f32 %v2878_v39, %v2878_v39  ;;  %v527_v7 = vmul.f32 %v2883_v46, %v2883_v46 }
  0xf6   :  { %v391_v29 = vadd.f32 %v2870_v0, %v390_v56  ;;  %v651_v34 = vadd.f32 %v650_v47, %v524_v16  ;;  %v529_v16 = vmul.f32 %v2896_v9, %v2896_v9 }
  0xf8   :  { %v392_v22 = vadd.f32 %v2878_v39, %v391_v29  ;;  %v652_v49 = vadd.f32 %v651_v34, %v525_v30 }
  0xfa   :  { %v393_v56 = vadd.f32 %v2883_v46, %v392_v22  ;;  %v653_v58 = vadd.f32 %v652_v49, %v526_v53  ;;  %v530_v46 = vmul.f32 %v2901_v38, %v2901_v38 }
  0xfc   :  { %v394_v61 = vadd.f32 %v2891_v19, %v393_v56  ;;  %v654_v47 = vadd.f32 %v653_v58, %v527_v7 }
  0xfe   :  { %v395_v29 = vadd.f32 %v2896_v9, %v394_v61  ;;  %v655_v30 = vadd.f32 %v654_v47, %v528_v17 }
 0x100   :  { %v396_v22 = vadd.f32 %v2901_v38, %v395_v29  ;;  %v656_v34 = vadd.f32 %v655_v30, %v529_v16 }
 0x102   :  { %v397_v40 = vrot.slane %v396_v22, 4  ;;  %v657_v56 = vadd.f32 %v656_v34, %v530_v46 }
 0x104   :  { %v398_v39 = vadd.f32 %v397_v40, %v396_v22  ;;  %v658_v26 = vrot.slane %v657_v56, 4 }
 0x106   :  { %v399_v0 = vrot.slane %v398_v39, 2  ;;  %v659_v49 = vadd.f32 %v658_v26, %v657_v56 }
 0x108   :  { %v400_v19 = vadd.f32 %v399_v0, %v398_v39  ;;  %v660_v61 = vrot.slane %v659_v49, 2 }
 0x10a   :  { %v401_v53 = vrot.slane %v400_v19, 1  ;;  %v661_v62 = vadd.f32 %v660_v61, %v659_v49 }
 0x10c   :  { %v402_v11 = vadd.f32 %v401_v53, %v400_v19  ;;  %v662_v7 = vrot.slane %v661_v62, 1 }
 0x10e   :  { %665 = vrot.lane.b32.xlu0 %v402_v11, %s2059_s0  ;;  %v663_v58 = vadd.f32 %v662_v7, %v661_v62  ;;  %v679_v62 = vld [vmem:[%s4243_s1] sm:$0x1] }
 0x116   :  { %670 = vrot.lane.b32.xlu0 %v663_v58, %s2059_s0 }
 0x180   :  { %v666_v17 = vpop.permute.xlu0 %665 }
 0x181   :  { %v668_v29 = vadd.f32 %v666_v17, %v402_v11  ;;  %v692_v17 = vld [vmem:[%s4244_s2] sm:$0x1] }
 0x183   :  { %v674_v16 = vmul.f32 0.00048828125, %v668_v29 }
 0x185   :  { %v676_v30 = vmul.f32 %v674_v16, %v674_v16 }
 0x188   :  { %v671_v47 = vpop.permute.xlu0 %670 }
 0x189   :  { %v673_v46 = vadd.f32 %v671_v47, %v663_v58 }
 0x18b   :  { %v675_v22 = vmul.f32 0.00048828125, %v673_v46 }
 0x18d   :  { %v677_v0 = vsub.f32 %v675_v22, %v676_v30 }
 0x18f   :  { %v678_v26 = vmax.f32 %v677_v0, 0.0 }
 0x191   :  { %v680_v39 = vadd.f32 1e-05, %v678_v26 }
 0x193   :  { %2057 = vrsqrt.f32 %v680_v39  ;;  %vm687_vm1 = vweird.f32 %v680_v39 }
 0x199   :  { %v2058_v19 = vpop.eup %2057 }
 0x19a   :  { %v682_v40 = vmul.f32 %v2058_v19, %v680_v39  ;;  %vm688_vm0 = vweird.f32 %v2058_v19 }
 0x19b   :  { %vm689_vm2 = vmor %vm687_vm1, %vm688_vm0 }
 0x19c   :  { %v683_v34 = vmul.f32 %v2058_v19, %v682_v40 }
 0x19e   :  { %v684_v56 = vmul.f32 0.5, %v683_v34 }
 0x1a0   :  { %v685_v49 = vsub.f32 1.5, %v684_v56  ;;  %v4416_v56 = vld [vmem:[#allocation2_spill] sm:$0xff] }
 0x1a2   :  { %v686_v11 = vmul.f32 %v2058_v19, %v685_v49  ;;  %v4417_v49 = vld [vmem:[#allocation3_spill] sm:$0xff] }
 0x1a4   :  { %v690_v53 = vsel %vm689_vm2, %v2058_v19, %v686_v11  ;;  %v4419_v11 = vld [vmem:[#allocation5_spill] sm:$0xff] }
 0x1a5   :  { %v691_v61 = vmul.f32 %v690_v53, %v679_v62  ;;  %v4418_v62 = vld [vmem:[#allocation4_spill] sm:$0xff]  ;;  %v4420_v53 = vld [vmem:[#allocation6_spill] sm:$0xff] }
 0x1a7   :  { %v696_v7 = vperm.slane %v691_v61, 0  ;;  %v693_v58 = vmul.f32 %v691_v61, %v674_v16 }
 0x1a9   :  { %697 = vrot.lane.b32.xlu1 %v696_v7, %s2059_s0  ;;  %v694_v29 = vsub.f32 %v692_v17, %v693_v58  ;;  %v4422_v58 = vld [vmem:[#allocation8_spill] sm:$0xff] }
 0x1ab   :  { %v703_v47 = vperm.slane %v694_v29, 0 }
 0x1b1   :  { %704 = vrot.lane.b32.xlu1 %v703_v47, %s2059_s0 }
 0x21b   :  { %v698_v46 = vpop.permute.xlu1 %697 }
 0x21c   :  { %v701_v22 = vsel %vm700_vm3, %v691_v61, %v698_v46  ;;  %v4421_v61 = vld [vmem:[#allocation7_spill] sm:$0xff]  ;;  %v4424_v46 = vld [vmem:[#allocation10_spill] sm:$0xff] }
 0x21d   :  { %v2923_v30 = vperm.slane %v701_v22, 0 }
 0x21f   :  { %v2927_v0 = vmul.f32 %v2086_v2, %v2923_v30  ;;  %v2931_v16 = vmul.f32 %v2088_v3, %v2923_v30  ;;  %v2935_v26 = vmul.f32 %v2090_v4, %v2923_v30  ;;  %v2939_v39 = vmul.f32 %v2095_v6, %v2923_v30 }
 0x220   :  { %v2943_v19 = vmul.f32 %v2103_v10, %v2923_v30  ;;  %v2947_v2 = vmul.f32 %v2111_v14, %v2923_v30  ;;  %v2951_v3 = vmul.f32 %v2116_v18, %v2923_v30  ;;  %v2955_v4 = vmul.f32 %v2124_v23, %v2923_v30 }
 0x221   :  { %v2959_v6 = vmul.f32 %v2129_v27, %v2923_v30  ;;  %v2963_v10 = vmul.f32 %v2137_v32, %v2923_v30  ;;  %v2967_v14 = vmul.f32 %v2142_v36, %v2923_v30  ;;  %v2971_v18 = vmul.f32 %v2150_v41, %v2923_v30 }
 0x222   :  { %v2975_v23 = vmul.f32 %v2155_v45, %v2923_v30  ;;  %v2979_v27 = vmul.f32 %v2163_v50, %v2923_v30  ;;  %v2983_v32 = vmul.f32 %v2168_v54, %v2923_v30  ;;  %v2987_v36 = vmul.f32 %v2176_v59, %v2923_v30 }
 0x223   :  { %v705_v40 = vpop.permute.xlu1 %704  ;;  %v2991_v41 = vmul.f32 %v2181_v63, %v2923_v30  ;;  %v2995_v45 = vmul.f32 %v2189_v8, %v2923_v30  ;;  %v3000_v50 = vmul.f32 %v2194_v13, %v2923_v30  ;;  %v3004_v54 = vmul.f32 %v2202_v20, %v2923_v30 }
 0x224   :  { %v707_v34 = vsel %vm700_vm3, %v694_v29, %v705_v40  ;;  %v3008_v59 = vmul.f32 %v2207_v25, %v2923_v30  ;;  %v3012_v63 = vmul.f32 %v2215_v31, %v2923_v30  ;;  %v3016_v8 = vmul.f32 %v2220_v37, %v2923_v30  ;;  %v4423_v29 = vld [vmem:[#allocation9_spill] sm:$0xff]  ;;  %v4426_v40 = vld [vmem:[#allocation11_spill] sm:$0xff] }
 0x225   :  { %v3020_v13 = vmul.f32 %v2228_v43, %v2923_v30  ;;  %v3024_v20 = vmul.f32 %v2233_v48, %v2923_v30  ;;  %v3028_v25 = vmul.f32 %v2241_v55, %v2923_v30  ;;  %v3032_v31 = vmul.f32 %v2246_v60, %v2923_v30 }
 0x226   :  { %v3036_v37 = vmul.f32 %v2254_v5, %v2923_v30  ;;  %v3040_v43 = vmul.f32 %v2259_v12, %v2923_v30  ;;  %v3044_v48 = vmul.f32 %v2267_v21, %v2923_v30  ;;  %v3048_v55 = vmul.f32 %v2272_v28, %v2923_v30 }
 0x227   :  { %v3052_v60 = vmul.f32 %v2280_v35, %v2923_v30  ;;  %v3056_v5 = vmul.f32 %v2285_v42, %v2923_v30  ;;  %v3060_v12 = vmul.f32 %v2293_v51, %v2923_v30  ;;  %v3064_v21 = vmul.f32 %v2298_v57, %v2923_v30 }
 0x228   :  { %v3068_v28 = vmul.f32 %v2306_v1, %v2923_v30  ;;  %v3072_v35 = vmul.f32 %v2311_v15, %v2923_v30  ;;  %v3076_v42 = vmul.f32 %v2319_v24, %v2923_v30  ;;  %v3080_v51 = vmul.f32 %v2324_v33, %v2923_v30 }
 0x229   :  { %v3084_v57 = vmul.f32 %v2332_v44, %v2923_v30  ;;  %v3088_v1 = vmul.f32 %v2337_v52, %v2923_v30  ;;  %v3092_v15 = vmul.f32 %v4416_v56, %v2923_v30  ;;  %v3096_v24 = vmul.f32 %v4417_v49, %v2923_v30  ;;  %v4428_v49 = vld [vmem:[#allocation12_spill] sm:$0xff] }
 0x22a   :  { %v3100_v33 = vmul.f32 %v4418_v62, %v2923_v30  ;;  %v3104_v44 = vmul.f32 %v4419_v11, %v2923_v30  ;;  %v3108_v52 = vmul.f32 %v4420_v53, %v2923_v30  ;;  %v3112_v7 = vmul.f32 %v4421_v61, %v2923_v30  ;;  %v4430_v11 = vld [vmem:[#allocation13_spill] sm:$0xff]  ;;  %v4432_v61 = vld [vmem:[#allocation14_spill] sm:$0xff] }
 0x22b   :  { %v3116_v17 = vmul.f32 %v4422_v58, %v2923_v30  ;;  %v3120_v47 = vmul.f32 %v4423_v29, %v2923_v30  ;;  %v3124_v22 = vmul.f32 %v4424_v46, %v2923_v30  ;;  %v3128_v56 = vmul.f32 %v4426_v40, %v2923_v30  ;;  %v4434_v29 = vld [vmem:[#allocation15_spill] sm:$0xff] }
 0x22c   :  { %v3132_v62 = vmul.f32 %v4428_v49, %v2923_v30  ;;  %v3136_v53 = vmul.f32 %v4430_v11, %v2923_v30  ;;  %v3140_v58 = vmul.f32 %v4432_v61, %v2923_v30  ;;  %v3144_v46 = vmul.f32 %v4434_v29, %v2923_v30 }
 0x22d   :  { %4425 = vst [vmem:[#allocation2_spill] sm:$0xff] %v3124_v22  ;;  %v4436_v22 = vld [vmem:[#allocation16_spill] sm:$0xff] }
 0x22e   :  { %4427 = vst [vmem:[#allocation3_spill] sm:$0xff] %v3128_v56  ;;  %v3148_v40 = vmul.f32 %v4436_v22, %v2923_v30  ;;  %v4438_v56 = vld [vmem:[#allocation17_spill] sm:$0xff] }
 0x22f   :  { %4429 = vst [vmem:[#allocation4_spill] sm:$0xff] %v3132_v62  ;;  %v3152_v49 = vmul.f32 %v4438_v56, %v2923_v30  ;;  %v4440_v62 = vld [vmem:[#allocation18_spill] sm:$0xff] }
 0x230   :  { %4431 = vst [vmem:[#allocation5_spill] sm:$0xff] %v3136_v53  ;;  %v3156_v11 = vmul.f32 %v4440_v62, %v2923_v30  ;;  %v4442_v53 = vld [vmem:[#allocation19_spill] sm:$0xff] }
 0x231   :  { %4433 = vst [vmem:[#allocation6_spill] sm:$0xff] %v3140_v58  ;;  %v3160_v61 = vmul.f32 %v4442_v53, %v2923_v30  ;;  %v4444_v58 = vld [vmem:[#allocation20_spill] sm:$0xff] }
 0x232   :  { %4435 = vst [vmem:[#allocation7_spill] sm:$0xff] %v3144_v46  ;;  %v3164_v29 = vmul.f32 %v4444_v58, %v2923_v30  ;;  %v4446_v46 = vld [vmem:[#allocation21_spill] sm:$0xff] }
 0x233   :  { %4437 = vst [vmem:[#allocation8_spill] sm:$0xff] %v3148_v40  ;;  %v3168_v22 = vmul.f32 %v4446_v46, %v2923_v30  ;;  %v4448_v40 = vld [vmem:[#allocation22_spill] sm:$0xff] }
 0x234   :  { %4439 = vst [vmem:[#allocation9_spill] sm:$0xff] %v3152_v49  ;;  %v3172_v56 = vmul.f32 %v4448_v40, %v2923_v30  ;;  %v4450_v49 = vld [vmem:[#allocation23_spill] sm:$0xff] }
 0x235   :  { %4441 = vst [vmem:[#allocation10_spill] sm:$0xff] %v3156_v11  ;;  %v3176_v62 = vmul.f32 %v4450_v49, %v2923_v30  ;;  %v4452_v11 = vld [vmem:[#allocation24_spill] sm:$0xff] }
 0x236   :  { %4443 = vst [vmem:[#allocation11_spill] sm:$0xff] %v3160_v61  ;;  %v3180_v53 = vmul.f32 %v4452_v11, %v2923_v30  ;;  %v4454_v61 = vld [vmem:[#allocation25_spill] sm:$0xff] }
 0x237   :  { %4445 = vst [vmem:[#allocation12_spill] sm:$0xff] %v3164_v29  ;;  %v3184_v58 = vmul.f32 %v4454_v61, %v2923_v30  ;;  %v4456_v29 = vld [vmem:[#allocation26_spill] sm:$0xff] }
 0x238   :  { %4447 = vst [vmem:[#allocation13_spill] sm:$0xff] %v3168_v22  ;;  %v3188_v46 = vmul.f32 %v4456_v29, %v2923_v30  ;;  %v4458_v22 = vld [vmem:[#allocation27_spill] sm:$0xff] }
 0x239   :  { %4449 = vst [vmem:[#allocation14_spill] sm:$0xff] %v3172_v56  ;;  %v3192_v40 = vmul.f32 %v4458_v22, %v2923_v30  ;;  %v4460_v56 = vld [vmem:[#allocation28_spill] sm:$0xff] }
 0x23a   :  { %4451 = vst [vmem:[#allocation15_spill] sm:$0xff] %v3176_v62  ;;  %v3196_v49 = vmul.f32 %v4460_v56, %v2923_v30  ;;  %v4462_v62 = vld [vmem:[#allocation29_spill] sm:$0xff] }
 0x23b   :  { %4453 = vst [vmem:[#allocation16_spill] sm:$0xff] %v3180_v53  ;;  %v3200_v11 = vmul.f32 %v4462_v62, %v2923_v30  ;;  %v4464_v53 = vld [vmem:[#allocation30_spill] sm:$0xff] }
 0x23c   :  { %4455 = vst [vmem:[#allocation17_spill] sm:$0xff] %v3184_v58  ;;  %v3204_v61 = vmul.f32 %v4464_v53, %v2923_v30  ;;  %v4466_v58 = vld [vmem:[#allocation31_spill] sm:$0xff] }
 0x23d   :  { %4457 = vst [vmem:[#allocation18_spill] sm:$0xff] %v3188_v46  ;;  %v3208_v29 = vmul.f32 %v4466_v58, %v2923_v30  ;;  %v4468_v46 = vld [vmem:[#allocation32_spill] sm:$0xff] }
 0x23e   :  { %4459 = vst [vmem:[#allocation19_spill] sm:$0xff] %v3192_v40  ;;  %v3212_v22 = vmul.f32 %v4468_v46, %v2923_v30  ;;  %v4470_v40 = vld [vmem:[#allocation33_spill] sm:$0xff] }
 0x23f   :  { %4461 = vst [vmem:[#allocation20_spill] sm:$0xff] %v3196_v49  ;;  %v3216_v56 = vmul.f32 %v4470_v40, %v2923_v30  ;;  %v4472_v49 = vld [vmem:[#allocation34_spill] sm:$0xff]  ;;  %v4478_v46 = vld [vmem:[#allocation37_spill] sm:$0xff] }
 0x240   :  { %4463 = vst [vmem:[#allocation21_spill] sm:$0xff] %v3200_v11  ;;  %v3220_v62 = vmul.f32 %v4472_v49, %v2923_v30  ;;  %v4474_v11 = vld [vmem:[#allocation35_spill] sm:$0xff]  ;;  %v4480_v40 = vld [vmem:[#allocation38_spill] sm:$0xff] }
 0x241   :  { %4465 = vst [vmem:[#allocation22_spill] sm:$0xff] %v3204_v61  ;;  %v3224_v53 = vmul.f32 %v4474_v11, %v2923_v30  ;;  %v4476_v61 = vld [vmem:[#allocation36_spill] sm:$0xff]  ;;  %v4482_v49 = vld [vmem:[#allocation39_spill] sm:$0xff] }
 0x242   :  { %4467 = vst [vmem:[#allocation23_spill] sm:$0xff] %v3208_v29  ;;  %v3228_v58 = vmul.f32 %v4476_v61, %v2923_v30  ;;  %v3230_v29 = vperm.slane %v707_v34, 0  ;;  %v4484_v11 = vld [vmem:[#allocation40_spill] sm:$0xff]  ;;  %v4486_v61 = vld [vmem:[#allocation41_spill] sm:$0xff] }
 0x243   :  { %4469 = vst [vmem:[#allocation24_spill] sm:$0xff] %v3212_v22  ;;  %v3234_v22 = vmul.f32 %v4478_v46, %v2923_v30  ;;  %v3250_v34 = vmul.f32 %v4486_v61, %v2923_v30  ;;  %v4493_v61 = vld [vmem:[#allocation45_spill] sm:$0xff] }
 0x244   :  { %4471 = vst [vmem:[#allocation25_spill] sm:$0xff] %v3216_v56  ;;  %v3238_v56 = vmul.f32 %v4480_v40, %v2923_v30  ;;  %v835_v40 = vmul.f32 %v2896_v9, %v2923_v30  ;;  %v4497_v9 = vld [vmem:[#allocation47_spill] sm:$0xff] }
 0x245   :  { %4473 = vst [vmem:[#allocation26_spill] sm:$0xff] %v3220_v62  ;;  %v3242_v62 = vmul.f32 %v4482_v49, %v2923_v30  ;;  %v4490_v49 = vld [vmem:[#allocation43_spill] sm:$0xff] }
 0x246   :  { %4475 = vst [vmem:[#allocation27_spill] sm:$0xff] %v3224_v53  ;;  %v3246_v53 = vmul.f32 %v4484_v11, %v2923_v30  ;;  %v4492_v11 = vld [vmem:[#allocation44_spill] sm:$0xff] }
 0x247   :  { %4477 = vst [vmem:[#allocation28_spill] sm:$0xff] %v3228_v58  ;;  %v4488_v58 = vld [vmem:[#allocation42_spill] sm:$0xff] }
 0x248   :  { %4479 = vst [vmem:[#allocation29_spill] sm:$0xff] %v3234_v22  ;;  %v3254_v46 = vmul.f32 %v4488_v58, %v2923_v30  ;;  %v4495_v58 = vld [vmem:[#allocation46_spill] sm:$0xff]  ;;  %v3278_v22 = vmul.f32 %v4497_v9, %v2923_v30  ;;  %v4506_v9 = vld [vmem:[#allocation51_spill] sm:$0xff] }
 0x249   :  { %4481 = vst [vmem:[#allocation30_spill] sm:$0xff] %v3238_v56  ;;  %v836_v56 = vmul.f32 %v2901_v38, %v2923_v30  ;;  %v4499_v38 = vld [vmem:[#allocation48_spill] sm:$0xff] }
 0x24a   :  { %4483 = vst [vmem:[#allocation31_spill] sm:$0xff] %v3242_v62  ;;  %v3262_v62 = vmul.f32 %v4490_v49, %v2923_v30  ;;  %v3282_v49 = vmul.f32 %v4499_v38, %v2923_v30  ;;  %v4508_v38 = vld [vmem:[#allocation52_spill] sm:$0xff] }
 0x24b   :  { %4485 = vst [vmem:[#allocation32_spill] sm:$0xff] %v3246_v53  ;;  %v3266_v53 = vmul.f32 %v4492_v11, %v2923_v30  ;;  %v3288_v11 = vadd.f32 %v3230_v29, %v836_v56 }
 0x24c   :  { %4487 = vst [vmem:[#allocation33_spill] sm:$0xff] %v3250_v34  ;;  %v3270_v34 = vmul.f32 %v4493_v61, %v2923_v30  ;;  %v4503_v61 = vld [vmem:[#allocation49_spill] sm:$0xff] }
 0x24d   :  { %4489 = vst [vmem:[#allocation34_spill] sm:$0xff] %v3254_v46  ;;  %v3274_v46 = vmul.f32 %v4495_v58, %v2923_v30  ;;  %v4504_v58 = vld [vmem:[#allocation50_spill] sm:$0xff] }
 0x24e   :  { %4491 = vst [vmem:[#allocation35_spill] sm:$0xff] %v3262_v62  ;;  %v3285_v62 = vadd.f32 %v3230_v29, %v835_v40  ;;  %v4510_v40 = vld [vmem:[#allocation53_spill] sm:$0xff] }
 0x24f   :  { %4494 = vst [vmem:[#allocation36_spill] sm:$0xff] %v3270_v34  ;;  %v3292_v34 = vmul.f32 %v4503_v61, %v2923_v30  ;;  %v3308_v56 = vmul.f32 %v4510_v40, %v2923_v30 }
 0x250   :  { %4496 = vst [vmem:[#allocation37_spill] sm:$0xff] %v3274_v46  ;;  %v3296_v46 = vmul.f32 %v4504_v58, %v2923_v30 }
 0x251   :  { %4498 = vst [vmem:[#allocation38_spill] sm:$0xff] %v3278_v22  ;;  %v3300_v22 = vmul.f32 %v4506_v9, %v2923_v30 }
 0x252   :  { %4500 = vst [vmem:[#allocation39_spill] sm:$0xff] %v3282_v49  ;;  %v3304_v49 = vmul.f32 %v4508_v38, %v2923_v30 }
 0x253   :  { %4501 = vst [vmem:[#allocation40_spill] sm:$0xff] %v3285_v62  ;;  %v4514_v62 = vld [vmem:[#allocation55_spill] sm:$0xff] }
 0x254   :  { %4502 = vst [vmem:[#allocation41_spill] sm:$0xff] %v3288_v11  ;;  %v4512_v11 = vld [vmem:[#allocation54_spill] sm:$0xff]  ;;  %v3316_v58 = vmul.f32 %v4514_v62, %v2923_v30 }
 0x255   :  { %4505 = vst [vmem:[#allocation42_spill] sm:$0xff] %v3296_v46  ;;  %v3312_v61 = vmul.f32 %v4512_v11, %v2923_v30  ;;  %v4516_v46 = vld [vmem:[#allocation56_spill] sm:$0xff] }
 0x256   :  { %4507 = vst [vmem:[#allocation43_spill] sm:$0xff] %v3300_v22  ;;  %v3320_v9 = vmul.f32 %v4516_v46, %v2923_v30  ;;  %v4518_v22 = vld [vmem:[#allocation57_spill] sm:$0xff] }
 0x257   :  { %4509 = vst [vmem:[#allocation44_spill] sm:$0xff] %v3304_v49  ;;  %v3324_v38 = vmul.f32 %v4518_v22, %v2923_v30  ;;  %v4520_v49 = vld [vmem:[#allocation58_spill] sm:$0xff] }
 0x258   :  { %4511 = vst [vmem:[#allocation45_spill] sm:$0xff] %v3308_v56  ;;  %v3328_v40 = vmul.f32 %v4520_v49, %v2923_v30  ;;  %v4522_v56 = vld [vmem:[#allocation59_spill] sm:$0xff] }
 0x259   :  { %4513 = vst [vmem:[#allocation46_spill] sm:$0xff] %v3312_v61  ;;  %v3332_v11 = vmul.f32 %v4522_v56, %v2923_v30  ;;  %v4524_v61 = vld [vmem:[#allocation60_spill] sm:$0xff] }
 0x25a   :  { %4515 = vst [vmem:[#allocation47_spill] sm:$0xff] %v3316_v58  ;;  %v3336_v62 = vmul.f32 %v4524_v61, %v2923_v30  ;;  %v4526_v58 = vld [vmem:[#allocation61_spill] sm:$0xff] }
 0x25b   :  { %4517 = vst [vmem:[#allocation48_spill] sm:$0xff] %v3320_v9  ;;  %v3340_v46 = vmul.f32 %v4526_v58, %v2923_v30  ;;  %v4528_v9 = vld [vmem:[#allocation62_spill] sm:$0xff] }
 0x25c   :  { %4519 = vst [vmem:[#allocation49_spill] sm:$0xff] %v3324_v38  ;;  %v3344_v22 = vmul.f32 %v4528_v9, %v2923_v30  ;;  %v4530_v38 = vld [vmem:[#allocation63_spill] sm:$0xff] }
 0x25d   :  { %4521 = vst [vmem:[#allocation50_spill] sm:$0xff] %v3328_v40  ;;  %v3348_v49 = vmul.f32 %v4530_v38, %v2923_v30  ;;  %v4532_v40 = vld [vmem:[#allocation64_spill] sm:$0xff] }
 0x25e   :  { %4523 = vst [vmem:[#allocation51_spill] sm:$0xff] %v3332_v11  ;;  %v3352_v56 = vmul.f32 %v4532_v40, %v2923_v30  ;;  %v4534_v11 = vld [vmem:[#allocation65_spill] sm:$0xff] }
 0x25f   :  { %4525 = vst [vmem:[#allocation52_spill] sm:$0xff] %v3336_v62  ;;  %v3356_v61 = vmul.f32 %v4534_v11, %v2923_v30  ;;  %v4536_v62 = vld [vmem:[#allocation66_spill] sm:$0xff] }
 0x260   :  { %4527 = vst [vmem:[#allocation53_spill] sm:$0xff] %v3340_v46  ;;  %v3360_v58 = vmul.f32 %v4536_v62, %v2923_v30  ;;  %v4538_v46 = vld [vmem:[#allocation67_spill] sm:$0xff] }
 0x261   :  { %4529 = vst [vmem:[#allocation54_spill] sm:$0xff] %v3344_v22  ;;  %v3364_v9 = vmul.f32 %v4538_v46, %v2923_v30  ;;  %v4540_v22 = vld [vmem:[#allocation68_spill] sm:$0xff] }
 0x262   :  { %4531 = vst [vmem:[#allocation55_spill] sm:$0xff] %v3348_v49  ;;  %v3368_v38 = vmul.f32 %v4540_v22, %v2923_v30  ;;  %v4542_v49 = vld [vmem:[#allocation69_spill] sm:$0xff] }
 0x263   :  { %4533 = vst [vmem:[#allocation56_spill] sm:$0xff] %v3352_v56  ;;  %v3372_v40 = vmul.f32 %v4542_v49, %v2923_v30  ;;  %v4544_v56 = vld [vmem:[#allocation70_spill] sm:$0xff] }
 0x264   :  { %4535 = vst [vmem:[#allocation57_spill] sm:$0xff] %v3356_v61  ;;  %v3376_v11 = vmul.f32 %v4544_v56, %v2923_v30  ;;  %v4546_v61 = vld [vmem:[#allocation71_spill] sm:$0xff] }
 0x265   :  { %4537 = vst [vmem:[#allocation58_spill] sm:$0xff] %v3360_v58  ;;  %v3380_v62 = vmul.f32 %v4546_v61, %v2923_v30  ;;  %v4548_v58 = vld [vmem:[#allocation72_spill] sm:$0xff] }
 0x266   :  { %4539 = vst [vmem:[#allocation59_spill] sm:$0xff] %v3364_v9  ;;  %v3384_v46 = vmul.f32 %v4548_v58, %v2923_v30  ;;  %v4550_v9 = vld [vmem:[#allocation73_spill] sm:$0xff] }
 0x267   :  { %4541 = vst [vmem:[#allocation60_spill] sm:$0xff] %v3368_v38  ;;  %v3388_v22 = vmul.f32 %v4550_v9, %v2923_v30  ;;  %v4552_v38 = vld [vmem:[#allocation74_spill] sm:$0xff] }
 0x268   :  { %4543 = vst [vmem:[#allocation61_spill] sm:$0xff] %v3372_v40  ;;  %v3392_v49 = vmul.f32 %v4552_v38, %v2923_v30  ;;  %v4554_v40 = vld [vmem:[#allocation75_spill] sm:$0xff] }
 0x269   :  { %4545 = vst [vmem:[#allocation62_spill] sm:$0xff] %v3376_v11  ;;  %v3396_v56 = vmul.f32 %v4554_v40, %v2923_v30  ;;  %v4556_v11 = vld [vmem:[#allocation76_spill] sm:$0xff] }
 0x26a   :  { %4547 = vst [vmem:[#allocation63_spill] sm:$0xff] %v3380_v62  ;;  %v3400_v61 = vmul.f32 %v4556_v11, %v2923_v30  ;;  %v4558_v62 = vld [vmem:[#allocation77_spill] sm:$0xff] }
 0x26b   :  { %4549 = vst [vmem:[#allocation64_spill] sm:$0xff] %v3384_v46  ;;  %v3404_v58 = vmul.f32 %v4558_v62, %v2923_v30  ;;  %v4560_v46 = vld [vmem:[#allocation78_spill] sm:$0xff] }
 0x26c   :  { %4551 = vst [vmem:[#allocation65_spill] sm:$0xff] %v3388_v22  ;;  %v3408_v9 = vmul.f32 %v4560_v46, %v2923_v30  ;;  %v4562_v22 = vld [vmem:[#allocation79_spill] sm:$0xff] }
 0x26d   :  { %4553 = vst [vmem:[#allocation66_spill] sm:$0xff] %v3392_v49  ;;  %v3412_v38 = vmul.f32 %v4562_v22, %v2923_v30  ;;  %v4564_v49 = vld [vmem:[#allocation80_spill] sm:$0xff] }
 0x26e   :  { %4555 = vst [vmem:[#allocation67_spill] sm:$0xff] %v3396_v56  ;;  %v3416_v40 = vmul.f32 %v4564_v49, %v2923_v30  ;;  %v4566_v56 = vld [vmem:[#allocation81_spill] sm:$0xff] }
 0x26f   :  { %4557 = vst [vmem:[#allocation68_spill] sm:$0xff] %v3400_v61  ;;  %v3420_v11 = vmul.f32 %v4566_v56, %v2923_v30  ;;  %v4568_v61 = vld [vmem:[#allocation82_spill] sm:$0xff] }
 0x270   :  { %4559 = vst [vmem:[#allocation69_spill] sm:$0xff] %v3404_v58  ;;  %v3424_v62 = vmul.f32 %v4568_v61, %v2923_v30  ;;  %v4570_v58 = vld [vmem:[#allocation83_spill] sm:$0xff]  ;;  %v3444_v61 = vadd.f32 %v3230_v29, %v2927_v0  ;;  %v3464_v0 = vadd.f32 %v3230_v29, %v2947_v2  ;;  %v3484_v2 = vadd.f32 %v3230_v29, %v2967_v14 }
 0x271   :  { %4561 = vst [vmem:[#allocation70_spill] sm:$0xff] %v3408_v9  ;;  %v3428_v46 = vmul.f32 %v4570_v58, %v2923_v30  ;;  %v4572_v9 = vld [vmem:[#allocation84_spill] sm:$0xff]  ;;  %v3448_v58 = vadd.f32 %v3230_v29, %v2931_v16  ;;  %v3468_v16 = vadd.f32 %v3230_v29, %v2951_v3  ;;  %v3488_v3 = vadd.f32 %v3230_v29, %v2971_v18 }
 0x272   :  { %4563 = vst [vmem:[#allocation71_spill] sm:$0xff] %v3412_v38  ;;  %v3432_v22 = vmul.f32 %v4572_v9, %v2923_v30  ;;  %v4574_v38 = vld [vmem:[#allocation85_spill] sm:$0xff]  ;;  %v3452_v9 = vadd.f32 %v3230_v29, %v2935_v26  ;;  %v3472_v26 = vadd.f32 %v3230_v29, %v2955_v4  ;;  %v3492_v4 = vadd.f32 %v3230_v29, %v2975_v23 }
 0x273   :  { %4565 = vst [vmem:[#allocation72_spill] sm:$0xff] %v3416_v40  ;;  %v3436_v49 = vmul.f32 %v4574_v38, %v2923_v30  ;;  %v4576_v40 = vld [vmem:[#allocation86_spill] sm:$0xff]  ;;  %v3456_v38 = vadd.f32 %v3230_v29, %v2939_v39  ;;  %v3476_v39 = vadd.f32 %v3230_v29, %v2959_v6  ;;  %v3496_v6 = vadd.f32 %v3230_v29, %v2979_v27 }
 0x274   :  { %4567 = vst [vmem:[#allocation73_spill] sm:$0xff] %v3420_v11  ;;  %v3440_v56 = vmul.f32 %v4576_v40, %v2923_v30  ;;  %v3460_v30 = vadd.f32 %v3230_v29, %v2943_v19  ;;  %v3480_v19 = vadd.f32 %v3230_v29, %v2963_v10  ;;  %v3500_v10 = vadd.f32 %v3230_v29, %v2983_v32  ;;  %v4579_v40 = vld [vmem:[#allocation2_spill] sm:$0xff]  ;;  %v4591_v11 = vld [vmem:[#allocation8_spill] sm:$0xff] }
 0x275   :  { %4569 = vst [vmem:[#allocation74_spill] sm:$0xff] %v3424_v62  ;;  %v3504_v14 = vadd.f32 %v3230_v29, %v2987_v36  ;;  %v3508_v18 = vadd.f32 %v3230_v29, %v2991_v41  ;;  %v3512_v23 = vadd.f32 %v3230_v29, %v2995_v45  ;;  %v3516_v27 = vadd.f32 %v3230_v29, %v3000_v50  ;;  %v4589_v62 = vld [vmem:[#allocation7_spill] sm:$0xff] }
 0x276   :  { %4571 = vst [vmem:[#allocation75_spill] sm:$0xff] %v3428_v46  ;;  %v3520_v32 = vadd.f32 %v3230_v29, %v3004_v54  ;;  %v3524_v36 = vadd.f32 %v3230_v29, %v3008_v59  ;;  %v3528_v41 = vadd.f32 %v3230_v29, %v3012_v63  ;;  %v3532_v45 = vadd.f32 %v3230_v29, %v3016_v8  ;;  %v4587_v46 = vld [vmem:[#allocation6_spill] sm:$0xff] }
 0x277   :  { %4573 = vst [vmem:[#allocation76_spill] sm:$0xff] %v3432_v22  ;;  %v3536_v50 = vadd.f32 %v3230_v29, %v3020_v13  ;;  %v3540_v54 = vadd.f32 %v3230_v29, %v3024_v20  ;;  %v3544_v59 = vadd.f32 %v3230_v29, %v3028_v25  ;;  %v3548_v63 = vadd.f32 %v3230_v29, %v3032_v31  ;;  %v4585_v22 = vld [vmem:[#allocation5_spill] sm:$0xff] }
 0x278   :  { %4575 = vst [vmem:[#allocation77_spill] sm:$0xff] %v3436_v49  ;;  %v3552_v8 = vadd.f32 %v3230_v29, %v3036_v37  ;;  %v3556_v13 = vadd.f32 %v3230_v29, %v3040_v43  ;;  %v3560_v20 = vadd.f32 %v3230_v29, %v3044_v48  ;;  %v3564_v25 = vadd.f32 %v3230_v29, %v3048_v55  ;;  %v4583_v49 = vld [vmem:[#allocation4_spill] sm:$0xff] }
 0x279   :  { %4577 = vst [vmem:[#allocation78_spill] sm:$0xff] %v3440_v56  ;;  %v3568_v31 = vadd.f32 %v3230_v29, %v3052_v60  ;;  %v3572_v37 = vadd.f32 %v3230_v29, %v3056_v5  ;;  %v3576_v43 = vadd.f32 %v3230_v29, %v3060_v12  ;;  %v3580_v48 = vadd.f32 %v3230_v29, %v3064_v21  ;;  %v4581_v56 = vld [vmem:[#allocation3_spill] sm:$0xff] }
 0x27a   :  { %v3584_v55 = vadd.f32 %v3230_v29, %v3068_v28  ;;  %v3588_v60 = vadd.f32 %v3230_v29, %v3072_v35  ;;  %v3592_v5 = vadd.f32 %v3230_v29, %v3076_v42  ;;  %v3596_v12 = vadd.f32 %v3230_v29, %v3080_v51 }
 0x27b   :  { %v3600_v21 = vadd.f32 %v3230_v29, %v3084_v57  ;;  %v3604_v28 = vadd.f32 %v3230_v29, %v3088_v1  ;;  %v3608_v35 = vadd.f32 %v3230_v29, %v3092_v15  ;;  %v3612_v42 = vadd.f32 %v3230_v29, %v3096_v24 }
 0x27c   :  { %v3616_v51 = vadd.f32 %v3230_v29, %v3100_v33  ;;  %v3620_v57 = vadd.f32 %v3230_v29, %v3104_v44  ;;  %v3624_v1 = vadd.f32 %v3230_v29, %v3108_v52  ;;  %v3628_v15 = vadd.f32 %v3230_v29, %v3112_v7 }
 0x27d   :  { %v3632_v24 = vadd.f32 %v3230_v29, %v3116_v17  ;;  %v3636_v33 = vadd.f32 %v3230_v29, %v3120_v47  ;;  %v3640_v44 = vadd.f32 %v3230_v29, %v4579_v40  ;;  %v3644_v52 = vadd.f32 %v3230_v29, %v4581_v56 }
 0x27e   :  { %v3648_v7 = vadd.f32 %v3230_v29, %v4583_v49  ;;  %v3652_v17 = vadd.f32 %v3230_v29, %v4585_v22  ;;  %v3656_v47 = vadd.f32 %v3230_v29, %v4587_v46  ;;  %v3660_v40 = vadd.f32 %v3230_v29, %v4589_v62 }
 0x27f   :  { %4578 = vst [vmem:[#allocation79_spill] sm:$0xff] %v3636_v33  ;;  %v3664_v56 = vadd.f32 %v3230_v29, %v4591_v11  ;;  %v4636_v33 = vld [vmem:[#allocation31_spill] sm:$0xff] }
 0x280   :  { %4580 = vst [vmem:[#allocation80_spill] sm:$0xff] %v3640_v44 }
 0x281   :  { %4582 = vst [vmem:[#allocation81_spill] sm:$0xff] %v3644_v52  ;;  %v4593_v52 = vld [vmem:[#allocation9_spill] sm:$0xff] }
 0x282   :  { %4584 = vst [vmem:[#allocation82_spill] sm:$0xff] %v3648_v7  ;;  %v3668_v49 = vadd.f32 %v3230_v29, %v4593_v52  ;;  %v4595_v7 = vld [vmem:[#allocation10_spill] sm:$0xff] }
 0x283   :  { %4586 = vst [vmem:[#allocation83_spill] sm:$0xff] %v3652_v17  ;;  %v3672_v22 = vadd.f32 %v3230_v29, %v4595_v7  ;;  %v4597_v17 = vld [vmem:[#allocation11_spill] sm:$0xff] }
 0x284   :  { %4588 = vst [vmem:[#allocation84_spill] sm:$0xff] %v3656_v47  ;;  %v3676_v46 = vadd.f32 %v3230_v29, %v4597_v17  ;;  %v4599_v47 = vld [vmem:[#allocation12_spill] sm:$0xff] }
 0x285   :  { %4590 = vst [vmem:[#allocation85_spill] sm:$0xff] %v3660_v40  ;;  %v3680_v62 = vadd.f32 %v3230_v29, %v4599_v47  ;;  %v4601_v40 = vld [vmem:[#allocation13_spill] sm:$0xff] }
 0x286   :  { %4592 = vst [vmem:[#allocation86_spill] sm:$0xff] %v3664_v56  ;;  %v3684_v11 = vadd.f32 %v3230_v29, %v4601_v40  ;;  %v4603_v56 = vld [vmem:[#allocation14_spill] sm:$0xff] }
 0x287   :  { %4594 = vst [vmem:[#allocation2_spill] sm:$0xff] %v3668_v49  ;;  %v3688_v52 = vadd.f32 %v3230_v29, %v4603_v56  ;;  %v4605_v49 = vld [vmem:[#allocation15_spill] sm:$0xff] }
 0x288   :  { %4596 = vst [vmem:[#allocation3_spill] sm:$0xff] %v3672_v22  ;;  %v3692_v7 = vadd.f32 %v3230_v29, %v4605_v49  ;;  %v4607_v22 = vld [vmem:[#allocation16_spill] sm:$0xff] }
 0x289   :  { %4598 = vst [vmem:[#allocation4_spill] sm:$0xff] %v3676_v46  ;;  %v3696_v17 = vadd.f32 %v3230_v29, %v4607_v22  ;;  %v4609_v46 = vld [vmem:[#allocation17_spill] sm:$0xff] }
 0x28a   :  { %4600 = vst [vmem:[#allocation5_spill] sm:$0xff] %v3680_v62  ;;  %v3700_v47 = vadd.f32 %v3230_v29, %v4609_v46  ;;  %v4611_v62 = vld [vmem:[#allocation18_spill] sm:$0xff] }
 0x28b   :  { %4602 = vst [vmem:[#allocation6_spill] sm:$0xff] %v3684_v11  ;;  %v3704_v40 = vadd.f32 %v3230_v29, %v4611_v62  ;;  %v4613_v11 = vld [vmem:[#allocation19_spill] sm:$0xff] }
 0x28c   :  { %4604 = vst [vmem:[#allocation7_spill] sm:$0xff] %v3688_v52  ;;  %v3708_v56 = vadd.f32 %v3230_v29, %v4613_v11  ;;  %v4615_v52 = vld [vmem:[#allocation20_spill] sm:$0xff] }
 0x28d   :  { %4606 = vst [vmem:[#allocation8_spill] sm:$0xff] %v3692_v7  ;;  %v3712_v49 = vadd.f32 %v3230_v29, %v4615_v52  ;;  %v4617_v7 = vld [vmem:[#allocation21_spill] sm:$0xff]  ;;  %v967_v52 = vmax.f32 %v3448_v58, 0.0  ;;  %v973_v58 = vmax.f32 %v3472_v26, 0.0  ;;  %v977_v26 = vmax.f32 %v3488_v3, 0.0 }
 0x28e   :  { %4608 = vst [vmem:[#allocation9_spill] sm:$0xff] %v3696_v17  ;;  %v3716_v22 = vadd.f32 %v3230_v29, %v4617_v7  ;;  %v4619_v17 = vld [vmem:[#allocation22_spill] sm:$0xff]  ;;  %v969_v7 = vmax.f32 %v3456_v38, 0.0  ;;  %v4631_v38 = vld [vmem:[#allocation28_spill] sm:$0xff]  ;;  %v982_v3 = vmax.f32 %v3508_v18, 0.0 }
 0x28f   :  { %4610 = vst [vmem:[#allocation10_spill] sm:$0xff] %v3700_v47  ;;  %v3720_v46 = vadd.f32 %v3230_v29, %v4619_v17  ;;  %v4621_v47 = vld [vmem:[#allocation23_spill] sm:$0xff]  ;;  %v971_v17 = vmax.f32 %v3464_v0, 0.0  ;;  %v974_v0 = vmax.f32 %v3476_v39, 0.0 }
 0x290   :  { %4612 = vst [vmem:[#allocation11_spill] sm:$0xff] %v3704_v40  ;;  %v3724_v62 = vadd.f32 %v3230_v29, %v4621_v47  ;;  %v4623_v40 = vld [vmem:[#allocation24_spill] sm:$0xff] }
 0x291   :  { %4614 = vst [vmem:[#allocation12_spill] sm:$0xff] %v3708_v56  ;;  %v3728_v11 = vadd.f32 %v3230_v29, %v4623_v40  ;;  %v966_v56 = vmax.f32 %v3444_v61, 0.0  ;;  %v972_v61 = vmax.f32 %v3468_v16, 0.0  ;;  %v976_v16 = vmax.f32 %v3484_v2, 0.0 }
 0x292   :  { %4616 = vst [vmem:[#allocation13_spill] sm:$0xff] %v3712_v49  ;;  %v968_v49 = vmax.f32 %v3452_v9, 0.0  ;;  %v3772_v2 = vadd.f32 %v3230_v29, %v4636_v33  ;;  %v4638_v33 = vld [vmem:[#allocation33_spill] sm:$0xff] }
 0x293   :  { %4618 = vst [vmem:[#allocation14_spill] sm:$0xff] %v3716_v22  ;;  %v970_v22 = vmax.f32 %v3460_v30, 0.0  ;;  %v3752_v30 = vadd.f32 %v3230_v29, %v4631_v38  ;;  %v1638_v18 = vpack.c.bf16 %v977_v26, %v976_v16  ;;  %v996_v16 = vmax.f32 %v3564_v25, 0.0 }
 0x294   :  { %4620 = vst [vmem:[#allocation15_spill] sm:$0xff] %v3720_v46  ;;  %v4625_v46 = vld [vmem:[#allocation25_spill] sm:$0xff]  ;;  %v1618_v44 = vpack.c.bf16 %v969_v7, %v968_v49  ;;  %v4639_v7 = vld [vmem:[#allocation34_spill] sm:$0xff]  ;;  %v997_v26 = vmax.f32 %v3568_v31, 0.0 }
 0x295   :  { %4622 = vst [vmem:[#allocation16_spill] sm:$0xff] %v3724_v62  ;;  %v3738_v47 = vadd.f32 %v3230_v29, %v4625_v46  ;;  %v4627_v62 = vld [vmem:[#allocation26_spill] sm:$0xff]  ;;  %v975_v46 = vmax.f32 %v3480_v19, 0.0  ;;  %v1623_v38 = vpack.c.bf16 %v971_v17, %v970_v22  ;;  %v980_v19 = vmax.f32 %v3500_v10, 0.0 }
 0x296   :  { %4624 = vst [vmem:[#allocation17_spill] sm:$0xff] %v3728_v11  ;;  %v3742_v40 = vadd.f32 %v3230_v29, %v4627_v62  ;;  %v4629_v11 = vld [vmem:[#allocation27_spill] sm:$0xff]  ;;  %v984_v10 = vmax.f32 %v3516_v27, 0.0  ;;  %v986_v22 = vmax.f32 %v3524_v36, 0.0  ;;  %v989_v17 = vmax.f32 %v3536_v50, 0.0 }
 0x297   :  { %4626 = vst [vmem:[#allocation18_spill] sm:$0xff] %v3738_v47  ;;  %v3748_v9 = vadd.f32 %v3230_v29, %v4629_v11  ;;  %v4633_v47 = vld [vmem:[#allocation29_spill] sm:$0xff]  ;;  %v979_v11 = vmax.f32 %v3496_v6, 0.0  ;;  %v1633_v6 = vpack.c.bf16 %v975_v46, %v974_v0  ;;  %v3817_v50 = vadd.f32 %v3230_v29, %v3266_v53  ;;  %v4641_v0 = vld [vmem:[#allocation36_spill] sm:$0xff] }
 0x298   :  { %4628 = vst [vmem:[#allocation19_spill] sm:$0xff] %v3742_v40  ;;  %v3758_v62 = vadd.f32 %v3230_v29, %v4633_v47  ;;  %v978_v40 = vmax.f32 %v3492_v4, 0.0  ;;  %v981_v47 = vmax.f32 %v3504_v14, 0.0  ;;  %v983_v4 = vmax.f32 %v3512_v23, 0.0 }
 0x299   :  { %4630 = vst [vmem:[#allocation20_spill] sm:$0xff] %v3748_v9  ;;  %v1613_v9 = vpack.c.bf16 %v967_v52, %v966_v56  ;;  %v4637_v56 = vld [vmem:[#allocation32_spill] sm:$0xff]  ;;  %v985_v14 = vmax.f32 %v3520_v32, 0.0  ;;  %v3790_v23 = vadd.f32 %v3230_v29, %v4638_v33  ;;  %v987_v52 = vmax.f32 %v3528_v41, 0.0 }
 0x29a   :  { %4632 = vst [vmem:[#allocation21_spill] sm:$0xff] %v3752_v30  ;;  %v4635_v30 = vld [vmem:[#allocation30_spill] sm:$0xff]  ;;  %v3781_v49 = vadd.f32 %v3230_v29, %v4637_v56  ;;  %v1643_v27 = vpack.c.bf16 %v979_v11, %v978_v40  ;;  %v3799_v32 = vadd.f32 %v3230_v29, %v4639_v7  ;;  %v1648_v36 = vpack.c.bf16 %v981_v47, %v980_v19  ;;  %v4644_v47 = vld [vmem:[#allocation39_spill] sm:$0xff] }
 0x29b   :  { %4634 = vst [vmem:[#allocation22_spill] sm:$0xff] %v3758_v62  ;;  %v3766_v39 = vadd.f32 %v3230_v29, %v4635_v30  ;;  %v1628_v62 = vpack.c.bf16 %v973_v58, %v972_v61  ;;  %v4640_v61 = vld [vmem:[#allocation35_spill] sm:$0xff]  ;;  %v990_v58 = vmax.f32 %v3540_v54, 0.0  ;;  %v991_v40 = vmax.f32 %v3544_v59, 0.0  ;;  %v4643_v11 = vld [vmem:[#allocation38_spill] sm:$0xff] }
 0x29c   :  { %1614 = vst [vmem:[%s4245_s3] sm:$0xff] %v1613_v9   ;;  %v3808_v41 = vadd.f32 %v3230_v29, %v4640_v61  ;;  %v992_v9 = vmax.f32 %v3548_v63, 0.0  ;;  %v993_v30 = vmax.f32 %v3552_v8, 0.0  ;;  %v1658_v54 = vpack.c.bf16 %v985_v14, %v984_v10  ;;  %v4642_v63 = vld [vmem:[#allocation37_spill] sm:$0xff]  ;;  %v4645_v10 = vld [vmem:[#allocation42_spill] sm:$0xff] }
 0x29d   :  { %1993 = vst [vmem:[%s4245_s3 + $0x8] sm:$0xff] %v1618_v44   ;;  %v988_v44 = vmax.f32 %v3532_v45, 0.0  ;;  %v1653_v45 = vpack.c.bf16 %v983_v4, %v982_v3  ;;  %v3826_v59 = vadd.f32 %v3230_v29, %v4641_v0  ;;  %v994_v46 = vmax.f32 %v3556_v13, 0.0  ;;  %v4649_v61 = vld [vmem:[#allocation46_spill] sm:$0xff] }
 0x29e   :  { %1994 = vst [vmem:[%s4245_s3 + $0x10] sm:$0xff] %v1623_v38   ;;  %v1663_v53 = vpack.c.bf16 %v987_v52, %v986_v22  ;;  %v3835_v8 = vadd.f32 %v3230_v29, %v4642_v63  ;;  %v998_v38 = vmax.f32 %v3572_v37, 0.0  ;;  %v999_v19 = vmax.f32 %v3576_v43, 0.0  ;;  %v4647_v52 = vld [vmem:[#allocation44_spill] sm:$0xff]  ;;  %v4655_v63 = vld [vmem:[#allocation82_spill] sm:$0xff] }
 0x29f   :  { %1995 = vst [vmem:[%s4245_s3 + $0x18] sm:$0xff] %v1628_v62   ;;  %v995_v62 = vmax.f32 %v3560_v20, 0.0  ;;  %v1668_v13 = vpack.c.bf16 %v989_v17, %v988_v44  ;;  %v3844_v20 = vadd.f32 %v3230_v29, %v4643_v11  ;;  %v1673_v25 = vpack.c.bf16 %v991_v40, %v990_v58  ;;  %v4648_v44 = vld [vmem:[#allocation45_spill] sm:$0xff] }
 0x2a0   :  { %1996 = vst [vmem:[%s4245_s3 + $0x20] sm:$0xff] %v1633_v6   ;;  %v3853_v31 = vadd.f32 %v3230_v29, %v4644_v47  ;;  %v1000_v3 = vmax.f32 %v3580_v48, 0.0  ;;  %v1001_v4 = vmax.f32 %v3584_v55, 0.0  ;;  %v1678_v37 = vpack.c.bf16 %v993_v30, %v992_v9  ;;  %v4651_v9 = vld [vmem:[#allocation79_spill] sm:$0xff] }
 0x2a1   :  { %1997 = vst [vmem:[%s4245_s3 + $0x28] sm:$0xff] %v1638_v18   ;;  %v3862_v43 = vadd.f32 %v3230_v29, %v3292_v34  ;;  %v1002_v6 = vmax.f32 %v3588_v60, 0.0  ;;  %v1003_v56 = vmax.f32 %v3592_v5, 0.0  ;;  %v1683_v48 = vpack.c.bf16 %v995_v62, %v994_v46  ;;  %v4646_v60 = vld [vmem:[#allocation43_spill] sm:$0xff]  ;;  %v4653_v46 = vld [vmem:[#allocation48_spill] sm:$0xff]  ;;  %v4654_v62 = vld [vmem:[#allocation81_spill] sm:$0xff] }
 0x2a2   :  { %1998 = vst [vmem:[%s4245_s3 + $0x30] sm:$0xff] %v1643_v27   ;;  %v3871_v55 = vadd.f32 %v3230_v29, %v4645_v10  ;;  %v1004_v14 = vmax.f32 %v3596_v12, 0.0  ;;  %v1005_v18 = vmax.f32 %v3600_v21, 0.0  ;;  %v1688_v34 = vpack.c.bf16 %v997_v26, %v996_v16 }
 0x2a3   :  { %1999 = vst [vmem:[%s4245_s3 + $0x38] sm:$0xff] %v1648_v36   ;;  %v3880_v5 = vadd.f32 %v3230_v29, %v4646_v60  ;;  %v1006_v33 = vmax.f32 %v3604_v28, 0.0  ;;  %v1007_v22 = vmax.f32 %v3608_v35, 0.0  ;;  %v1693_v12 = vpack.c.bf16 %v999_v19, %v998_v38  ;;  %v4657_v38 = vld [vmem:[#allocation83_spill] sm:$0xff]  ;;  %v4663_v60 = vld [vmem:[#allocation2_spill] sm:$0xff] }
 0x2a4   :  { %2000 = vst [vmem:[%s4245_s3 + $0x40] sm:$0xff] %v1653_v45   ;;  %v3889_v21 = vadd.f32 %v3230_v29, %v4647_v52  ;;  %v1008_v27 = vmax.f32 %v3612_v42, 0.0  ;;  %v1009_v7 = vmax.f32 %v3616_v51, 0.0  ;;  %v1698_v28 = vpack.c.bf16 %v1001_v4, %v1000_v3  ;;  %v4650_v45 = vld [vmem:[#allocation47_spill] sm:$0xff]  ;;  %v4659_v4 = vld [vmem:[#allocation50_spill] sm:$0xff] }
 0x2a5   :  { %2001 = vst [vmem:[%s4245_s3 + $0x48] sm:$0xff] %v1658_v54   ;;  %v3898_v35 = vadd.f32 %v3230_v29, %v4648_v44  ;;  %v1010_v17 = vmax.f32 %v3620_v57, 0.0  ;;  %v1011_v36 = vmax.f32 %v3624_v1, 0.0  ;;  %v1703_v42 = vpack.c.bf16 %v1003_v56, %v1002_v6  ;;  %v4652_v54 = vld [vmem:[#allocation80_spill] sm:$0xff]  ;;  %v4660_v6 = vld [vmem:[#allocation85_spill] sm:$0xff] }
 0x2a6   :  { %2002 = vst [vmem:[%s4245_s3 + $0x50] sm:$0xff] %v1663_v53   ;;  %v3907_v51 = vadd.f32 %v3230_v29, %v4649_v61  ;;  %v1012_v58 = vmax.f32 %v3628_v15, 0.0  ;;  %v1013_v40 = vmax.f32 %v3632_v24, 0.0  ;;  %v1708_v57 = vpack.c.bf16 %v1005_v18, %v1004_v14  ;;  %v4662_v18 = vld [vmem:[#allocation51_spill] sm:$0xff]  ;;  %v4668_v61 = vld [vmem:[#allocation53_spill] sm:$0xff] }
 0x2a7   :  { %2003 = vst [vmem:[%s4245_s3 + $0x58] sm:$0xff] %v1668_v13   ;;  %v3916_v1 = vadd.f32 %v3230_v29, %v4650_v45  ;;  %v1014_v30 = vmax.f32 %v4651_v9, 0.0  ;;  %v1015_v0 = vmax.f32 %v4652_v54, 0.0  ;;  %v1713_v15 = vpack.c.bf16 %v1007_v22, %v1006_v33  ;;  %v4656_v13 = vld [vmem:[#allocation49_spill] sm:$0xff]  ;;  %v4664_v22 = vld [vmem:[#allocation3_spill] sm:$0xff]  ;;  %v4671_v54 = vld [vmem:[#allocation8_spill] sm:$0xff] }
 0x2a8   :  { %2004 = vst [vmem:[%s4245_s3 + $0x60] sm:$0xff] %v1673_v25   ;;  %v3925_v24 = vadd.f32 %v3230_v29, %v4653_v46  ;;  %v1016_v53 = vmax.f32 %v4654_v62, 0.0  ;;  %v1017_v16 = vmax.f32 %v4655_v63, 0.0  ;;  %v1718_v26 = vpack.c.bf16 %v1009_v7, %v1008_v27  ;;  %v4658_v25 = vld [vmem:[#allocation84_spill] sm:$0xff]  ;;  %v4670_v45 = vld [vmem:[#allocation7_spill] sm:$0xff]  ;;  %v4673_v62 = vld [vmem:[#allocation10_spill] sm:$0xff] }
 0x2a9   :  { %2005 = vst [vmem:[%s4245_s3 + $0x68] sm:$0xff] %v1678_v37   ;;  %v3934_v11 = vadd.f32 %v3230_v29, %v4656_v13  ;;  %v1018_v19 = vmax.f32 %v4657_v38, 0.0  ;;  %v1019_v47 = vmax.f32 %v4658_v25, 0.0  ;;  %v1723_v3 = vpack.c.bf16 %v1011_v36, %v1010_v17  ;;  %v4665_v27 = vld [vmem:[#allocation52_spill] sm:$0xff]  ;;  %v4667_v17 = vld [vmem:[#allocation5_spill] sm:$0xff] }
 0x2aa   :  { %2006 = vst [vmem:[%s4245_s3 + $0x70] sm:$0xff] %v1683_v48   ;;  %v3943_v37 = vadd.f32 %v3230_v29, %v4659_v4  ;;  %v1020_v56 = vmax.f32 %v4660_v6, 0.0  ;;  %v4661_v48 = vld [vmem:[#allocation86_spill] sm:$0xff]  ;;  %v1728_v14 = vpack.c.bf16 %v1013_v40, %v1012_v58  ;;  %v1022_v33 = vmax.f32 %v4663_v60, 0.0  ;;  %v4675_v13 = vld [vmem:[#allocation40_spill] sm:$0xff]  ;;  %v4676_v25 = vld [vmem:[#allocation41_spill] sm:$0xff] }
 0x2ab   :  { %2007 = vst [vmem:[%s4245_s3 + $0x78] sm:$0xff] %v1688_v34   ;;  %v1021_v10 = vmax.f32 %v4661_v48, 0.0  ;;  %v3952_v34 = vadd.f32 %v3230_v29, %v4662_v18  ;;  %v1733_v52 = vpack.c.bf16 %v1015_v0, %v1014_v30  ;;  %v3961_v7 = vadd.f32 %v3230_v29, %v4665_v27  ;;  %v4669_v40 = vld [vmem:[#allocation6_spill] sm:$0xff]  ;;  %v4678_v6 = vld [vmem:[#allocation12_spill] sm:$0xff]  ;;  %v4679_v18 = vld [vmem:[#allocation13_spill] sm:$0xff] }
 0x2ac   :  { %2008 = vst [vmem:[%s4245_s3 + $0x80] sm:$0xff] %v1693_v12   ;;  %v1023_v12 = vmax.f32 %v4664_v22, 0.0  ;;  %v1025_v36 = vmax.f32 %v4667_v17, 0.0  ;;  %v3970_v58 = vadd.f32 %v3230_v29, %v4668_v61  ;;  %v1027_v9 = vmax.f32 %v4670_v45, 0.0  ;;  %v4681_v22 = vld [vmem:[#allocation14_spill] sm:$0xff]  ;;  %v4684_v61 = vld [vmem:[#allocation16_spill] sm:$0xff] }
 0x2ad   :  { %2009 = vst [vmem:[%s4245_s3 + $0x88] sm:$0xff] %v1698_v28   ;;  %v4666_v28 = vld [vmem:[#allocation4_spill] sm:$0xff]  ;;  %v1743_v30 = vpack.c.bf16 %v1019_v47, %v1018_v19  ;;  %v1028_v0 = vmax.f32 %v4671_v54, 0.0  ;;  %v1030_v63 = vmax.f32 %v4673_v62, 0.0  ;;  %v1092_v38 = vmax.f32 %v4675_v13, 0.0  ;;  %v4677_v47 = vld [vmem:[#allocation54_spill] sm:$0xff] }
 0x2ae   :  { %2010 = vst [vmem:[%s4245_s3 + $0x90] sm:$0xff] %v1703_v42   ;;  %v1024_v44 = vmax.f32 %v4666_v28, 0.0  ;;  %v1738_v42 = vpack.c.bf16 %v1017_v16, %v1016_v53  ;;  %v1748_v53 = vpack.c.bf16 %v1021_v10, %v1020_v56  ;;  %v4674_v16 = vld [vmem:[#allocation11_spill] sm:$0xff]  ;;  %v1093_v4 = vmax.f32 %v4676_v25, 0.0  ;;  %v4683_v28 = vld [vmem:[#allocation56_spill] sm:$0xff]  ;;  %v4686_v45 = vld [vmem:[#allocation18_spill] sm:$0xff] }
 0x2af   :  { %2011 = vst [vmem:[%s4245_s3 + $0x98] sm:$0xff] %v1708_v57   ;;  %v1026_v57 = vmax.f32 %v4669_v40, 0.0  ;;  %v1753_v19 = vpack.c.bf16 %v1023_v12, %v1022_v33  ;;  %v1032_v48 = vmax.f32 %v4678_v6, 0.0  ;;  %v4680_v10 = vld [vmem:[#allocation55_spill] sm:$0xff]  ;;  %v4009_v17 = vadd.f32 %v3230_v29, %v4683_v28  ;;  %v4689_v13 = vld [vmem:[#allocation20_spill] sm:$0xff]  ;;  %v4696_v28 = vld [vmem:[#allocation62_spill] sm:$0xff] }
 0x2b0   :  { %2012 = vst [vmem:[%s4245_s3 + $0xa0] sm:$0xff] %v1713_v15   ;;  %v4672_v15 = vld [vmem:[#allocation9_spill] sm:$0xff]  ;;  %v1758_v56 = vpack.c.bf16 %v1025_v36, %v1024_v44  ;;  %v4000_v60 = vadd.f32 %v3230_v29, %v4680_v10  ;;  %v4682_v33 = vld [vmem:[#allocation15_spill] sm:$0xff]  ;;  %v1038_v54 = vmax.f32 %v4686_v45, 0.0  ;;  %v1040_v25 = vmax.f32 %v4689_v13, 0.0  ;;  %v4694_v10 = vld [vmem:[#allocation60_spill] sm:$0xff] }
 0x2b1   :  { %2013 = vst [vmem:[%s4245_s3 + $0xa8] sm:$0xff] %v1718_v26   ;;  %v1029_v46 = vmax.f32 %v4672_v15, 0.0  ;;  %v1031_v26 = vmax.f32 %v4674_v16, 0.0  ;;  %v1035_v12 = vmax.f32 %v4682_v33, 0.0  ;;  %v1763_v27 = vpack.c.bf16 %v1027_v9, %v1026_v57  ;;  %v4685_v44 = vld [vmem:[#allocation17_spill] sm:$0xff]  ;;  %v4687_v15 = vld [vmem:[#allocation19_spill] sm:$0xff] }
 0x2b2   :  { %2014 = vst [vmem:[%s4245_s3 + $0xb0] sm:$0xff] %v1723_v3   ;;  %v3991_v3 = vadd.f32 %v3230_v29, %v4677_v47  ;;  %v1037_v36 = vmax.f32 %v4685_v44, 0.0  ;;  %v1039_v62 = vmax.f32 %v4687_v15, 0.0  ;;  %v4021_v9 = vpack.c.bf16 %v1093_v4, %v1092_v38  ;;  %v4690_v47 = vld [vmem:[#allocation21_spill] sm:$0xff]  ;;  %v4697_v44 = vld [vmem:[#allocation63_spill] sm:$0xff]  ;;  %v4698_v45 = vld [vmem:[#allocation64_spill] sm:$0xff] }
 0x2b3   :  { %2015 = vst [vmem:[%s4245_s3 + $0xb8] sm:$0xff] %v1728_v14   ;;  %v1033_v14 = vmax.f32 %v4679_v18, 0.0  ;;  %v1768_v40 = vpack.c.bf16 %v1029_v46, %v1028_v0  ;;  %v1773_v57 = vpack.c.bf16 %v1031_v26, %v1030_v63  ;;  %v4691_v46 = vld [vmem:[#allocation58_spill] sm:$0xff]  ;;  %v1043_v38 = vmax.f32 %v3766_v39, 0.0  ;;  %v4695_v33 = vld [vmem:[#allocation61_spill] sm:$0xff] }
 0x2b4   :  { %2016 = vst [vmem:[%s4245_s3 + $0xc0] sm:$0xff] %v1733_v52   ;;  %v1034_v52 = vmax.f32 %v4681_v22, 0.0  ;;  %v4034_v6 = vadd.f32 %v3230_v29, %v4691_v46  ;;  %v4692_v63 = vld [vmem:[#allocation22_spill] sm:$0xff]  ;;  %v4052_v39 = vadd.f32 %v3230_v29, %v4694_v10  ;;  %v1046_v22 = vmax.f32 %v3790_v23, 0.0 }
 0x2b5   :  { %2017 = vst [vmem:[%s4245_s3 + $0xc8] sm:$0xff] %v1738_v42   ;;  %v1036_v42 = vmax.f32 %v4684_v61, 0.0  ;;  %v1778_v0 = vpack.c.bf16 %v1033_v14, %v1032_v48  ;;  %v1042_v26 = vmax.f32 %v4692_v63, 0.0  ;;  %v1045_v48 = vmax.f32 %v3781_v49, 0.0  ;;  %v4700_v13 = vld [vmem:[#allocation66_spill] sm:$0xff]  ;;  %v4702_v63 = vld [vmem:[#allocation68_spill] sm:$0xff] }
 0x2b6   :  { %2018 = vst [vmem:[%s4245_s3 + $0xd0] sm:$0xff] %v1743_v30   ;;  %v4688_v30 = vld [vmem:[#allocation57_spill] sm:$0xff]  ;;  %v1783_v4 = vpack.c.bf16 %v1035_v12, %v1034_v52  ;;  %v1047_v52 = vmax.f32 %v3799_v32, 0.0  ;;  %v4061_v49 = vadd.f32 %v3230_v29, %v4695_v33  ;;  %v1048_v12 = vmax.f32 %v3808_v41, 0.0 }
 0x2b7   :  { %2019 = vst [vmem:[%s4245_s3 + $0xd8] sm:$0xff] %v1748_v53   ;;  %v4025_v16 = vadd.f32 %v3230_v29, %v4688_v30  ;;  %v1041_v53 = vmax.f32 %v4690_v47, 0.0  ;;  %v1788_v14 = vpack.c.bf16 %v1037_v36, %v1036_v42  ;;  %v4070_v32 = vadd.f32 %v3230_v29, %v4696_v28 }
 0x2b8   :  { %2020 = vst [vmem:[%s4245_s3 + $0xe0] sm:$0xff] %v1753_v19   ;;  %v4693_v19 = vld [vmem:[#allocation59_spill] sm:$0xff]  ;;  %v1050_v61 = vmax.f32 %v3826_v59, 0.0  ;;  %v1051_v42 = vmax.f32 %v3835_v8, 0.0  ;;  %v1803_v41 = vpack.c.bf16 %v1043_v38, %v1042_v26  ;;  %v1052_v36 = vmax.f32 %v3844_v20, 0.0 }
 0x2b9   :  { %2021 = vst [vmem:[%s4245_s3 + $0xe8] sm:$0xff] %v1758_v56   ;;  %v4043_v18 = vadd.f32 %v3230_v29, %v4693_v19  ;;  %v1044_v56 = vmax.f32 %v3772_v2, 0.0  ;;  %v1793_v2 = vpack.c.bf16 %v1039_v62, %v1038_v54  ;;  %v1798_v23 = vpack.c.bf16 %v1041_v53, %v1040_v25  ;;  %v4699_v62 = vld [vmem:[#allocation65_spill] sm:$0xff]  ;;  %v4701_v53 = vld [vmem:[#allocation67_spill] sm:$0xff] }
 0x2ba   :  { %2022 = vst [vmem:[%s4245_s3 + $0xf0] sm:$0xff] %v1763_v27   ;;  %v1049_v27 = vmax.f32 %v3817_v50, 0.0  ;;  %v4079_v50 = vadd.f32 %v3230_v29, %v4697_v44  ;;  %v4088_v8 = vadd.f32 %v3230_v29, %v4698_v45  ;;  %v1054_v54 = vmax.f32 %v3862_v43, 0.0 }
 0x2bb   :  { %2023 = vst [vmem:[%s4245_s3 + $0xf8] sm:$0xff] %v1768_v40   ;;  %v1053_v40 = vmax.f32 %v3853_v31, 0.0  ;;  %v1808_v59 = vpack.c.bf16 %v1045_v48, %v1044_v56  ;;  %v1055_v15 = vmax.f32 %v3871_v55, 0.0  ;;  %v1813_v20 = vpack.c.bf16 %v1047_v52, %v1046_v22  ;;  %v4704_v48 = vld [vmem:[#allocation70_spill] sm:$0xff] }
 0x2bc   :  { %2024 = vst [vmem:[%s4245_s3 + $0x100] sm:$0xff] %v1773_v57   ;;  %v4097_v31 = vadd.f32 %v3230_v29, %v4699_v62  ;;  %v1056_v57 = vmax.f32 %v3880_v5, 0.0  ;;  %v1057_v30 = vmax.f32 %v3889_v21, 0.0  ;;  %v1818_v43 = vpack.c.bf16 %v1049_v27, %v1048_v12 }
 0x2bd   :  { %2025 = vst [vmem:[%s4245_s3 + $0x108] sm:$0xff] %v1778_v0   ;;  %v4106_v55 = vadd.f32 %v3230_v29, %v4700_v13  ;;  %v1058_v25 = vmax.f32 %v3898_v35, 0.0  ;;  %v1059_v47 = vmax.f32 %v3907_v51, 0.0  ;;  %v1823_v5 = vpack.c.bf16 %v1051_v42, %v1050_v61 }
 0x2be   :  { %2026 = vst [vmem:[%s4245_s3 + $0x110] sm:$0xff] %v1783_v4   ;;  %v4115_v21 = vadd.f32 %v3230_v29, %v4701_v53  ;;  %v1060_v0 = vmax.f32 %v3916_v1, 0.0  ;;  %v1061_v46 = vmax.f32 %v3925_v24, 0.0  ;;  %v1828_v35 = vpack.c.bf16 %v1053_v40, %v1052_v36  ;;  %v4703_v4 = vld [vmem:[#allocation69_spill] sm:$0xff] }
 0x2bf   :  { %2027 = vst [vmem:[%s4245_s3 + $0x118] sm:$0xff] %v1788_v14   ;;  %v4124_v51 = vadd.f32 %v3230_v29, %v4702_v63  ;;  %v1062_v26 = vmax.f32 %v3934_v11, 0.0  ;;  %v1063_v38 = vmax.f32 %v3943_v37, 0.0  ;;  %v1833_v1 = vpack.c.bf16 %v1055_v15, %v1054_v54 }
 0x2c0   :  { %2028 = vst [vmem:[%s4245_s3 + $0x120] sm:$0xff] %v1793_v2   ;;  %v4133_v24 = vadd.f32 %v3230_v29, %v4703_v4  ;;  %v1064_v19 = vmax.f32 %v3952_v34, 0.0  ;;  %v1065_v56 = vmax.f32 %v3961_v7, 0.0  ;;  %v1838_v11 = vpack.c.bf16 %v1057_v30, %v1056_v57  ;;  %v4705_v34 = vld [vmem:[#allocation71_spill] sm:$0xff] }
 0x2c1   :  { %2029 = vst [vmem:[%s4245_s3 + $0x128] sm:$0xff] %v1798_v23   ;;  %v955_v37 = vadd.f32 %v3230_v29, %v4704_v48  ;;  %v1066_v14 = vmax.f32 %v3970_v58, 0.0  ;;  %v1067_v10 = vmax.f32 %v3991_v3, 0.0  ;;  %v1843_v22 = vpack.c.bf16 %v1059_v47, %v1058_v25  ;;  %v4706_v58 = vld [vmem:[#allocation72_spill] sm:$0xff] }
 0x2c2   :  { %2030 = vst [vmem:[%s4245_s3 + $0x130] sm:$0xff] %v1803_v41   ;;  %v956_v7 = vadd.f32 %v3230_v29, %v4705_v34  ;;  %v1068_v52 = vmax.f32 %v4000_v60, 0.0  ;;  %v1069_v2 = vmax.f32 %v4009_v17, 0.0  ;;  %v1848_v33 = vpack.c.bf16 %v1061_v46, %v1060_v0  ;;  %v4707_v60 = vld [vmem:[#allocation73_spill] sm:$0xff] }
 0x2c3   :  { %2031 = vst [vmem:[%s4245_s3 + $0x138] sm:$0xff] %v1808_v59   ;;  %v957_v3 = vadd.f32 %v3230_v29, %v4706_v58  ;;  %v1070_v12 = vmax.f32 %v4025_v16, 0.0  ;;  %v1071_v27 = vmax.f32 %v4034_v6, 0.0  ;;  %v1853_v23 = vpack.c.bf16 %v1063_v38, %v1062_v26  ;;  %v4708_v16 = vld [vmem:[#allocation74_spill] sm:$0xff] }
 0x2c4   :  { %2032 = vst [vmem:[%s4245_s3 + $0x140] sm:$0xff] %v1813_v20   ;;  %v958_v17 = vadd.f32 %v3230_v29, %v4707_v60  ;;  %v1072_v28 = vmax.f32 %v4043_v18, 0.0  ;;  %v1073_v61 = vmax.f32 %v4052_v39, 0.0  ;;  %v1858_v42 = vpack.c.bf16 %v1065_v56, %v1064_v19  ;;  %v4709_v18 = vld [vmem:[#allocation75_spill] sm:$0xff] }
 0x2c5   :  { %2033 = vst [vmem:[%s4245_s3 + $0x148] sm:$0xff] %v1818_v43   ;;  %v959_v6 = vadd.f32 %v3230_v29, %v4708_v16  ;;  %v1074_v41 = vmax.f32 %v4061_v49, 0.0  ;;  %v1075_v44 = vmax.f32 %v4070_v32, 0.0  ;;  %v1863_v36 = vpack.c.bf16 %v1067_v10, %v1066_v14  ;;  %v4710_v49 = vld [vmem:[#allocation76_spill] sm:$0xff] }
 0x2c6   :  { %2034 = vst [vmem:[%s4245_s3 + $0x150] sm:$0xff] %v1823_v5   ;;  %v960_v39 = vadd.f32 %v3230_v29, %v4709_v18  ;;  %v1076_v40 = vmax.f32 %v4079_v50, 0.0  ;;  %v1077_v59 = vmax.f32 %v4088_v8, 0.0  ;;  %v1868_v45 = vpack.c.bf16 %v1069_v2, %v1068_v52  ;;  %v4711_v50 = vld [vmem:[#allocation77_spill] sm:$0xff] }
 0x2c7   :  { %2035 = vst [vmem:[%s4245_s3 + $0x158] sm:$0xff] %v1828_v35   ;;  %v961_v32 = vadd.f32 %v3230_v29, %v4710_v49  ;;  %v1078_v54 = vmax.f32 %v4097_v31, 0.0  ;;  %v1079_v15 = vmax.f32 %v4106_v55, 0.0  ;;  %v1873_v20 = vpack.c.bf16 %v1071_v27, %v1070_v12  ;;  %v4712_v31 = vld [vmem:[#allocation78_spill] sm:$0xff] }
 0x2c8   :  { %2036 = vst [vmem:[%s4245_s3 + $0x160] sm:$0xff] %v1833_v1   ;;  %v962_v8 = vadd.f32 %v3230_v29, %v4711_v50  ;;  %v1080_v62 = vmax.f32 %v4115_v21, 0.0  ;;  %v1081_v57 = vmax.f32 %v4124_v51, 0.0  ;;  %v1878_v30 = vpack.c.bf16 %v1073_v61, %v1072_v28 }
 0x2c9   :  { %2037 = vst [vmem:[%s4245_s3 + $0x168] sm:$0xff] %v1838_v11   ;;  %v963_v43 = vadd.f32 %v3230_v29, %v4712_v31  ;;  %v1082_v13 = vmax.f32 %v4133_v24, 0.0  ;;  %v1083_v55 = vmax.f32 %v955_v37, 0.0  ;;  %v1883_v25 = vpack.c.bf16 %v1075_v44, %v1074_v41 }
 0x2ca   :  { %2038 = vst [vmem:[%s4245_s3 + $0x170] sm:$0xff] %v1843_v22   ;;  %v1084_v47 = vmax.f32 %v956_v7, 0.0  ;;  %v1085_v5 = vmax.f32 %v957_v3, 0.0  ;;  %v1888_v53 = vpack.c.bf16 %v1077_v59, %v1076_v40  ;;  %v1086_v21 = vmax.f32 %v958_v17, 0.0 }
 0x2cb   :  { %2039 = vst [vmem:[%s4245_s3 + $0x178] sm:$0xff] %v1848_v33   ;;  %v1087_v0 = vmax.f32 %v959_v6, 0.0  ;;  %v1893_v29 = vpack.c.bf16 %v1079_v15, %v1078_v54  ;;  %v1088_v46 = vmax.f32 %v960_v39, 0.0  ;;  %v1089_v35 = vmax.f32 %v961_v32, 0.0 }
 0x2cc   :  { %2040 = vst [vmem:[%s4245_s3 + $0x180] sm:$0xff] %v1853_v23   ;;  %v1898_v63 = vpack.c.bf16 %v1081_v57, %v1080_v62  ;;  %v1090_v51 = vmax.f32 %v962_v8, 0.0  ;;  %v1091_v26 = vmax.f32 %v963_v43, 0.0  ;;  %v1903_v38 = vpack.c.bf16 %v1083_v55, %v1082_v13 }
 0x2cd   :  { %2041 = vst [vmem:[%s4245_s3 + $0x188] sm:$0xff] %v1858_v42   ;;  %v1908_v1 = vpack.c.bf16 %v1085_v5, %v1084_v47  ;;  %v1913_v4 = vpack.c.bf16 %v1087_v0, %v1086_v21  ;;  %v1918_v24 = vpack.c.bf16 %v1089_v35, %v1088_v46 }
 0x2ce   :  { %2042 = vst [vmem:[%s4245_s3 + $0x190] sm:$0xff] %v1863_v36   ;;  %v1923_v19 = vpack.c.bf16 %v1091_v26, %v1090_v51 }
 0x2cf   :  { %2043 = vst [vmem:[%s4245_s3 + $0x198] sm:$0xff] %v1868_v45  }
 0x2d0   :  { %2044 = vst [vmem:[%s4245_s3 + $0x1a0] sm:$0xff] %v1873_v20  }
 0x2d1   :  { %2045 = vst [vmem:[%s4245_s3 + $0x1a8] sm:$0xff] %v1878_v30  }
 0x2d2   :  { %2046 = vst [vmem:[%s4245_s3 + $0x1b0] sm:$0xff] %v1883_v25  }
 0x2d3   :  { %2047 = vst [vmem:[%s4245_s3 + $0x1b8] sm:$0xff] %v1888_v53  }
 0x2d4   :  { %2048 = vst [vmem:[%s4245_s3 + $0x1c0] sm:$0xff] %v1893_v29  }
 0x2d5   :  { %2049 = vst [vmem:[%s4245_s3 + $0x1c8] sm:$0xff] %v1898_v63  }
 0x2d6   :  { %2050 = vst [vmem:[%s4245_s3 + $0x1d0] sm:$0xff] %v1903_v38  }
 0x2d7   :  { %2051 = vst [vmem:[%s4245_s3 + $0x1d8] sm:$0xff] %v1908_v1  }
 0x2d8   :  { %2052 = vst [vmem:[%s4245_s3 + $0x1e0] sm:$0xff] %v1913_v4  }
 0x2d9   :  { %2053 = vst [vmem:[%s4245_s3 + $0x1e8] sm:$0xff] %v1918_v24  }
 0x2da   :  { %2054 = vst [vmem:[%s4245_s3 + $0x1f0] sm:$0xff] %v1923_v19  }
 0x2db   :  { %2055 = vst [vmem:[%s4245_s3 + $0x1f8] sm:$0xff] %v4021_v9  }

</bundles_post_ra>
